<compile_context>
chip_gen: v7x
topology: tpu7x:2x2x1
jax: 0.10.0
libtpu: 0.0.40
codegen_flags: <defaults>
</compile_context>

<pallas_src>
import functools

import jax
import jax.numpy as jnp
from jax.experimental import pallas as pl
from jax.experimental.pallas import tpu as pltpu

_VMEM_LIMIT = 32 * 1024 * 1024  # safe on v5e/v6e (128 MiB phys) and v7x (64 MiB phys)


def _pick_row_tile(rows, cap=256):
    """Largest row tile <= cap that divides `rows` (multiple of 8), else full rows."""
    if rows <= cap:
        return rows
    for t in range(cap, 7, -8):
        if rows % t == 0:
            return t
    return rows


def _gelu(x):
    return jax.nn.gelu(x, approximate=True)


# ---------------------------------------------------------------------------
# Kernels
# ---------------------------------------------------------------------------
def ln_matmul_kernel(x_ref, g_ref, b_ref, w_ref, wb_ref, o_ref, *, eps):
    # x_ref: (TM, C)  g/b: (1, C)  w: (C, Dout)  wb: (1, Dout)  o: (TM, Dout)
    x = x_ref[...].astype(jnp.float32)
    mu = jnp.mean(x, axis=-1, keepdims=True)
    xc = x - mu
    var = jnp.mean(xc * xc, axis=-1, keepdims=True)
    xn = xc * jax.lax.rsqrt(var + eps)
    h = xn * g_ref[...].astype(jnp.float32) + b_ref[...].astype(jnp.float32)
    y = jnp.dot(h, w_ref[...].astype(jnp.float32),
                preferred_element_type=jnp.float32)
    y = y + wb_ref[...].astype(jnp.float32)
    o_ref[...] = y.astype(o_ref.dtype)


def attn_kernel(q_ref, k_ref, v_ref, o_ref, *, scale):
    # q/k/v refs: (1, N, d)
    q = q_ref[0].astype(jnp.float32)
    k = k_ref[0].astype(jnp.float32)
    v = v_ref[0].astype(jnp.float32)
    # q @ k^T without an explicit in-kernel transpose.
    s = jax.lax.dot_general(q, k, (((1,), (1,)), ((), ())),
                            preferred_element_type=jnp.float32) * scale
    m = jnp.max(s, axis=-1, keepdims=True)
    p = jnp.exp(s - m)
    l = jnp.sum(p, axis=-1, keepdims=True)
    attn = p / l
    out = jnp.dot(attn, v, preferred_element_type=jnp.float32)
    o_ref[0] = out.astype(o_ref.dtype)


def dwconv_gelu_kernel(x_ref, w_ref, b_ref, o_ref):
    # x_ref: (1, H+2, W+2, C) spatially pre-padded, channels-last (lane axis = C)
    # w_ref: (9, C)   b_ref: (1, C)   o_ref: (1, H, W, C)
    xp = x_ref[0].astype(jnp.float32)
    w = w_ref[...].astype(jnp.float32)
    hp2, wp2, c = xp.shape
    H, W = hp2 - 2, wp2 - 2
    acc = jnp.zeros((H, W, c), jnp.float32)
    for k in range(9):                       # short static unroll: 9 VPU mul-adds
        di, dj = k // 3, k % 3
        acc = acc + xp[di:di + H, dj:dj + W, :] * w[k][None, None, :]
    acc = acc + b_ref[0][None, None, :].astype(jnp.float32)
    o_ref[0] = _gelu(acc).astype(o_ref.dtype)


def linear_bias_res_kernel(x_ref, w_ref, b_ref, res_ref, o_ref):
    # y = res + x @ W + b   (projection + residual fused)
    y = jnp.dot(x_ref[...].astype(jnp.float32), w_ref[...].astype(jnp.float32),
                preferred_element_type=jnp.float32)
    y = y + b_ref[...].astype(jnp.float32) + res_ref[...].astype(jnp.float32)
    o_ref[...] = y.astype(o_ref.dtype)


# ---------------------------------------------------------------------------
# pallas_call wrappers
# ---------------------------------------------------------------------------
def _ln_matmul(x2d, gamma, beta, w, wb, *, eps=1e-5):
    R, C = x2d.shape
    Dout = w.shape[1]
    tm = _pick_row_tile(R)
    return pl.pallas_call(
        functools.partial(ln_matmul_kernel, eps=eps),
        out_shape=jax.ShapeDtypeStruct((R, Dout), x2d.dtype),
        grid=(R // tm,),
        in_specs=[
            pl.BlockSpec((tm, C), lambda i: (i, 0)),
            pl.BlockSpec((1, C), lambda i: (0, 0)),
            pl.BlockSpec((1, C), lambda i: (0, 0)),
            pl.BlockSpec((C, Dout), lambda i: (0, 0)),
            pl.BlockSpec((1, Dout), lambda i: (0, 0)),
        ],
        out_specs=pl.BlockSpec((tm, Dout), lambda i: (i, 0)),
        compiler_params=pltpu.CompilerParams(
            dimension_semantics=("parallel",),
            vmem_limit_bytes=_VMEM_LIMIT),
    )(x2d, gamma, beta, w, wb)


def _attention(q, k, v, scale):
    BH, N, d = q.shape
    spec = pl.BlockSpec((1, N, d), lambda i: (i, 0, 0))
    return pl.pallas_call(
        functools.partial(attn_kernel, scale=scale),
        out_shape=jax.ShapeDtypeStruct((BH, N, d), q.dtype),
        grid=(BH,),
        in_specs=[spec, spec, spec],
        out_specs=pl.BlockSpec((1, N, d), lambda i: (i, 0, 0)),
        compiler_params=pltpu.CompilerParams(
            dimension_semantics=("parallel",),
            vmem_limit_bytes=_VMEM_LIMIT),
    )(q, k, v)


def _dwconv_gelu(x_nhwc, w9c, bias, H, W):
    B, _, _, Ch = x_nhwc.shape
    xp = jnp.pad(x_nhwc, ((0, 0), (1, 1), (1, 1), (0, 0)))
    return pl.pallas_call(
        dwconv_gelu_kernel,
        out_shape=jax.ShapeDtypeStruct((B, H, W, Ch), x_nhwc.dtype),
        grid=(B,),
        in_specs=[
            pl.BlockSpec((1, H + 2, W + 2, Ch), lambda b: (b, 0, 0, 0)),
            pl.BlockSpec((9, Ch), lambda b: (0, 0)),
            pl.BlockSpec((1, Ch), lambda b: (0, 0)),
        ],
        out_specs=pl.BlockSpec((1, H, W, Ch), lambda b: (b, 0, 0, 0)),
        compiler_params=pltpu.CompilerParams(
            dimension_semantics=("parallel",),
            vmem_limit_bytes=_VMEM_LIMIT),
    )(xp, w9c, bias)


def _linear_bias_residual(x2d, w, b, res2d):
    R, Din = x2d.shape
    Dout = w.shape[1]
    tm = _pick_row_tile(R)
    return pl.pallas_call(
        linear_bias_res_kernel,
        out_shape=jax.ShapeDtypeStruct((R, Dout), x2d.dtype),
        grid=(R // tm,),
        in_specs=[
            pl.BlockSpec((tm, Din), lambda i: (i, 0)),
            pl.BlockSpec((Din, Dout), lambda i: (0, 0)),
            pl.BlockSpec((1, Dout), lambda i: (0, 0)),
            pl.BlockSpec((tm, Dout), lambda i: (i, 0)),
        ],
        out_specs=pl.BlockSpec((tm, Dout), lambda i: (i, 0)),
        compiler_params=pltpu.CompilerParams(
            dimension_semantics=("parallel",),
            vmem_limit_bytes=_VMEM_LIMIT),
    )(x2d, w, b, res2d)


# ---------------------------------------------------------------------------
# Block forward (sr_ratio=1, linear=False, drops=0)
# ---------------------------------------------------------------------------
def block_forward(x, params, H, W, num_heads, eps=1e-5):
    B, N, C = x.shape
    assert C % num_heads == 0
    d = C // num_heads
    scale = d ** (-0.5)
    hidden = params["fc1_w"].shape[0]
    x2d = x.reshape(B * N, C)

    # ---- Attention branch: fused norm1 + (q|kv) projection ------------------
    w_qkv = jnp.concatenate([params["q_w"].T, params["kv_w"].T], axis=1)   # (C, 3C)
    b_qkv = jnp.zeros((1, 3 * C), x.dtype)                                 # qkv_bias=False
    qkv = _ln_matmul(x2d, params["ln1_g"].reshape(1, C), params["ln1_b"].reshape(1, C),
                     w_qkv, b_qkv, eps=eps)                                # (B*N, 3C)
    qkv = qkv.reshape(B, N, 3, num_heads, d).transpose(2, 0, 3, 1, 4)      # (3, B, nh, N, d)
    q = qkv[0].reshape(B * num_heads, N, d)
    k = qkv[1].reshape(B * num_heads, N, d)
    v = qkv[2].reshape(B * num_heads, N, d)

    attn_out = _attention(q, k, v, scale)                                  # (B*nh, N, d)
    attn_out = attn_out.reshape(B, num_heads, N, d).transpose(0, 2, 1, 3).reshape(B * N, C)

    # proj + bias + residual (fused)
    x2d = _linear_bias_residual(attn_out, params["proj_w"].T,
                                params["proj_b"].reshape(1, C), x2d)

    # ---- MLP branch: fused norm2 + fc1, dwconv+GELU, fc2 + residual ---------
    h = _ln_matmul(x2d, params["ln2_g"].reshape(1, C), params["ln2_b"].reshape(1, C),
                   params["fc1_w"].T, params["fc1_b"].reshape(1, hidden), eps=eps)
    h = _dwconv_gelu(h.reshape(B, H, W, hidden),
                     params["dw_w"].reshape(hidden, 9).T,                  # (9, hidden)
                     params["dw_b"].reshape(1, hidden), H, W)
    h = h.reshape(B * N, hidden)
    x2d = _linear_bias_residual(h, params["fc2_w"].T,
                                params["fc2_b"].reshape(1, C), x2d)
    return x2d.reshape(B, N, C)


# ---------------------------------------------------------------------------
# Pure-JAX reference (mirrors the PyTorch forward)
# ---------------------------------------------------------------------------
def reference_block(x, params, H, W, num_heads, eps=1e-5):
    B, N, C = x.shape
    d = C // num_heads
    scale = d ** (-0.5)
    hidden = params["fc1_w"].shape[0]

    def ln(z, g, b):
        mu = jnp.mean(z, axis=-1, keepdims=True)
        var = jnp.mean((z - mu) ** 2, axis=-1, keepdims=True)
        return (z - mu) / jnp.sqrt(var + eps) * g + b

    # Attention
    h = ln(x, params["ln1_g"], params["ln1_b"])
    q = (h @ params["q_w"].T).reshape(B, N, num_heads, d).transpose(0, 2, 1, 3)
    kv = (h @ params["kv_w"].T).reshape(B, N, 2, num_heads, d).transpose(2, 0, 3, 1, 4)
    k, v = kv[0], kv[1]
    attn = (q @ jnp.swapaxes(k, -1, -2)) * scale
    attn = jax.nn.softmax(attn, axis=-1)
    o = (attn @ v).transpose(0, 2, 1, 3).reshape(B, N, C)
    o = o @ params["proj_w"].T + params["proj_b"]
    x = x + o

    # MLP
    h = ln(x, params["ln2_g"], params["ln2_b"])
    h = h @ params["fc1_w"].T + params["fc1_b"]                 # (B, N, hidden)
    hh = h.transpose(0, 2, 1).reshape(B, hidden, H, W)
    hh = jax.lax.conv_general_dilated(
        hh, params["dw_w"], window_strides=(1, 1), padding="SAME",
        dimension_numbers=("NCHW", "OIHW", "NCHW"), feature_group_count=hidden)
    hh = hh + params["dw_b"].reshape(1, hidden, 1, 1)
    h = hh.reshape(B, hidden, N).transpose(0, 2, 1)
    h = _gelu(h)
    h = h @ params["fc2_w"].T + params["fc2_b"]
    x = x + h
    return x


if __name__ == "__main__":
    B, H, W, C, num_heads = 2, 8, 8, 32, 4
    N = H * W
    hidden = 4 * C
    f32 = jnp.float32

    key = jax.random.PRNGKey(0)
    ks = jax.random.split(key, 16)
    params = {
        "ln1_g": 1.0 + 0.1 * jax.random.normal(ks[0], (C,), f32),
        "ln1_b": 0.1 * jax.random.normal(ks[1], (C,), f32),
        "q_w": 0.02 * jax.random.normal(ks[2], (C, C), f32),
        "kv_w": 0.02 * jax.random.normal(ks[3], (2 * C, C), f32),
        "proj_w": 0.02 * jax.random.normal(ks[4], (C, C), f32),
        "proj_b": 0.02 * jax.random.normal(ks[5], (C,), f32),
        "ln2_g": 1.0 + 0.1 * jax.random.normal(ks[6], (C,), f32),
        "ln2_b": 0.1 * jax.random.normal(ks[7], (C,), f32),
        "fc1_w": 0.02 * jax.random.normal(ks[8], (hidden, C), f32),
        "fc1_b": 0.02 * jax.random.normal(ks[9], (hidden,), f32),
        "dw_w": (2.0 / 9.0) ** 0.5 * jax.random.normal(ks[10], (hidden, 1, 3, 3), f32),
        "dw_b": 0.02 * jax.random.normal(ks[11], (hidden,), f32),
        "fc2_w": 0.02 * jax.random.normal(ks[12], (C, hidden), f32),
        "fc2_b": 0.02 * jax.random.normal(ks[13], (C,), f32),
    }
    x = jax.random.normal(ks[14], (B, N, C), f32)

    fwd = jax.jit(block_forward, static_argnums=(2, 3, 4))
    out = jax.block_until_ready(fwd(x, params, H, W, num_heads))

    ref = reference_block(x, params, H, W, num_heads)
    assert out.shape == (B, N, C), out.shape
    err = float(jnp.max(jnp.abs(out - ref)))
    assert err < 2e-4, f"max abs err {err}"

    print("KERNEL_OK")
</pallas_src>

<mosaic_0001>
module attributes {stable_mosaic.version = 11 : i64} {
  func.func @ln_matmul_kernel(%arg0: i32, %arg1: memref<128x32xf32, #tpu.memory_space<vmem>>, %arg2: memref<1x32xf32, #tpu.memory_space<vmem>>, %arg3: memref<1x32xf32, #tpu.memory_space<vmem>>, %arg4: memref<32x96xf32, #tpu.memory_space<vmem>>, %arg5: memref<1x96xf32, #tpu.memory_space<vmem>>, %arg6: memref<128x96xf32, #tpu.memory_space<vmem>>) attributes {dimension_semantics = [#tpu.dimension_semantics<parallel>], iteration_bounds = array<i64: 1>, scalar_prefetch = 0 : i64, scratch_operands = 0 : i64, tpu.core_type = #tpu.core_type<tc>, window_params = [{transform_indices = @transform_0, window_bounds = array<i64: 128, 32>}, {pipeline_mode = #tpu.pipeline_mode<synchronous>, transform_indices = @transform_1, window_bounds = array<i64: 1, 32>}, {pipeline_mode = #tpu.pipeline_mode<synchronous>, transform_indices = @transform_2, window_bounds = array<i64: 1, 32>}, {pipeline_mode = #tpu.pipeline_mode<synchronous>, transform_indices = @transform_3, window_bounds = array<i64: 32, 96>}, {pipeline_mode = #tpu.pipeline_mode<synchronous>, transform_indices = @transform_4, window_bounds = array<i64: 1, 96>}, {transform_indices = @transform_5, window_bounds = array<i64: 128, 96>}]} {
    %c0 = arith.constant 0 : index
    %c0_0 = arith.constant 0 : index
    %0 = vector.load %arg1[%c0, %c0_0] : memref<128x32xf32, #tpu.memory_space<vmem>>, vector<128x32xf32>
    %cst = arith.constant dense<0.000000e+00> : vector<128xf32>
    %1 = vector.multi_reduction <add>, %0, %cst [1] : vector<128x32xf32> to vector<128xf32>
    %2 = vector.shape_cast %1 : vector<128xf32> to vector<128x1xf32>
    %cst_1 = arith.constant 3.200000e+01 : f32
    %3 = vector.broadcast %cst_1 : f32 to vector<128x1xf32>
    %4 = arith.divf %2, %3 : vector<128x1xf32>
    %5 = vector.broadcast %4 : vector<128x1xf32> to vector<128x32xf32>
    %6 = arith.subf %0, %5 : vector<128x32xf32>
    %7 = arith.mulf %6, %6 : vector<128x32xf32>
    %cst_2 = arith.constant dense<0.000000e+00> : vector<128xf32>
    %8 = vector.multi_reduction <add>, %7, %cst_2 [1] : vector<128x32xf32> to vector<128xf32>
    %9 = vector.shape_cast %8 : vector<128xf32> to vector<128x1xf32>
    %cst_3 = arith.constant 3.200000e+01 : f32
    %10 = vector.broadcast %cst_3 : f32 to vector<128x1xf32>
    %11 = arith.divf %9, %10 : vector<128x1xf32>
    %cst_4 = arith.constant 9.99999974E-6 : f32
    %12 = vector.broadcast %cst_4 : f32 to vector<128x1xf32>
    %13 = arith.addf %11, %12 : vector<128x1xf32>
    %14 = math.rsqrt %13 : vector<128x1xf32>
    %15 = vector.broadcast %14 : vector<128x1xf32> to vector<128x32xf32>
    %16 = arith.mulf %6, %15 : vector<128x32xf32>
    %c0_5 = arith.constant 0 : index
    %c0_6 = arith.constant 0 : index
    %17 = vector.load %arg2[%c0_5, %c0_6] : memref<1x32xf32, #tpu.memory_space<vmem>>, vector<1x32xf32>
    %18 = vector.broadcast %17 : vector<1x32xf32> to vector<128x32xf32>
    %19 = arith.mulf %16, %18 : vector<128x32xf32>
    %c0_7 = arith.constant 0 : index
    %c0_8 = arith.constant 0 : index
    %20 = vector.load %arg3[%c0_7, %c0_8] : memref<1x32xf32, #tpu.memory_space<vmem>>, vector<1x32xf32>
    %21 = vector.broadcast %20 : vector<1x32xf32> to vector<128x32xf32>
    %22 = arith.addf %19, %21 : vector<128x32xf32>
    %c0_9 = arith.constant 0 : index
    %c0_10 = arith.constant 0 : index
    %23 = vector.load %arg4[%c0_9, %c0_10] : memref<32x96xf32, #tpu.memory_space<vmem>>, vector<32x96xf32>
    %cst_11 = arith.constant dense<0.000000e+00> : vector<128x96xf32>
    %24 = tpu.matmul %22, %23, %cst_11 {dimension_numbers = #tpu.dot_dimension_numbers<[1], [0], [0], [1], [0, 0, 1, 1], [], []>} : vector<128x32xf32>, vector<32x96xf32>, vector<128x96xf32> -> vector<128x96xf32>
    %c0_12 = arith.constant 0 : index
    %c0_13 = arith.constant 0 : index
    %25 = vector.load %arg5[%c0_12, %c0_13] : memref<1x96xf32, #tpu.memory_space<vmem>>, vector<1x96xf32>
    %26 = vector.broadcast %25 : vector<1x96xf32> to vector<128x96xf32>
    %27 = arith.addf %24, %26 : vector<128x96xf32>
    %c0_14 = arith.constant 0 : index
    %c0_15 = arith.constant 0 : index
    %28 = vector.load %arg6[%c0_14, %c0_15] : memref<128x96xf32, #tpu.memory_space<vmem>>, vector<128x96xf32>
    tpu.vector_store %arg6[%c0_14, %c0_15], %27 {strides = array<i32>} : memref<128x96xf32, #tpu.memory_space<vmem>>, vector<128x96xf32>,
    return
  }
  func.func @transform_0(%arg0: i32) -> (i32, i32) {
    %c0_i32 = arith.constant 0 : i32
    %c0_i32_0 = arith.constant 0 : i32
    return %arg0, %c0_i32 : i32, i32
  }
  func.func @transform_1(%arg0: i32) -> (i32, i32) {
    %c0_i32 = arith.constant 0 : i32
    %c0_i32_0 = arith.constant 0 : i32
    %c0_i32_1 = arith.constant 0 : i32
    return %c0_i32, %c0_i32_0 : i32, i32
  }
  func.func @transform_2(%arg0: i32) -> (i32, i32) {
    %c0_i32 = arith.constant 0 : i32
    %c0_i32_0 = arith.constant 0 : i32
    %c0_i32_1 = arith.constant 0 : i32
    return %c0_i32, %c0_i32_0 : i32, i32
  }
  func.func @transform_3(%arg0: i32) -> (i32, i32) {
    %c0_i32 = arith.constant 0 : i32
    %c0_i32_0 = arith.constant 0 : i32
    %c0_i32_1 = arith.constant 0 : i32
    return %c0_i32, %c0_i32_0 : i32, i32
  }
  func.func @transform_4(%arg0: i32) -> (i32, i32) {
    %c0_i32 = arith.constant 0 : i32
    %c0_i32_0 = arith.constant 0 : i32
    %c0_i32_1 = arith.constant 0 : i32
    return %c0_i32, %c0_i32_0 : i32, i32
  }
  func.func @transform_5(%arg0: i32) -> (i32, i32) {
    %c0_i32 = arith.constant 0 : i32
    %c0_i32_0 = arith.constant 0 : i32
    return %arg0, %c0_i32 : i32, i32
  }
}

module attributes {stable_mosaic.version = 11 : i64} {
  func.func @attn_kernel(%arg0: i32, %arg1: memref<1x64x8xf32, #tpu.memory_space<vmem>>, %arg2: memref<1x64x8xf32, #tpu.memory_space<vmem>>, %arg3: memref<1x64x8xf32, #tpu.memory_space<vmem>>, %arg4: memref<1x64x8xf32, #tpu.memory_space<vmem>>) attributes {dimension_semantics = [#tpu.dimension_semantics<parallel>], iteration_bounds = array<i64: 8>, scalar_prefetch = 0 : i64, scratch_operands = 0 : i64, tpu.core_type = #tpu.core_type<tc>, window_params = [{transform_indices = @transform_0, window_bounds = array<i64: 1, 64, 8>}, {transform_indices = @transform_1, window_bounds = array<i64: 1, 64, 8>}, {transform_indices = @transform_2, window_bounds = array<i64: 1, 64, 8>}, {transform_indices = @transform_3, window_bounds = array<i64: 1, 64, 8>}]} {
    %c0 = arith.constant 0 : index
    %c0_0 = arith.constant 0 : index
    %c0_1 = arith.constant 0 : index
    %0 = vector.load %arg1[%c0, %c0_0, %c0_1] : memref<1x64x8xf32, #tpu.memory_space<vmem>>, vector<1x64x8xf32>
    %1 = vector.shape_cast %0 : vector<1x64x8xf32> to vector<64x8xf32>
    %c0_2 = arith.constant 0 : index
    %c0_3 = arith.constant 0 : index
    %c0_4 = arith.constant 0 : index
    %2 = vector.load %arg2[%c0_2, %c0_3, %c0_4] : memref<1x64x8xf32, #tpu.memory_space<vmem>>, vector<1x64x8xf32>
    %3 = vector.shape_cast %2 : vector<1x64x8xf32> to vector<64x8xf32>
    %c0_5 = arith.constant 0 : index
    %c0_6 = arith.constant 0 : index
    %c0_7 = arith.constant 0 : index
    %4 = vector.load %arg3[%c0_5, %c0_6, %c0_7] : memref<1x64x8xf32, #tpu.memory_space<vmem>>, vector<1x64x8xf32>
    %5 = vector.shape_cast %4 : vector<1x64x8xf32> to vector<64x8xf32>
    %cst = arith.constant dense<0.000000e+00> : vector<64x64xf32>
    %6 = tpu.matmul %1, %3, %cst {dimension_numbers = #tpu.dot_dimension_numbers<[1], [1], [0], [0], [0, 0, 1, 0], [], []>} : vector<64x8xf32>, vector<64x8xf32>, vector<64x64xf32> -> vector<64x64xf32>
    %cst_8 = arith.constant 0.353553385 : f32
    %7 = vector.broadcast %cst_8 : f32 to vector<64x64xf32>
    %8 = arith.mulf %6, %7 : vector<64x64xf32>
    %cst_9 = arith.constant dense<0xFF800000> : vector<64xf32>
    %9 = vector.multi_reduction <maximumf>, %8, %cst_9 [1] : vector<64x64xf32> to vector<64xf32>
    %10 = vector.shape_cast %9 : vector<64xf32> to vector<64x1xf32>
    %11 = vector.broadcast %10 : vector<64x1xf32> to vector<64x64xf32>
    %12 = arith.subf %8, %11 : vector<64x64xf32>
    %13 = math.exp %12 : vector<64x64xf32>
    %cst_10 = arith.constant dense<0.000000e+00> : vector<64xf32>
    %14 = vector.multi_reduction <add>, %13, %cst_10 [1] : vector<64x64xf32> to vector<64xf32>
    %15 = vector.shape_cast %14 : vector<64xf32> to vector<64x1xf32>
    %16 = vector.broadcast %15 : vector<64x1xf32> to vector<64x64xf32>
    %17 = arith.divf %13, %16 : vector<64x64xf32>
    %cst_11 = arith.constant dense<0.000000e+00> : vector<64x8xf32>
    %18 = tpu.matmul %17, %5, %cst_11 {dimension_numbers = #tpu.dot_dimension_numbers<[1], [0], [0], [1], [0, 0, 1, 1], [], []>} : vector<64x64xf32>, vector<64x8xf32>, vector<64x8xf32> -> vector<64x8xf32>
    %c0_12 = arith.constant 0 : index
    %c0_13 = arith.constant 0 : index
    %c0_14 = arith.constant 0 : index
    %19 = vector.load %arg4[%c0_12, %c0_13, %c0_14] : memref<1x64x8xf32, #tpu.memory_space<vmem>>, vector<1x64x8xf32>
    %20 = vector.shape_cast %19 : vector<1x64x8xf32> to vector<64x8xf32>
    %21 = vector.shape_cast %18 : vector<64x8xf32> to vector<1x64x8xf32>
    tpu.vector_store %arg4[%c0_12, %c0_13, %c0_14], %21 {strides = array<i32>} : memref<1x64x8xf32, #tpu.memory_space<vmem>>, vector<1x64x8xf32>,
    return
  }
  func.func @transform_0(%arg0: i32) -> (i32, i32, i32) {
    %c0_i32 = arith.constant 0 : i32
    %c0_i32_0 = arith.constant 0 : i32
    %c0_i32_1 = arith.constant 0 : i32
    return %arg0, %c0_i32, %c0_i32_0 : i32, i32, i32
  }
  func.func @transform_1(%arg0: i32) -> (i32, i32, i32) {
    %c0_i32 = arith.constant 0 : i32
    %c0_i32_0 = arith.constant 0 : i32
    %c0_i32_1 = arith.constant 0 : i32
    return %arg0, %c0_i32, %c0_i32_0 : i32, i32, i32
  }
  func.func @transform_2(%arg0: i32) -> (i32, i32, i32) {
    %c0_i32 = arith.constant 0 : i32
    %c0_i32_0 = arith.constant 0 : i32
    %c0_i32_1 = arith.constant 0 : i32
    return %arg0, %c0_i32, %c0_i32_0 : i32, i32, i32
  }
  func.func @transform_3(%arg0: i32) -> (i32, i32, i32) {
    %c0_i32 = arith.constant 0 : i32
    %c0_i32_0 = arith.constant 0 : i32
    %c0_i32_1 = arith.constant 0 : i32
    return %arg0, %c0_i32, %c0_i32_0 : i32, i32, i32
  }
}

module attributes {stable_mosaic.version = 11 : i64} {
  func.func @linear_bias_res_kernel(%arg0: i32, %arg1: memref<128x32xf32, #tpu.memory_space<vmem>>, %arg2: memref<32x32xf32, #tpu.memory_space<vmem>>, %arg3: memref<1x32xf32, #tpu.memory_space<vmem>>, %arg4: memref<128x32xf32, #tpu.memory_space<vmem>>, %arg5: memref<128x32xf32, #tpu.memory_space<vmem>>) attributes {dimension_semantics = [#tpu.dimension_semantics<parallel>], iteration_bounds = array<i64: 1>, scalar_prefetch = 0 : i64, scratch_operands = 0 : i64, tpu.core_type = #tpu.core_type<tc>, window_params = [{transform_indices = @transform_0, window_bounds = array<i64: 128, 32>}, {pipeline_mode = #tpu.pipeline_mode<synchronous>, transform_indices = @transform_1, window_bounds = array<i64: 32, 32>}, {pipeline_mode = #tpu.pipeline_mode<synchronous>, transform_indices = @transform_2, window_bounds = array<i64: 1, 32>}, {transform_indices = @transform_3, window_bounds = array<i64: 128, 32>}, {transform_indices = @transform_4, window_bounds = array<i64: 128, 32>}]} {
    %c0 = arith.constant 0 : index
    %c0_0 = arith.constant 0 : index
    %0 = vector.load %arg1[%c0, %c0_0] : memref<128x32xf32, #tpu.memory_space<vmem>>, vector<128x32xf32>
    %c0_1 = arith.constant 0 : index
    %c0_2 = arith.constant 0 : index
    %1 = vector.load %arg2[%c0_1, %c0_2] : memref<32x32xf32, #tpu.memory_space<vmem>>, vector<32x32xf32>
    %cst = arith.constant dense<0.000000e+00> : vector<128x32xf32>
    %2 = tpu.matmul %0, %1, %cst {dimension_numbers = #tpu.dot_dimension_numbers<[1], [0], [0], [1], [0, 0, 1, 1], [], []>} : vector<128x32xf32>, vector<32x32xf32>, vector<128x32xf32> -> vector<128x32xf32>
    %c0_3 = arith.constant 0 : index
    %c0_4 = arith.constant 0 : index
    %3 = vector.load %arg3[%c0_3, %c0_4] : memref<1x32xf32, #tpu.memory_space<vmem>>, vector<1x32xf32>
    %4 = vector.broadcast %3 : vector<1x32xf32> to vector<128x32xf32>
    %5 = arith.addf %2, %4 : vector<128x32xf32>
    %c0_5 = arith.constant 0 : index
    %c0_6 = arith.constant 0 : index
    %6 = vector.load %arg4[%c0_5, %c0_6] : memref<128x32xf32, #tpu.memory_space<vmem>>, vector<128x32xf32>
    %7 = arith.addf %5, %6 : vector<128x32xf32>
    %c0_7 = arith.constant 0 : index
    %c0_8 = arith.constant 0 : index
    %8 = vector.load %arg5[%c0_7, %c0_8] : memref<128x32xf32, #tpu.memory_space<vmem>>, vector<128x32xf32>
    tpu.vector_store %arg5[%c0_7, %c0_8], %7 {strides = array<i32>} : memref<128x32xf32, #tpu.memory_space<vmem>>, vector<128x32xf32>,
    return
  }
  func.func @transform_0(%arg0: i32) -> (i32, i32) {
    %c0_i32 = arith.constant 0 : i32
    %c0_i32_0 = arith.constant 0 : i32
    return %arg0, %c0_i32 : i32, i32
  }
  func.func @transform_1(%arg0: i32) -> (i32, i32) {
    %c0_i32 = arith.constant 0 : i32
    %c0_i32_0 = arith.constant 0 : i32
    %c0_i32_1 = arith.constant 0 : i32
    return %c0_i32, %c0_i32_0 : i32, i32
  }
  func.func @transform_2(%arg0: i32) -> (i32, i32) {
    %c0_i32 = arith.constant 0 : i32
    %c0_i32_0 = arith.constant 0 : i32
    %c0_i32_1 = arith.constant 0 : i32
    return %c0_i32, %c0_i32_0 : i32, i32
  }
  func.func @transform_3(%arg0: i32) -> (i32, i32) {
    %c0_i32 = arith.constant 0 : i32
    %c0_i32_0 = arith.constant 0 : i32
    return %arg0, %c0_i32 : i32, i32
  }
  func.func @transform_4(%arg0: i32) -> (i32, i32) {
    %c0_i32 = arith.constant 0 : i32
    %c0_i32_0 = arith.constant 0 : i32
    return %arg0, %c0_i32 : i32, i32
  }
}

module attributes {stable_mosaic.version = 11 : i64} {
  func.func @ln_matmul_kernel(%arg0: i32, %arg1: memref<128x32xf32, #tpu.memory_space<vmem>>, %arg2: memref<1x32xf32, #tpu.memory_space<vmem>>, %arg3: memref<1x32xf32, #tpu.memory_space<vmem>>, %arg4: memref<32x128xf32, #tpu.memory_space<vmem>>, %arg5: memref<1x128xf32, #tpu.memory_space<vmem>>, %arg6: memref<128x128xf32, #tpu.memory_space<vmem>>) attributes {dimension_semantics = [#tpu.dimension_semantics<parallel>], iteration_bounds = array<i64: 1>, scalar_prefetch = 0 : i64, scratch_operands = 0 : i64, tpu.core_type = #tpu.core_type<tc>, window_params = [{transform_indices = @transform_0, window_bounds = array<i64: 128, 32>}, {pipeline_mode = #tpu.pipeline_mode<synchronous>, transform_indices = @transform_1, window_bounds = array<i64: 1, 32>}, {pipeline_mode = #tpu.pipeline_mode<synchronous>, transform_indices = @transform_2, window_bounds = array<i64: 1, 32>}, {pipeline_mode = #tpu.pipeline_mode<synchronous>, transform_indices = @transform_3, window_bounds = array<i64: 32, 128>}, {pipeline_mode = #tpu.pipeline_mode<synchronous>, transform_indices = @transform_4, window_bounds = array<i64: 1, 128>}, {transform_indices = @transform_5, window_bounds = array<i64: 128, 128>}]} {
    %c0 = arith.constant 0 : index
    %c0_0 = arith.constant 0 : index
    %0 = vector.load %arg1[%c0, %c0_0] : memref<128x32xf32, #tpu.memory_space<vmem>>, vector<128x32xf32>
    %cst = arith.constant dense<0.000000e+00> : vector<128xf32>
    %1 = vector.multi_reduction <add>, %0, %cst [1] : vector<128x32xf32> to vector<128xf32>
    %2 = vector.shape_cast %1 : vector<128xf32> to vector<128x1xf32>
    %cst_1 = arith.constant 3.200000e+01 : f32
    %3 = vector.broadcast %cst_1 : f32 to vector<128x1xf32>
    %4 = arith.divf %2, %3 : vector<128x1xf32>
    %5 = vector.broadcast %4 : vector<128x1xf32> to vector<128x32xf32>
    %6 = arith.subf %0, %5 : vector<128x32xf32>
    %7 = arith.mulf %6, %6 : vector<128x32xf32>
    %cst_2 = arith.constant dense<0.000000e+00> : vector<128xf32>
    %8 = vector.multi_reduction <add>, %7, %cst_2 [1] : vector<128x32xf32> to vector<128xf32>
    %9 = vector.shape_cast %8 : vector<128xf32> to vector<128x1xf32>
    %cst_3 = arith.constant 3.200000e+01 : f32
    %10 = vector.broadcast %cst_3 : f32 to vector<128x1xf32>
    %11 = arith.divf %9, %10 : vector<128x1xf32>
    %cst_4 = arith.constant 9.99999974E-6 : f32
    %12 = vector.broadcast %cst_4 : f32 to vector<128x1xf32>
    %13 = arith.addf %11, %12 : vector<128x1xf32>
    %14 = math.rsqrt %13 : vector<128x1xf32>
    %15 = vector.broadcast %14 : vector<128x1xf32> to vector<128x32xf32>
    %16 = arith.mulf %6, %15 : vector<128x32xf32>
    %c0_5 = arith.constant 0 : index
    %c0_6 = arith.constant 0 : index
    %17 = vector.load %arg2[%c0_5, %c0_6] : memref<1x32xf32, #tpu.memory_space<vmem>>, vector<1x32xf32>
    %18 = vector.broadcast %17 : vector<1x32xf32> to vector<128x32xf32>
    %19 = arith.mulf %16, %18 : vector<128x32xf32>
    %c0_7 = arith.constant 0 : index
    %c0_8 = arith.constant 0 : index
    %20 = vector.load %arg3[%c0_7, %c0_8] : memref<1x32xf32, #tpu.memory_space<vmem>>, vector<1x32xf32>
    %21 = vector.broadcast %20 : vector<1x32xf32> to vector<128x32xf32>
    %22 = arith.addf %19, %21 : vector<128x32xf32>
    %c0_9 = arith.constant 0 : index
    %c0_10 = arith.constant 0 : index
    %23 = vector.load %arg4[%c0_9, %c0_10] : memref<32x128xf32, #tpu.memory_space<vmem>>, vector<32x128xf32>
    %cst_11 = arith.constant dense<0.000000e+00> : vector<128x128xf32>
    %24 = tpu.matmul %22, %23, %cst_11 {dimension_numbers = #tpu.dot_dimension_numbers<[1], [0], [0], [1], [0, 0, 1, 1], [], []>} : vector<128x32xf32>, vector<32x128xf32>, vector<128x128xf32> -> vector<128x128xf32>
    %c0_12 = arith.constant 0 : index
    %c0_13 = arith.constant 0 : index
    %25 = vector.load %arg5[%c0_12, %c0_13] : memref<1x128xf32, #tpu.memory_space<vmem>>, vector<1x128xf32>
    %26 = vector.broadcast %25 : vector<1x128xf32> to vector<128x128xf32>
    %27 = arith.addf %24, %26 : vector<128x128xf32>
    %c0_14 = arith.constant 0 : index
    %c0_15 = arith.constant 0 : index
    %28 = vector.load %arg6[%c0_14, %c0_15] : memref<128x128xf32, #tpu.memory_space<vmem>>, vector<128x128xf32>
    tpu.vector_store %arg6[%c0_14, %c0_15], %27 {strides = array<i32>} : memref<128x128xf32, #tpu.memory_space<vmem>>, vector<128x128xf32>,
    return
  }
  func.func @transform_0(%arg0: i32) -> (i32, i32) {
    %c0_i32 = arith.constant 0 : i32
    %c0_i32_0 = arith.constant 0 : i32
    return %arg0, %c0_i32 : i32, i32
  }
  func.func @transform_1(%arg0: i32) -> (i32, i32) {
    %c0_i32 = arith.constant 0 : i32
    %c0_i32_0 = arith.constant 0 : i32
    %c0_i32_1 = arith.constant 0 : i32
    return %c0_i32, %c0_i32_0 : i32, i32
  }
  func.func @transform_2(%arg0: i32) -> (i32, i32) {
    %c0_i32 = arith.constant 0 : i32
    %c0_i32_0 = arith.constant 0 : i32
    %c0_i32_1 = arith.constant 0 : i32
    return %c0_i32, %c0_i32_0 : i32, i32
  }
  func.func @transform_3(%arg0: i32) -> (i32, i32) {
    %c0_i32 = arith.constant 0 : i32
    %c0_i32_0 = arith.constant 0 : i32
    %c0_i32_1 = arith.constant 0 : i32
    return %c0_i32, %c0_i32_0 : i32, i32
  }
  func.func @transform_4(%arg0: i32) -> (i32, i32) {
    %c0_i32 = arith.constant 0 : i32
    %c0_i32_0 = arith.constant 0 : i32
    %c0_i32_1 = arith.constant 0 : i32
    return %c0_i32, %c0_i32_0 : i32, i32
  }
  func.func @transform_5(%arg0: i32) -> (i32, i32) {
    %c0_i32 = arith.constant 0 : i32
    %c0_i32_0 = arith.constant 0 : i32
    return %arg0, %c0_i32 : i32, i32
  }
}

module attributes {stable_mosaic.version = 11 : i64} {
  func.func @dwconv_gelu_kernel(%arg0: i32, %arg1: memref<1x10x10x128xf32, #tpu.memory_space<vmem>>, %arg2: memref<9x128xf32, #tpu.memory_space<vmem>>, %arg3: memref<1x128xf32, #tpu.memory_space<vmem>>, %arg4: memref<1x8x8x128xf32, #tpu.memory_space<vmem>>) attributes {dimension_semantics = [#tpu.dimension_semantics<parallel>], iteration_bounds = array<i64: 2>, scalar_prefetch = 0 : i64, scratch_operands = 0 : i64, tpu.core_type = #tpu.core_type<tc>, window_params = [{transform_indices = @transform_0, window_bounds = array<i64: 1, 10, 10, 128>}, {pipeline_mode = #tpu.pipeline_mode<synchronous>, transform_indices = @transform_1, window_bounds = array<i64: 9, 128>}, {pipeline_mode = #tpu.pipeline_mode<synchronous>, transform_indices = @transform_2, window_bounds = array<i64: 1, 128>}, {transform_indices = @transform_3, window_bounds = array<i64: 1, 8, 8, 128>}]} {
    %c0 = arith.constant 0 : index
    %c0_0 = arith.constant 0 : index
    %c0_1 = arith.constant 0 : index
    %c0_2 = arith.constant 0 : index
    %0 = vector.load %arg1[%c0, %c0_0, %c0_1, %c0_2] : memref<1x10x10x128xf32, #tpu.memory_space<vmem>>, vector<1x10x10x128xf32>
    %1 = vector.shape_cast %0 : vector<1x10x10x128xf32> to vector<10x10x128xf32>
    %c0_3 = arith.constant 0 : index
    %c0_4 = arith.constant 0 : index
    %2 = vector.load %arg2[%c0_3, %c0_4] : memref<9x128xf32, #tpu.memory_space<vmem>>, vector<9x128xf32>
    %cst = arith.constant 0.000000e+00 : f32
    %3 = vector.broadcast %cst : f32 to vector<8x8x128xf32>
    %4 = vector.extract_strided_slice %1 {offsets = [0, 0, 0], sizes = [8, 8, 128], strides = [1, 1, 1]} : vector<10x10x128xf32> to vector<8x8x128xf32>
    %5 = vector.extract_strided_slice %2 {offsets = [0, 0], sizes = [1, 128], strides = [1, 1]} : vector<9x128xf32> to vector<1x128xf32>
    %6 = vector.shape_cast %5 : vector<1x128xf32> to vector<128xf32>
    %7 = vector.shape_cast %6 : vector<128xf32> to vector<1x1x128xf32>
    %8 = vector.broadcast %7 : vector<1x1x128xf32> to vector<8x8x128xf32>
    %9 = arith.mulf %4, %8 : vector<8x8x128xf32>
    %10 = arith.addf %3, %9 : vector<8x8x128xf32>
    %11 = vector.extract_strided_slice %1 {offsets = [0, 1, 0], sizes = [8, 8, 128], strides = [1, 1, 1]} : vector<10x10x128xf32> to vector<8x8x128xf32>
    %12 = vector.extract_strided_slice %2 {offsets = [1, 0], sizes = [1, 128], strides = [1, 1]} : vector<9x128xf32> to vector<1x128xf32>
    %13 = vector.shape_cast %12 : vector<1x128xf32> to vector<128xf32>
    %14 = vector.shape_cast %13 : vector<128xf32> to vector<1x1x128xf32>
    %15 = vector.broadcast %14 : vector<1x1x128xf32> to vector<8x8x128xf32>
    %16 = arith.mulf %11, %15 : vector<8x8x128xf32>
    %17 = arith.addf %10, %16 : vector<8x8x128xf32>
    %18 = vector.extract_strided_slice %1 {offsets = [0, 2, 0], sizes = [8, 8, 128], strides = [1, 1, 1]} : vector<10x10x128xf32> to vector<8x8x128xf32>
    %19 = vector.extract_strided_slice %2 {offsets = [2, 0], sizes = [1, 128], strides = [1, 1]} : vector<9x128xf32> to vector<1x128xf32>
    %20 = vector.shape_cast %19 : vector<1x128xf32> to vector<128xf32>
    %21 = vector.shape_cast %20 : vector<128xf32> to vector<1x1x128xf32>
    %22 = vector.broadcast %21 : vector<1x1x128xf32> to vector<8x8x128xf32>
    %23 = arith.mulf %18, %22 : vector<8x8x128xf32>
    %24 = arith.addf %17, %23 : vector<8x8x128xf32>
    %25 = vector.extract_strided_slice %1 {offsets = [1, 0, 0], sizes = [8, 8, 128], strides = [1, 1, 1]} : vector<10x10x128xf32> to vector<8x8x128xf32>
    %26 = vector.extract_strided_slice %2 {offsets = [3, 0], sizes = [1, 128], strides = [1, 1]} : vector<9x128xf32> to vector<1x128xf32>
    %27 = vector.shape_cast %26 : vector<1x128xf32> to vector<128xf32>
    %28 = vector.shape_cast %27 : vector<128xf32> to vector<1x1x128xf32>
    %29 = vector.broadcast %28 : vector<1x1x128xf32> to vector<8x8x128xf32>
    %30 = arith.mulf %25, %29 : vector<8x8x128xf32>
    %31 = arith.addf %24, %30 : vector<8x8x128xf32>
    %32 = vector.extract_strided_slice %1 {offsets = [1, 1, 0], sizes = [8, 8, 128], strides = [1, 1, 1]} : vector<10x10x128xf32> to vector<8x8x128xf32>
    %33 = vector.extract_strided_slice %2 {offsets = [4, 0], sizes = [1, 128], strides = [1, 1]} : vector<9x128xf32> to vector<1x128xf32>
    %34 = vector.shape_cast %33 : vector<1x128xf32> to vector<128xf32>
    %35 = vector.shape_cast %34 : vector<128xf32> to vector<1x1x128xf32>
    %36 = vector.broadcast %35 : vector<1x1x128xf32> to vector<8x8x128xf32>
    %37 = arith.mulf %32, %36 : vector<8x8x128xf32>
    %38 = arith.addf %31, %37 : vector<8x8x128xf32>
    %39 = vector.extract_strided_slice %1 {offsets = [1, 2, 0], sizes = [8, 8, 128], strides = [1, 1, 1]} : vector<10x10x128xf32> to vector<8x8x128xf32>
    %40 = vector.extract_strided_slice %2 {offsets = [5, 0], sizes = [1, 128], strides = [1, 1]} : vector<9x128xf32> to vector<1x128xf32>
    %41 = vector.shape_cast %40 : vector<1x128xf32> to vector<128xf32>
    %42 = vector.shape_cast %41 : vector<128xf32> to vector<1x1x128xf32>
    %43 = vector.broadcast %42 : vector<1x1x128xf32> to vector<8x8x128xf32>
    %44 = arith.mulf %39, %43 : vector<8x8x128xf32>
    %45 = arith.addf %38, %44 : vector<8x8x128xf32>
    %46 = vector.extract_strided_slice %1 {offsets = [2, 0, 0], sizes = [8, 8, 128], strides = [1, 1, 1]} : vector<10x10x128xf32> to vector<8x8x128xf32>
    %47 = vector.extract_strided_slice %2 {offsets = [6, 0], sizes = [1, 128], strides = [1, 1]} : vector<9x128xf32> to vector<1x128xf32>
    %48 = vector.shape_cast %47 : vector<1x128xf32> to vector<128xf32>
    %49 = vector.shape_cast %48 : vector<128xf32> to vector<1x1x128xf32>
    %50 = vector.broadcast %49 : vector<1x1x128xf32> to vector<8x8x128xf32>
    %51 = arith.mulf %46, %50 : vector<8x8x128xf32>
    %52 = arith.addf %45, %51 : vector<8x8x128xf32>
    %53 = vector.extract_strided_slice %1 {offsets = [2, 1, 0], sizes = [8, 8, 128], strides = [1, 1, 1]} : vector<10x10x128xf32> to vector<8x8x128xf32>
    %54 = vector.extract_strided_slice %2 {offsets = [7, 0], sizes = [1, 128], strides = [1, 1]} : vector<9x128xf32> to vector<1x128xf32>
    %55 = vector.shape_cast %54 : vector<1x128xf32> to vector<128xf32>
    %56 = vector.shape_cast %55 : vector<128xf32> to vector<1x1x128xf32>
    %57 = vector.broadcast %56 : vector<1x1x128xf32> to vector<8x8x128xf32>
    %58 = arith.mulf %53, %57 : vector<8x8x128xf32>
    %59 = arith.addf %52, %58 : vector<8x8x128xf32>
    %60 = vector.extract_strided_slice %1 {offsets = [2, 2, 0], sizes = [8, 8, 128], strides = [1, 1, 1]} : vector<10x10x128xf32> to vector<8x8x128xf32>
    %61 = vector.extract_strided_slice %2 {offsets = [8, 0], sizes = [1, 128], strides = [1, 1]} : vector<9x128xf32> to vector<1x128xf32>
    %62 = vector.shape_cast %61 : vector<1x128xf32> to vector<128xf32>
    %63 = vector.shape_cast %62 : vector<128xf32> to vector<1x1x128xf32>
    %64 = vector.broadcast %63 : vector<1x1x128xf32> to vector<8x8x128xf32>
    %65 = arith.mulf %60, %64 : vector<8x8x128xf32>
    %66 = arith.addf %59, %65 : vector<8x8x128xf32>
    %c0_5 = arith.constant 0 : index
    %c0_6 = arith.constant 0 : index
    %67 = vector.load %arg3[%c0_5, %c0_6] : memref<1x128xf32, #tpu.memory_space<vmem>>, vector<1x128xf32>
    %68 = vector.shape_cast %67 : vector<1x128xf32> to vector<128xf32>
    %69 = vector.shape_cast %68 : vector<128xf32> to vector<1x1x128xf32>
    %70 = vector.broadcast %69 : vector<1x1x128xf32> to vector<8x8x128xf32>
    %71 = arith.addf %66, %70 : vector<8x8x128xf32>
    %72 = arith.mulf %71, %71 : vector<8x8x128xf32>
    %73 = arith.mulf %71, %72 : vector<8x8x128xf32>
    %cst_7 = arith.constant 4.471500e-02 : f32
    %74 = vector.broadcast %cst_7 : f32 to vector<8x8x128xf32>
    %75 = arith.mulf %74, %73 : vector<8x8x128xf32>
    %76 = arith.addf %71, %75 : vector<8x8x128xf32>
    %cst_8 = arith.constant 0.797884583 : f32
    %77 = vector.broadcast %cst_8 : f32 to vector<8x8x128xf32>
    %78 = arith.mulf %77, %76 : vector<8x8x128xf32>
    %79 = math.tanh %78 : vector<8x8x128xf32>
    %cst_9 = arith.constant 1.000000e+00 : f32
    %80 = vector.broadcast %cst_9 : f32 to vector<8x8x128xf32>
    %81 = arith.addf %80, %79 : vector<8x8x128xf32>
    %cst_10 = arith.constant 5.000000e-01 : f32
    %82 = vector.broadcast %cst_10 : f32 to vector<8x8x128xf32>
    %83 = arith.mulf %82, %81 : vector<8x8x128xf32>
    %84 = arith.mulf %71, %83 : vector<8x8x128xf32>
    %c0_11 = arith.constant 0 : index
    %c0_12 = arith.constant 0 : index
    %c0_13 = arith.constant 0 : index
    %c0_14 = arith.constant 0 : index
    %85 = vector.load %arg4[%c0_11, %c0_12, %c0_13, %c0_14] : memref<1x8x8x128xf32, #tpu.memory_space<vmem>>, vector<1x8x8x128xf32>
    %86 = vector.shape_cast %85 : vector<1x8x8x128xf32> to vector<8x8x128xf32>
    %87 = vector.shape_cast %84 : vector<8x8x128xf32> to vector<1x8x8x128xf32>
    tpu.vector_store %arg4[%c0_11, %c0_12, %c0_13, %c0_14], %87 {strides = array<i32>} : memref<1x8x8x128xf32, #tpu.memory_space<vmem>>, vector<1x8x8x128xf32>,
    return
  }
  func.func @transform_0(%arg0: i32) -> (i32, i32, i32, i32) {
    %c0_i32 = arith.constant 0 : i32
    %c0_i32_0 = arith.constant 0 : i32
    %c0_i32_1 = arith.constant 0 : i32
    %c0_i32_2 = arith.constant 0 : i32
    return %arg0, %c0_i32, %c0_i32_0, %c0_i32_1 : i32, i32, i32, i32
  }
  func.func @transform_1(%arg0: i32) -> (i32, i32) {
    %c0_i32 = arith.constant 0 : i32
    %c0_i32_0 = arith.constant 0 : i32
    %c0_i32_1 = arith.constant 0 : i32
    return %c0_i32, %c0_i32_0 : i32, i32
  }
  func.func @transform_2(%arg0: i32) -> (i32, i32) {
    %c0_i32 = arith.constant 0 : i32
    %c0_i32_0 = arith.constant 0 : i32
    %c0_i32_1 = arith.constant 0 : i32
    return %c0_i32, %c0_i32_0 : i32, i32
  }
  func.func @transform_3(%arg0: i32) -> (i32, i32, i32, i32) {
    %c0_i32 = arith.constant 0 : i32
    %c0_i32_0 = arith.constant 0 : i32
    %c0_i32_1 = arith.constant 0 : i32
    %c0_i32_2 = arith.constant 0 : i32
    return %arg0, %c0_i32, %c0_i32_0, %c0_i32_1 : i32, i32, i32, i32
  }
}

module attributes {stable_mosaic.version = 11 : i64} {
  func.func @linear_bias_res_kernel(%arg0: i32, %arg1: memref<128x128xf32, #tpu.memory_space<vmem>>, %arg2: memref<128x32xf32, #tpu.memory_space<vmem>>, %arg3: memref<1x32xf32, #tpu.memory_space<vmem>>, %arg4: memref<128x32xf32, #tpu.memory_space<vmem>>, %arg5: memref<128x32xf32, #tpu.memory_space<vmem>>) attributes {dimension_semantics = [#tpu.dimension_semantics<parallel>], iteration_bounds = array<i64: 1>, scalar_prefetch = 0 : i64, scratch_operands = 0 : i64, tpu.core_type = #tpu.core_type<tc>, window_params = [{transform_indices = @transform_0, window_bounds = array<i64: 128, 128>}, {pipeline_mode = #tpu.pipeline_mode<synchronous>, transform_indices = @transform_1, window_bounds = array<i64: 128, 32>}, {pipeline_mode = #tpu.pipeline_mode<synchronous>, transform_indices = @transform_2, window_bounds = array<i64: 1, 32>}, {transform_indices = @transform_3, window_bounds = array<i64: 128, 32>}, {transform_indices = @transform_4, window_bounds = array<i64: 128, 32>}]} {
    %c0 = arith.constant 0 : index
    %c0_0 = arith.constant 0 : index
    %0 = vector.load %arg1[%c0, %c0_0] : memref<128x128xf32, #tpu.memory_space<vmem>>, vector<128x128xf32>
    %c0_1 = arith.constant 0 : index
    %c0_2 = arith.constant 0 : index
    %1 = vector.load %arg2[%c0_1, %c0_2] : memref<128x32xf32, #tpu.memory_space<vmem>>, vector<128x32xf32>
    %cst = arith.constant dense<0.000000e+00> : vector<128x32xf32>
    %2 = tpu.matmul %0, %1, %cst {dimension_numbers = #tpu.dot_dimension_numbers<[1], [0], [0], [1], [0, 0, 1, 1], [], []>} : vector<128x128xf32>, vector<128x32xf32>, vector<128x32xf32> -> vector<128x32xf32>
    %c0_3 = arith.constant 0 : index
    %c0_4 = arith.constant 0 : index
    %3 = vector.load %arg3[%c0_3, %c0_4] : memref<1x32xf32, #tpu.memory_space<vmem>>, vector<1x32xf32>
    %4 = vector.broadcast %3 : vector<1x32xf32> to vector<128x32xf32>
    %5 = arith.addf %2, %4 : vector<128x32xf32>
    %c0_5 = arith.constant 0 : index
    %c0_6 = arith.constant 0 : index
    %6 = vector.load %arg4[%c0_5, %c0_6] : memref<128x32xf32, #tpu.memory_space<vmem>>, vector<128x32xf32>
    %7 = arith.addf %5, %6 : vector<128x32xf32>
    %c0_7 = arith.constant 0 : index
    %c0_8 = arith.constant 0 : index
    %8 = vector.load %arg5[%c0_7, %c0_8] : memref<128x32xf32, #tpu.memory_space<vmem>>, vector<128x32xf32>
    tpu.vector_store %arg5[%c0_7, %c0_8], %7 {strides = array<i32>} : memref<128x32xf32, #tpu.memory_space<vmem>>, vector<128x32xf32>,
    return
  }
  func.func @transform_0(%arg0: i32) -> (i32, i32) {
    %c0_i32 = arith.constant 0 : i32
    %c0_i32_0 = arith.constant 0 : i32
    return %arg0, %c0_i32 : i32, i32
  }
  func.func @transform_1(%arg0: i32) -> (i32, i32) {
    %c0_i32 = arith.constant 0 : i32
    %c0_i32_0 = arith.constant 0 : i32
    %c0_i32_1 = arith.constant 0 : i32
    return %c0_i32, %c0_i32_0 : i32, i32
  }
  func.func @transform_2(%arg0: i32) -> (i32, i32) {
    %c0_i32 = arith.constant 0 : i32
    %c0_i32_0 = arith.constant 0 : i32
    %c0_i32_1 = arith.constant 0 : i32
    return %c0_i32, %c0_i32_0 : i32, i32
  }
  func.func @transform_3(%arg0: i32) -> (i32, i32) {
    %c0_i32 = arith.constant 0 : i32
    %c0_i32_0 = arith.constant 0 : i32
    return %arg0, %c0_i32 : i32, i32
  }
  func.func @transform_4(%arg0: i32) -> (i32, i32) {
    %c0_i32 = arith.constant 0 : i32
    %c0_i32_0 = arith.constant 0 : i32
    return %arg0, %c0_i32 : i32, i32
  }
}

</mosaic_0001>

<bundles_post_ra>
// kernel: block_forward.7
= control target key start
LH: loop header
LB: loop body
LE: loop exit
PB: predicated region body
PF: predicated region fallthrough
CT: control target
= control target key end

     0   :  { %s941_s12 = smov 0   ;;  %s1070_s0 = inlined_call_operand.vmem [shape: f32[8,64,8], index: 0, kind: input, shape index: {}]   ;;  %s1071_s1 = inlined_call_operand.vmem [shape: f32[8,64,8], index: 1, kind: input, shape index: {}]   ;;  %s1072_s2 = inlined_call_operand.vmem [shape: f32[8,64,8], index: 2, kind: input, shape index: {}]   ;;  %s1073_s3 = inlined_call_operand.vmem [shape: f32[8,64,8], index: 3, kind: output, shape index: {}]  }
   0x1 LB: > { %s702_s13 = sadd.s32 4294967295, %s919_s12   ;;  %p706_p0 = scmp.ge.s32.totalorder %s919_s12, 1  ;;  %s919_s12 = sphi %s941_s12, %s13_s12  }
   0x2   : > { %p157_p1 = scmp.lt.s32.totalorder %s919_s12, 9 }
   0x4   : > { %p158_p2 = pnand %p706_p0, %p157_p1 }
   0x5   : > { %p191_p3 = scmp.lt.s32.totalorder (!%p158_p2), %s702_s13, 7  ;;  %vm235_vm0 = vcmask (!%p158_p2), 64512   ;;  %vm397_vm2 = vcmask (!%p158_p2), 523264  }
   0x6   : > { %161 = sbr.rel (%p158_p2) target bundleno = 810 (0x32a), region = 32  ;;  %vm957_vm1 = vmpackc.low (!%p158_p2), %vm235_vm0, %vm235_vm0 }
   0xd   : > { %s1077_s13 = smov (!%p191_p3, %s702_s13), 7 }
   0xe   : > { %s949_s14 = sshll.u32 %s1077_s13, 6 }
   0xf   : > { %s200_s17 = scalar_lea.vmem %s1071_s1, %s949_s14  ;;  %s965_s20 = scalar_lea.vmem %s1070_s0, %s949_s14 }
  0x10   : > { %v219_v1 = vld [vmem:[%s200_s17] sm:$0xff]  ;;  %v220_v2 = vld [vmem:[%s200_s17 + $0x8] sm:$0xff]  ;;  %v221_v3 = vld [vmem:[%s200_s17 + $0x10] sm:$0xff]  ;;  %s205_s23 = scalar_lea.vmem %s1072_s2, %s949_s14  ;;  %s210_s26 = scalar_lea.vmem %s1073_s3, %s949_s14 }
  0x11   : > { %v833_v4 = vpack.c.bf16 %v220_v2, %v219_v1  ;;  %v222_v5 = vld [vmem:[%s200_s17 + $0x18] sm:$0xff]  ;;  %v211_v7 = vld [vmem:[%s965_s20] sm:$0xff]  ;;  %v224_v9 = vld [vmem:[%s200_s17 + $0x28] sm:$0xff] }
  0x12   : > { %v839_v6 = vpack.c.bf16 %v222_v5, %v221_v3  ;;  %793 = vmatprep.mubr.msk.f32.mxu0 %vm235_vm0, %v211_v7  ;;  %v223_v8 = vld [vmem:[%s200_s17 + $0x20] sm:$0xff]  ;;  %v225_v11 = vld [vmem:[%s200_s17 + $0x30] sm:$0xff]  ;;  %v226_v12 = vld [vmem:[%s200_s17 + $0x38] sm:$0xff] }
  0x13   : > { %835 = vmatprep.subr.msk.bf16.mxu0 %vm957_vm1, %v833_v4  ;;  %v845_v10 = vpack.c.bf16 %v224_v9, %v223_v8  ;;  %v851_v13 = vpack.c.bf16 %v226_v12, %v225_v11  ;;  %v212_v14 = vld [vmem:[%s965_s20 + $0x8] sm:$0xff]  ;;  %v213_v15 = vld [vmem:[%s965_s20 + $0x10] sm:$0xff]  ;;  %v214_v16 = vld [vmem:[%s965_s20 + $0x18] sm:$0xff] }
  0x14   : > { %838 = vmatpush3.bf16.xpose.msk.msra.mxu0 %vm957_vm1, %v833_v4  ;;  %v215_v17 = vld [vmem:[%s965_s20 + $0x20] sm:$0xff]  ;;  %v216_v18 = vld [vmem:[%s965_s20 + $0x28] sm:$0xff]  ;;  %v217_v19 = vld [vmem:[%s965_s20 + $0x30] sm:$0xff] }
  0x15   : > { %841 = vmatprep.subr.msk.bf16.mxu0 %vm957_vm1, %v839_v6  ;;  %v218_v20 = vld [vmem:[%s965_s20 + $0x38] sm:$0xff] }
  0x1c   : > { %844 = vmatpush3.bf16.xpose.msk.msra.mxu0 %vm957_vm1, %v839_v6 }
  0x1d   : > { %847 = vmatprep.subr.msk.bf16.mxu0 %vm957_vm1, %v845_v10 }
  0x24   : > { %850 = vmatpush3.bf16.xpose.msk.msra.mxu0 %vm957_vm1, %v845_v10 }
  0x25   : > { %853 = vmatprep.subr.msk.bf16.mxu0 %vm957_vm1, %v851_v13 }
  0x2c   : > { %856 = vmatpush3.bf16.xpose.msk.msra.mxu0 %vm957_vm1, %v851_v13 }
  0x33   : > { %794 = vmatmul.mubr.msk.f32.vlgmr.msra.gmra.mrb[0].mxu0 %vm235_vm0, %v212_v14 }
  0x34   : > { %796 = vmatprep.mubr.msk.f32.mxu0 %vm235_vm0, %v213_v15 }
  0x37   : > { %797 = vmatmul.mubr.msk.f32.gmra.mrb[2].mxu0 %vm235_vm0, %v214_v16 }
  0x38   : > { %799 = vmatprep.mubr.msk.f32.mxu0 %vm235_vm0, %v215_v17 }
  0x3b   : > { %800 = vmatmul.mubr.msk.f32.gmra.mrb[4].mxu0 %vm235_vm0, %v216_v18 }
  0x3c   : > { %802 = vmatprep.mubr.msk.f32.mxu0 %vm235_vm0, %v217_v19  ;;  %v227_v19 = vld [vmem:[%s205_s23] sm:$0xff] }
  0x3f   : > { %803 = vmatmul.mubr.msk.f32.gmra.mrb[6].mxu0 %vm235_vm0, %v218_v20  ;;  %v228_v20 = vld [vmem:[%s205_s23 + $0x8] sm:$0xff] }
 0x106   : > { %v795_v21 = vpop.f32.mrb[0].mxu0 }
 0x107   : > { %v350_v22 = vpop.f32.mrb[1].mxu0  ;;  %v390_v24 = vmul.f32 0.35355338, %v795_v21 }
 0x108   : > { %v389_v23 = vmul.f32 0.35355338, %v350_v22  ;;  %v857_v22 = vpack.c.bf16 %v228_v20, %v227_v19 }
 0x109   : > { %v401_v31 = vsel %vm397_vm2, %v390_v24, -inf }
 0x10a   : > { %v798_v25 = vpop.f32.mrb[2].mxu0  ;;  %v398_v26 = vsel %vm397_vm2, %v389_v23, -inf  ;;  %858 = vmatprep.subr.bf16.mxu1 %v857_v22 }
 0x10b   : > { %399 = vmax.xlane.f32.xlu0 %v398_v26  ;;  %v360_v27 = vpop.f32.mrb[3].mxu0  ;;  %v392_v29 = vmul.f32 0.35355338, %v798_v25  ;;  %860 = vmatpush3.bf16.msra.mxu1 %v857_v22  ;;  %v230_v25 = vld [vmem:[%s205_s23 + $0x18] sm:$0xff] }
 0x10c   : > { %v391_v28 = vmul.f32 0.35355338, %v360_v27  ;;  %v231_v27 = vld [vmem:[%s205_s23 + $0x20] sm:$0xff] }
 0x10d   : > { %v407_v37 = vsel %vm397_vm2, %v392_v29, -inf }
 0x10e   : > { %v801_v30 = vpop.f32.mrb[4].mxu0  ;;  %v404_v32 = vsel %vm397_vm2, %v391_v28, -inf }
 0x10f   : > { %402 = vmax.xlane.f32.xlu0 %v401_v31  ;;  %405 = vmax.xlane.f32.xlu1 %v404_v32  ;;  %v370_v33 = vpop.f32.mrb[5].mxu0  ;;  %v394_v35 = vmul.f32 0.35355338, %v801_v30  ;;  %v233_v30 = vld [vmem:[%s205_s23 + $0x30] sm:$0xff]  ;;  %v234_v31 = vld [vmem:[%s205_s23 + $0x38] sm:$0xff] }
 0x110   : > { %v393_v34 = vmul.f32 0.35355338, %v370_v33  ;;  %v869_v32 = vpack.c.bf16 %v234_v31, %v233_v30 }
 0x111   : > { %v413_v42 = vsel %vm397_vm2, %v394_v35, -inf }
 0x112   : > { %v804_v36 = vpop.f32.mrb[6].mxu0  ;;  %v410_v38 = vsel %vm397_vm2, %v393_v34, -inf }
 0x113   : > { %408 = vmax.xlane.f32.xlu1 %v407_v37  ;;  %411 = vmax.xlane.f32.xlu0 %v410_v38  ;;  %v380_v39 = vpop.f32.mrb[7].mxu0  ;;  %v396_v41 = vmul.f32 0.35355338, %v804_v36 }
 0x114   : > { %v395_v40 = vmul.f32 0.35355338, %v380_v39 }
 0x115   : > { %v419_v44 = vsel %vm397_vm2, %v396_v41, -inf }
 0x116   : > { %v416_v43 = vsel %vm397_vm2, %v395_v40, -inf }
 0x117   : > { %414 = vmax.xlane.f32.xlu1 %v413_v42  ;;  %417 = vmax.xlane.f32.xlu0 %v416_v43 }
 0x11b   : > { %420 = vmax.xlane.f32.xlu1 %v419_v44 }
 0x198   : > { %v400_v45 = vpop.xlane.xlu0 %399 }
 0x199   : > { %v422_v46 = vsub.f32 %v389_v23, %v400_v45 }
 0x19b   : > { %v430_v47 = vmul.f32 1.442695, %v422_v46 }
 0x19c   : > { %v403_v48 = vpop.xlane.xlu0 %402  ;;  %v406_v49 = vpop.xlane.xlu1 %405 }
 0x19d   : > { %881 = vpow2.f32 %v430_v47  ;;  %v423_v50 = vsub.f32 %v390_v24, %v403_v48  ;;  %v424_v51 = vsub.f32 %v391_v28, %v406_v49  ;;  %v229_v24 = vld [vmem:[%s205_s23 + $0x10] sm:$0xff]  ;;  %v232_v28 = vld [vmem:[%s205_s23 + $0x28] sm:$0xff] }
 0x19e   : > { %v861_v26 = vpack.c.bf16 %v230_v25, %v229_v24 }
 0x19f   : > { %v432_v52 = vmul.f32 1.442695, %v423_v50  ;;  %v434_v53 = vmul.f32 1.442695, %v424_v51 }
 0x1a0   : > { %v409_v54 = vpop.xlane.xlu1 %408  ;;  %v412_v55 = vpop.xlane.xlu0 %411  ;;  %862 = vmatprep.subr.bf16.mxu1 %v861_v26 }
 0x1a1   : > { %883 = vpow2.f32 %v432_v52  ;;  %v425_v56 = vsub.f32 %v392_v29, %v409_v54  ;;  %v426_v57 = vsub.f32 %v393_v34, %v412_v55  ;;  %864 = vmatpush3.bf16.msra.mxu1 %v861_v26  ;;  %v865_v29 = vpack.c.bf16 %v232_v28, %v231_v27 }
 0x1a2   : > { %885 = vpow2.f32 %v434_v53 }
 0x1a3   : > { %v436_v58 = vmul.f32 1.442695, %v425_v56  ;;  %v438_v59 = vmul.f32 1.442695, %v426_v57  ;;  %866 = vmatprep.subr.bf16.mxu1 %v865_v29 }
 0x1a4   : > { %v415_v60 = vpop.xlane.xlu1 %414  ;;  %v418_v61 = vpop.xlane.xlu0 %417 }
 0x1a5   : > { %887 = vpow2.f32 %v436_v58  ;;  %v427_v62 = vsub.f32 %v394_v35, %v415_v60  ;;  %v428_v63 = vsub.f32 %v395_v40, %v418_v61  ;;  %868 = vmatpush3.bf16.msra.mxu1 %v865_v29 }
 0x1a6   : > { %889 = vpow2.f32 %v438_v59  ;;  %870 = vmatprep.subr.bf16.mxu1 %v869_v32 }
 0x1a7   : > { %v1007_v0 = vpop.eup %881  ;;  %v440_v1 = vmul.f32 1.442695, %v427_v62  ;;  %v442_v2 = vmul.f32 1.442695, %v428_v63 }
 0x1a8   : > { %v421_v3 = vpop.xlane.xlu1 %420  ;;  %v446_v4 = vsel %vm397_vm2, %v1007_v0, 0.0 }
 0x1a9   : > { %891 = vpow2.f32 %v440_v1  ;;  %v429_v5 = vsub.f32 %v396_v41, %v421_v3  ;;  %447 = vadd.xlane.f32.xlu0 %v446_v4  ;;  %872 = vmatpush3.bf16.msra.mxu1 %v869_v32 }
 0x1aa   : > { %893 = vpow2.f32 %v442_v2 }
 0x1ab   : > { %v1011_v6 = vpop.eup %883  ;;  %v444_v7 = vmul.f32 1.442695, %v429_v5 }
 0x1ac   : > { %v1013_v8 = vpop.eup %885  ;;  %v449_v9 = vsel %vm397_vm2, %v1011_v6, 0.0 }
 0x1ad   : > { %895 = vpow2.f32 %v444_v7  ;;  %450 = vadd.xlane.f32.xlu1 %v449_v9  ;;  %v452_v10 = vsel %vm397_vm2, %v1013_v8, 0.0 }
 0x1ae   : > { %453 = vadd.xlane.f32.xlu0 %v452_v10 }
 0x1af   : > { %v1019_v11 = vpop.eup %887 }
 0x1b0   : > { %v1021_v12 = vpop.eup %889  ;;  %v455_v13 = vsel %vm397_vm2, %v1019_v11, 0.0 }
 0x1b1   : > { %456 = vadd.xlane.f32.xlu1 %v455_v13  ;;  %v458_v14 = vsel %vm397_vm2, %v1021_v12, 0.0 }
 0x1b2   : > { %459 = vadd.xlane.f32.xlu0 %v458_v14 }
 0x1b3   : > { %v1027_v15 = vpop.eup %891 }
 0x1b4   : > { %v1029_v16 = vpop.eup %893  ;;  %v461_v17 = vsel %vm397_vm2, %v1027_v15, 0.0 }
 0x1b5   : > { %462 = vadd.xlane.f32.xlu1 %v461_v17  ;;  %v464_v18 = vsel %vm397_vm2, %v1029_v16, 0.0 }
 0x1b6   : > { %465 = vadd.xlane.f32.xlu0 %v464_v18 }
 0x1b7   : > { %v896_v21 = vpop.eup %895 }
 0x1b8   : > { %v467_v23 = vsel %vm397_vm2, %v896_v21, 0.0 }
 0x1b9   : > { %468 = vadd.xlane.f32.xlu1 %v467_v23 }
 0x236   : > { %v448_v33 = vpop.xlane.xlu0 %447 }
 0x237   : > { %897 = vrcp.f32 %v448_v33 }
 0x23a   : > { %v451_v34 = vpop.xlane.xlu1 %450 }
 0x23b   : > { %899 = vrcp.f32 %v451_v34  ;;  %v454_v35 = vpop.xlane.xlu0 %453 }
 0x23c   : > { %901 = vrcp.f32 %v454_v35 }
 0x23e   : > { %v457_v36 = vpop.xlane.xlu1 %456 }
 0x23f   : > { %903 = vrcp.f32 %v457_v36  ;;  %v460_v37 = vpop.xlane.xlu0 %459 }
 0x240   : > { %905 = vrcp.f32 %v460_v37 }
 0x241   : > { %v898_v38 = vpop.eup %897 }
 0x242   : > { %v463_v39 = vpop.xlane.xlu1 %462  ;;  %v471_v40 = vmul.f32 %v898_v38, %v1007_v0 }
 0x243   : > { %907 = vrcp.f32 %v463_v39  ;;  %v466_v41 = vpop.xlane.xlu0 %465 }
 0x244   : > { %909 = vrcp.f32 %v466_v41  ;;  %821 = vmatprep.mubr.msk.f32.mxu1 %vm397_vm2, %v471_v40 }
 0x245   : > { %v900_v42 = vpop.eup %899 }
 0x246   : > { %v902_v43 = vpop.eup %901  ;;  %v469_v44 = vpop.xlane.xlu1 %468  ;;  %v473_v45 = vmul.f32 %v900_v42, %v1011_v6 }
 0x247   : > { %911 = vrcp.f32 %v469_v44  ;;  %v475_v46 = vmul.f32 %v902_v43, %v1013_v8 }
 0x248   : > { %822 = vmatmul.mubr.msk.f32.vlgmr.msra.gmra.mrb[0].mxu1 %vm397_vm2, %v473_v45 }
 0x249   : > { %v904_v47 = vpop.eup %903  ;;  %824 = vmatprep.mubr.msk.f32.mxu1 %vm397_vm2, %v475_v46 }
 0x24a   : > { %v906_v48 = vpop.eup %905  ;;  %v477_v49 = vmul.f32 %v904_v47, %v1019_v11 }
 0x24b   : > { %v479_v50 = vmul.f32 %v906_v48, %v1021_v12 }
 0x24c   : > { %825 = vmatmul.mubr.msk.f32.gmra.mrb[2].mxu1 %vm397_vm2, %v477_v49 }
 0x24d   : > { %v908_v51 = vpop.eup %907  ;;  %827 = vmatprep.mubr.msk.f32.mxu1 %vm397_vm2, %v479_v50 }
 0x24e   : > { %v910_v52 = vpop.eup %909  ;;  %v481_v53 = vmul.f32 %v908_v51, %v1027_v15 }
 0x24f   : > { %v483_v54 = vmul.f32 %v910_v52, %v1029_v16 }
 0x250   : > { %828 = vmatmul.mubr.msk.f32.gmra.mrb[4].mxu1 %vm397_vm2, %v481_v53 }
 0x251   : > { %v912_v55 = vpop.eup %911  ;;  %830 = vmatprep.mubr.msk.f32.mxu1 %vm397_vm2, %v483_v54 }
 0x252   : > { %v485_v56 = vmul.f32 %v912_v55, %v896_v21 }
 0x254   : > { %831 = vmatmul.mubr.msk.f32.gmra.mrb[6].mxu1 %vm397_vm2, %v485_v56 }
 0x31b   : > { %v823_v57 = vpop.f32.mrb[0].mxu1 }
 0x31c   : > { %616 = vst.msk [vmem:[%s210_s26 + $0x8] sm:$0xff] %vm235_vm0, %v823_v57  ;;  %v576_v58 = vpop.f32.mrb[1].mxu1 }
 0x31d   : > { %615 = vst.msk [vmem:[%s210_s26] sm:$0xff] %vm235_vm0, %v576_v58 }
 0x31f   : > { %v826_v59 = vpop.f32.mrb[2].mxu1 }
 0x320   : > { %618 = vst.msk [vmem:[%s210_s26 + $0x18] sm:$0xff] %vm235_vm0, %v826_v59  ;;  %v586_v60 = vpop.f32.mrb[3].mxu1 }
 0x321   : > { %617 = vst.msk [vmem:[%s210_s26 + $0x10] sm:$0xff] %vm235_vm0, %v586_v60 }
 0x323   : > { %v829_v61 = vpop.f32.mrb[4].mxu1 }
 0x324   : > { %620 = vst.msk [vmem:[%s210_s26 + $0x28] sm:$0xff] %vm235_vm0, %v829_v61  ;;  %v596_v62 = vpop.f32.mrb[5].mxu1 }
 0x325   : > { %619 = vst.msk [vmem:[%s210_s26 + $0x20] sm:$0xff] %vm235_vm0, %v596_v62 }
 0x327   : > { %v832_v63 = vpop.f32.mrb[6].mxu1 }
 0x328   : > { %622 = vst.msk [vmem:[%s210_s26 + $0x38] sm:$0xff] %vm235_vm0, %v832_v63  ;;  %v606_v0 = vpop.f32.mrb[7].mxu1 }
 0x329   : > { %621 = vst.msk [vmem:[%s210_s26 + $0x30] sm:$0xff] %vm235_vm0, %v606_v0 }
 0x32a PF: > { %s13_s12 = sadd.s32 1, %s919_s12  }
 0x32b   : > { %p10_p4 = scmp.ge.s32.totalorder %s13_s12, 10  }
 0x32d   :  { %12 = sbr.rel (!%p10_p4) target bundleno = 1 (0x1), region = 68 }

// kernel: block_forward.6
= control target key start
LH: loop header
LB: loop body
LE: loop exit
PB: predicated region body
PF: predicated region fallthrough
CT: control target
= control target key end

     0   :  { %vm36_vm0 = vcmask 261120   ;;  %vm496_vm1 = vcmask 785408   ;;  %s999_s0 = inlined_call_operand.vmem [shape: f32[128,32], index: 0, kind: input, shape index: {}]   ;;  %s1000_s3 = inlined_call_operand.vmem [shape: f32[32,96], index: 3, kind: input, shape index: {}]   ;;  %s1001_s1 = inlined_call_operand.vmem [shape: f32[1,32], index: 1, kind: input, shape index: {}]   ;;  %s1002_s2 = inlined_call_operand.vmem [shape: f32[1,32], index: 2, kind: input, shape index: {}]   ;;  %s1003_s4 = inlined_call_operand.vmem [shape: f32[1,96], index: 4, kind: input, shape index: {}]   ;;  %s1004_s5 = inlined_call_operand.vmem [shape: f32[128,96], index: 5, kind: output, shape index: {}]  }
   0x1   :  { %v20_v0 = vld [vmem:[%s999_s0] sm:$0xff]  ;;  %v21_v1 = vld [vmem:[%s999_s0 + $0x8] sm:$0xff]  ;;  %v22_v8 = vld [vmem:[%s999_s0 + $0x10] sm:$0xff] }
   0x2   :  { %v28_v2 = vld [vmem:[%s999_s0 + $0x40] sm:$0xff]  ;;  %v37_v3 = vsel %vm36_vm0, %v20_v0, 0.0  ;;  %v40_v4 = vsel %vm36_vm0, %v21_v1, 0.0  ;;  %v29_v5 = vld [vmem:[%s999_s0 + $0x48] sm:$0xff]  ;;  %v30_v9 = vld [vmem:[%s999_s0 + $0x50] sm:$0xff]  ;;  %v43_v10 = vsel %vm36_vm0, %v22_v8, 0.0 }
   0x3   :  { %38 = vadd.xlane.f32.xlu0 %v37_v3  ;;  %41 = vadd.xlane.f32.xlu1 %v40_v4  ;;  %v61_v6 = vsel %vm36_vm0, %v28_v2, 0.0  ;;  %v64_v7 = vsel %vm36_vm0, %v29_v5, 0.0  ;;  %v67_v11 = vsel %vm36_vm0, %v30_v9, 0.0  ;;  %v689_v12 = vld [vmem:[%s999_s0 + $0x18] sm:$0xff]  ;;  %v703_v16 = vld [vmem:[%s999_s0 + $0x20] sm:$0xff]  ;;  %v717_v20 = vld [vmem:[%s999_s0 + $0x28] sm:$0xff] }
   0x4   :  { %v694_v13 = vld [vmem:[%s999_s0 + $0x58] sm:$0xff]  ;;  %v46_v14 = vsel %vm36_vm0, %v689_v12, 0.0  ;;  %v708_v17 = vld [vmem:[%s999_s0 + $0x60] sm:$0xff]  ;;  %v49_v18 = vsel %vm36_vm0, %v703_v16, 0.0  ;;  %v722_v21 = vld [vmem:[%s999_s0 + $0x68] sm:$0xff]  ;;  %v52_v22 = vsel %vm36_vm0, %v717_v20, 0.0 }
   0x5   :  { %v70_v15 = vsel %vm36_vm0, %v694_v13, 0.0  ;;  %v73_v19 = vsel %vm36_vm0, %v708_v17, 0.0  ;;  %v76_v23 = vsel %vm36_vm0, %v722_v21, 0.0  ;;  %v731_v24 = vld [vmem:[%s999_s0 + $0x30] sm:$0xff]  ;;  %v745_v28 = vld [vmem:[%s999_s0 + $0x38] sm:$0xff] }
   0x6   :  { %v736_v25 = vld [vmem:[%s999_s0 + $0x70] sm:$0xff]  ;;  %v55_v26 = vsel %vm36_vm0, %v731_v24, 0.0  ;;  %v750_v29 = vld [vmem:[%s999_s0 + $0x78] sm:$0xff]  ;;  %v58_v30 = vsel %vm36_vm0, %v745_v28, 0.0 }
   0x7   :  { %62 = vadd.xlane.f32.xlu0 %v61_v6  ;;  %65 = vadd.xlane.f32.xlu1 %v64_v7  ;;  %v79_v27 = vsel %vm36_vm0, %v736_v25, 0.0  ;;  %v82_v31 = vsel %vm36_vm0, %v750_v29, 0.0 }
   0xb   :  { %44 = vadd.xlane.f32.xlu0 %v43_v10  ;;  %68 = vadd.xlane.f32.xlu1 %v67_v11 }
   0xf   :  { %47 = vadd.xlane.f32.xlu0 %v46_v14  ;;  %71 = vadd.xlane.f32.xlu1 %v70_v15 }
  0x13   :  { %50 = vadd.xlane.f32.xlu0 %v49_v18  ;;  %74 = vadd.xlane.f32.xlu1 %v73_v19 }
  0x17   :  { %53 = vadd.xlane.f32.xlu0 %v52_v22  ;;  %77 = vadd.xlane.f32.xlu1 %v76_v23 }
  0x1b   :  { %56 = vadd.xlane.f32.xlu0 %v55_v26  ;;  %80 = vadd.xlane.f32.xlu1 %v79_v27 }
  0x1f   :  { %59 = vadd.xlane.f32.xlu0 %v58_v30  ;;  %83 = vadd.xlane.f32.xlu1 %v82_v31 }
  0x90   :  { %v39_v32 = vpop.xlane.xlu0 %38  ;;  %v42_v33 = vpop.xlane.xlu1 %41 }
  0x91   :  { %v86_v34 = vmul.f32 0.03125, %v39_v32  ;;  %v87_v35 = vmul.f32 0.03125, %v42_v33 }
  0x93   :  { %v756_v36 = vsub.f32 %v20_v0, %v86_v34  ;;  %v758_v37 = vsub.f32 %v21_v1, %v87_v35 }
  0x94   :  { %v63_v38 = vpop.xlane.xlu0 %62  ;;  %v66_v39 = vpop.xlane.xlu1 %65 }
  0x95   :  { %v94_v40 = vmul.f32 0.03125, %v63_v38  ;;  %v95_v41 = vmul.f32 0.03125, %v66_v39  ;;  %v118_v42 = vmul.f32 %v756_v36, %v756_v36  ;;  %v119_v43 = vmul.f32 %v758_v37, %v758_v37 }
  0x97   :  { %v764_v44 = vsub.f32 %v28_v2, %v94_v40  ;;  %v766_v45 = vsub.f32 %v29_v5, %v95_v41  ;;  %v134_v46 = vsel %vm36_vm0, %v118_v42, 0.0  ;;  %v137_v49 = vsel %vm36_vm0, %v119_v43, 0.0 }
  0x98   :  { %135 = vadd.xlane.f32.xlu0 %v134_v46  ;;  %v45_v47 = vpop.xlane.xlu0 %44  ;;  %v69_v48 = vpop.xlane.xlu1 %68 }
  0x99   :  { %v88_v50 = vmul.f32 0.03125, %v45_v47  ;;  %v96_v51 = vmul.f32 0.03125, %v69_v48  ;;  %v126_v52 = vmul.f32 %v764_v44, %v764_v44  ;;  %v127_v53 = vmul.f32 %v766_v45, %v766_v45 }
  0x9b   :  { %v774_v54 = vsub.f32 %v22_v8, %v88_v50  ;;  %v776_v55 = vsub.f32 %v30_v9, %v96_v51  ;;  %v158_v56 = vsel %vm36_vm0, %v126_v52, 0.0  ;;  %v161_v59 = vsel %vm36_vm0, %v127_v53, 0.0  ;;  %v293_v53 = vld [vmem:[%s1000_s3 + $0x8] sm:$0xff] }
  0x9c   :  { %138 = vadd.xlane.f32.xlu0 %v137_v49  ;;  %159 = vadd.xlane.f32.xlu1 %v158_v56  ;;  %v48_v57 = vpop.xlane.xlu0 %47  ;;  %v72_v58 = vpop.xlane.xlu1 %71 }
  0x9d   :  { %v89_v60 = vmul.f32 0.03125, %v48_v57  ;;  %v97_v61 = vmul.f32 0.03125, %v72_v58  ;;  %v120_v62 = vmul.f32 %v774_v54, %v774_v54  ;;  %v128_v63 = vmul.f32 %v776_v55, %v776_v55  ;;  %v294_v57 = vld [vmem:[%s1000_s3 + $0x10] sm:$0xff]  ;;  %v295_v58 = vld [vmem:[%s1000_s3 + $0x18] sm:$0xff] }
  0x9f   :  { %v785_v0 = vsub.f32 %v689_v12, %v89_v60  ;;  %v788_v1 = vsub.f32 %v694_v13, %v97_v61  ;;  %v140_v2 = vsel %vm36_vm0, %v120_v62, 0.0  ;;  %v164_v5 = vsel %vm36_vm0, %v128_v63, 0.0 }
  0xa0   :  { %162 = vadd.xlane.f32.xlu1 %v161_v59  ;;  %141 = vadd.xlane.f32.xlu0 %v140_v2  ;;  %v51_v3 = vpop.xlane.xlu0 %50  ;;  %v75_v4 = vpop.xlane.xlu1 %74  ;;  %v592_v59 = vpack.c.bf16 %v295_v58, %v294_v57 }
  0xa1   :  { %v90_v6 = vmul.f32 0.03125, %v51_v3  ;;  %v98_v7 = vmul.f32 0.03125, %v75_v4  ;;  %v121_v8 = vmul.f32 %v785_v0, %v785_v0  ;;  %v129_v9 = vmul.f32 %v788_v1, %v788_v1 }
  0xa3   :  { %v797_v10 = vsub.f32 %v703_v16, %v90_v6  ;;  %v800_v11 = vsub.f32 %v708_v17, %v98_v7  ;;  %v143_v12 = vsel %vm36_vm0, %v121_v8, 0.0  ;;  %v167_v15 = vsel %vm36_vm0, %v129_v9, 0.0 }
  0xa4   :  { %165 = vadd.xlane.f32.xlu1 %v164_v5  ;;  %144 = vadd.xlane.f32.xlu0 %v143_v12  ;;  %v54_v13 = vpop.xlane.xlu0 %53  ;;  %v78_v14 = vpop.xlane.xlu1 %77 }
  0xa5   :  { %v91_v18 = vmul.f32 0.03125, %v54_v13  ;;  %v99_v19 = vmul.f32 0.03125, %v78_v14  ;;  %v122_v22 = vmul.f32 %v797_v10, %v797_v10  ;;  %v130_v16 = vmul.f32 %v800_v11, %v800_v11 }
  0xa7   :  { %v809_v23 = vsub.f32 %v717_v20, %v91_v18  ;;  %v812_v17 = vsub.f32 %v722_v21, %v99_v19  ;;  %v146_v26 = vsel %vm36_vm0, %v122_v22, 0.0  ;;  %v170_v31 = vsel %vm36_vm0, %v130_v16, 0.0 }
  0xa8   :  { %168 = vadd.xlane.f32.xlu1 %v167_v15  ;;  %147 = vadd.xlane.f32.xlu0 %v146_v26  ;;  %v57_v27 = vpop.xlane.xlu0 %56  ;;  %v81_v30 = vpop.xlane.xlu1 %80 }
  0xa9   :  { %v92_v32 = vmul.f32 0.03125, %v57_v27  ;;  %v100_v33 = vmul.f32 0.03125, %v81_v30  ;;  %v123_v34 = vmul.f32 %v809_v23, %v809_v23  ;;  %v131_v20 = vmul.f32 %v812_v17, %v812_v17  ;;  %v861_v30 = vld [vmem:[%s1001_s1] ss:$0 sm:$0xff] }
  0xab   :  { %v821_v35 = vsub.f32 %v731_v24, %v92_v32  ;;  %v824_v21 = vsub.f32 %v736_v25, %v100_v33  ;;  %v149_v38 = vsel %vm36_vm0, %v123_v34, 0.0  ;;  %v173_v41 = vsel %vm36_vm0, %v131_v20, 0.0 }
  0xac   :  { %171 = vadd.xlane.f32.xlu1 %v170_v31  ;;  %150 = vadd.xlane.f32.xlu0 %v149_v38  ;;  %v60_v39 = vpop.xlane.xlu0 %59  ;;  %v84_v40 = vpop.xlane.xlu1 %83  ;;  %v867_v38 = vld [vmem:[%s1002_s2] ss:$0 sm:$0xff] }
  0xad   :  { %v93_v42 = vmul.f32 0.03125, %v60_v39  ;;  %v101_v43 = vmul.f32 0.03125, %v84_v40  ;;  %v124_v46 = vmul.f32 %v821_v35, %v821_v35  ;;  %v132_v24 = vmul.f32 %v824_v21, %v824_v21 }
  0xaf   :  { %v833_v47 = vsub.f32 %v745_v28, %v93_v42  ;;  %v836_v25 = vsub.f32 %v750_v29, %v101_v43  ;;  %v152_v48 = vsel %vm36_vm0, %v124_v46, 0.0  ;;  %v176_v49 = vsel %vm36_vm0, %v132_v24, 0.0  ;;  %v292_v29 = vld [vmem:[%s1000_s3] sm:$0xff] }
  0xb0   :  { %174 = vadd.xlane.f32.xlu1 %v173_v41  ;;  %153 = vadd.xlane.f32.xlu0 %v152_v48  ;;  %v588_v56 = vpack.c.bf16 %v293_v53, %v292_v29 }
  0xb1   :  { %v125_v50 = vmul.f32 %v833_v47, %v833_v47  ;;  %v133_v51 = vmul.f32 %v836_v25, %v836_v25 }
  0xb2   :  { %589 = vmatprep.subr.bf16.mxu0 %v588_v56  ;;  %596 = vmatprep.subr.bf16.mxu1 %v588_v56 }
  0xb3   :  { %v155_v52 = vsel %vm36_vm0, %v125_v50, 0.0  ;;  %v179_v28 = vsel %vm36_vm0, %v133_v51, 0.0  ;;  %591 = vmatpush3.bf16.msra.mxu0 %v588_v56  ;;  %598 = vmatpush3.bf16.msra.mxu1 %v588_v56 }
  0xb4   :  { %177 = vadd.xlane.f32.xlu1 %v176_v49  ;;  %156 = vadd.xlane.f32.xlu0 %v155_v52 }
  0xb5   :  { %593 = vmatprep.subr.bf16.mxu0 %v592_v59  ;;  %597 = vmatprep.subr.bf16.mxu1 %v592_v59 }
  0xb7   :  { %595 = vmatpush3.bf16.msra.mxu0 %v592_v59  ;;  %599 = vmatpush3.bf16.msra.mxu1 %v592_v59 }
  0xb8   :  { %180 = vadd.xlane.f32.xlu1 %v179_v28 }
 0x125   :  { %v136_v60 = vpop.xlane.xlu0 %135 }
 0x126   :  { %v182_v61 = vmul.f32 0.03125, %v136_v60 }
 0x128   :  { %v198_v62 = vadd.f32 1e-05, %v182_v61 }
 0x129   :  { %v160_v63 = vpop.xlane.xlu1 %159  ;;  %v139_v2 = vpop.xlane.xlu0 %138 }
 0x12a   :  { %600 = vrsqrt.f32 %v198_v62  ;;  %v190_v3 = vmul.f32 0.03125, %v160_v63  ;;  %v183_v4 = vmul.f32 0.03125, %v139_v2 }
 0x12c   :  { %v206_v5 = vadd.f32 1e-05, %v190_v3  ;;  %v199_v6 = vadd.f32 1e-05, %v183_v4 }
 0x12d   :  { %v163_v7 = vpop.xlane.xlu1 %162  ;;  %v142_v8 = vpop.xlane.xlu0 %141 }
 0x12e   :  { %602 = vrsqrt.f32 %v206_v5  ;;  %v191_v9 = vmul.f32 0.03125, %v163_v7  ;;  %v184_v12 = vmul.f32 0.03125, %v142_v8 }
 0x12f   :  { %604 = vrsqrt.f32 %v199_v6 }
 0x130   :  { %v207_v13 = vadd.f32 1e-05, %v191_v9  ;;  %v200_v14 = vadd.f32 1e-05, %v184_v12 }
 0x131   :  { %v166_v15 = vpop.xlane.xlu1 %165  ;;  %v145_v18 = vpop.xlane.xlu0 %144 }
 0x132   :  { %606 = vrsqrt.f32 %v207_v13  ;;  %v192_v19 = vmul.f32 0.03125, %v166_v15  ;;  %v185_v22 = vmul.f32 0.03125, %v145_v18 }
 0x133   :  { %608 = vrsqrt.f32 %v200_v14 }
 0x134   :  { %v601_v16 = vpop.eup %600  ;;  %v208_v26 = vadd.f32 1e-05, %v192_v19  ;;  %v201_v27 = vadd.f32 1e-05, %v185_v22 }
 0x135   :  { %v169_v31 = vpop.xlane.xlu1 %168  ;;  %v148_v32 = vpop.xlane.xlu0 %147  ;;  %v230_v33 = vmul.f32 %v601_v16, %v756_v36 }
 0x136   :  { %610 = vrsqrt.f32 %v208_v26  ;;  %v193_v34 = vmul.f32 0.03125, %v169_v31  ;;  %v186_v20 = vmul.f32 0.03125, %v148_v32 }
 0x137   :  { %612 = vrsqrt.f32 %v201_v27  ;;  %v253_v39 = vmul.f32 %v861_v30, %v230_v33 }
 0x138   :  { %v603_v40 = vpop.eup %602  ;;  %v209_v41 = vadd.f32 1e-05, %v193_v34  ;;  %v202_v42 = vadd.f32 1e-05, %v186_v20 }
 0x139   :  { %v605_v43 = vpop.eup %604  ;;  %v172_v46 = vpop.xlane.xlu1 %171  ;;  %v276_v48 = vadd.f32 %v867_v38, %v253_v39  ;;  %v238_v36 = vmul.f32 %v603_v40, %v764_v44 }
 0x13a   :  { %v151_v24 = vpop.xlane.xlu0 %150  ;;  %614 = vrsqrt.f32 %v209_v41  ;;  %v194_v49 = vmul.f32 0.03125, %v172_v46  ;;  %v231_v51 = vmul.f32 %v605_v43, %v758_v37 }
 0x13b   :  { %v187_v50 = vmul.f32 0.03125, %v151_v24  ;;  %616 = vrsqrt.f32 %v202_v42  ;;  %564 = vmatprep.mubr.msk.f32.mxu0 %vm36_vm0, %v276_v48  ;;  %v261_v52 = vmul.f32 %v861_v30, %v238_v36 }
 0x13c   :  { %v607_v28 = vpop.eup %606  ;;  %v210_v29 = vadd.f32 1e-05, %v194_v49  ;;  %v254_v56 = vmul.f32 %v861_v30, %v231_v51 }
 0x13d   :  { %v203_v53 = vadd.f32 1e-05, %v187_v50  ;;  %v609_v57 = vpop.eup %608  ;;  %v175_v58 = vpop.xlane.xlu1 %174  ;;  %v284_v44 = vadd.f32 %v867_v38, %v261_v52  ;;  %v239_v60 = vmul.f32 %v607_v28, %v766_v45 }
 0x13e   :  { %v154_v59 = vpop.xlane.xlu0 %153  ;;  %618 = vrsqrt.f32 %v210_v29  ;;  %v195_v61 = vmul.f32 0.03125, %v175_v58  ;;  %v277_v62 = vadd.f32 %v867_v38, %v254_v56  ;;  %v232_v63 = vmul.f32 %v609_v57, %v774_v54 }
 0x13f   :  { %v188_v37 = vmul.f32 0.03125, %v154_v59  ;;  %620 = vrsqrt.f32 %v203_v53  ;;  %576 = vmatprep.mubr.msk.f32.mxu1 %vm36_vm0, %v284_v44  ;;  %v262_v2 = vmul.f32 %v861_v30, %v239_v60 }
 0x140   :  { %v611_v3 = vpop.eup %610  ;;  %v211_v4 = vadd.f32 1e-05, %v195_v61  ;;  %565 = vmatmul.mubr.msk.f32.vlgmr.msra.gmra.mrb[0].mxu0 %vm36_vm0, %v277_v62  ;;  %v255_v8 = vmul.f32 %v861_v30, %v232_v63  ;;  %v519_v62 = vld [vmem:[%s1003_s4] ss:$0 sm:$0xff] }
 0x141   :  { %v204_v5 = vadd.f32 1e-05, %v188_v37  ;;  %v613_v6 = vpop.eup %612  ;;  %v178_v7 = vpop.xlane.xlu1 %177  ;;  %v285_v9 = vadd.f32 %v867_v38, %v262_v2  ;;  %v240_v12 = vmul.f32 %v611_v3, %v776_v55 }
 0x142   :  { %v157_v45 = vpop.xlane.xlu0 %156  ;;  %622 = vrsqrt.f32 %v211_v4  ;;  %v196_v13 = vmul.f32 0.03125, %v178_v7  ;;  %v233_v54 = vmul.f32 %v613_v6, %v785_v0  ;;  %v278_v15 = vadd.f32 %v867_v38, %v255_v8 }
 0x143   :  { %v189_v14 = vmul.f32 0.03125, %v157_v45  ;;  %624 = vrsqrt.f32 %v204_v5  ;;  %577 = vmatmul.mubr.msk.f32.vlgmr.msra.gmra.mrb[0].mxu1 %vm36_vm0, %v285_v9  ;;  %v263_v18 = vmul.f32 %v861_v30, %v240_v12 }
 0x144   :  { %v615_v19 = vpop.eup %614  ;;  %v212_v22 = vadd.f32 1e-05, %v196_v13  ;;  %v256_v26 = vmul.f32 %v861_v30, %v233_v54  ;;  %567 = vmatprep.mubr.msk.f32.mxu0 %vm36_vm0, %v278_v15 }
 0x145   :  { %v205_v16 = vadd.f32 1e-05, %v189_v14  ;;  %v617_v27 = vpop.eup %616  ;;  %v181_v55 = vpop.xlane.xlu1 %180  ;;  %v286_v31 = vadd.f32 %v867_v38, %v263_v18  ;;  %v241_v0 = vmul.f32 %v615_v19, %v788_v1 }
 0x146   :  { %626 = vrsqrt.f32 %v212_v22  ;;  %v197_v32 = vmul.f32 0.03125, %v181_v55  ;;  %v279_v33 = vadd.f32 %v867_v38, %v256_v26  ;;  %v234_v34 = vmul.f32 %v617_v27, %v797_v10 }
 0x147   :  { %628 = vrsqrt.f32 %v205_v16  ;;  %579 = vmatprep.mubr.msk.f32.mxu1 %vm36_vm0, %v286_v31  ;;  %v264_v20 = vmul.f32 %v861_v30, %v241_v0 }
 0x148   :  { %v619_v39 = vpop.eup %618  ;;  %v213_v40 = vadd.f32 1e-05, %v197_v32  ;;  %568 = vmatmul.mubr.msk.f32.gmra.mrb[2].mxu0 %vm36_vm0, %v279_v33  ;;  %v257_v41 = vmul.f32 %v861_v30, %v234_v34 }
 0x149   :  { %v621_v42 = vpop.eup %620  ;;  %v287_v1 = vadd.f32 %v867_v38, %v264_v20  ;;  %v242_v43 = vmul.f32 %v619_v39, %v800_v11 }
 0x14a   :  { %630 = vrsqrt.f32 %v213_v40  ;;  %v280_v46 = vadd.f32 %v867_v38, %v257_v41  ;;  %v235_v10 = vmul.f32 %v621_v42, %v809_v23 }
 0x14b   :  { %580 = vmatmul.mubr.msk.f32.gmra.mrb[2].mxu1 %vm36_vm0, %v287_v1  ;;  %v265_v24 = vmul.f32 %v861_v30, %v242_v43 }
 0x14c   :  { %v623_v48 = vpop.eup %622  ;;  %570 = vmatprep.mubr.msk.f32.mxu0 %vm36_vm0, %v280_v46  ;;  %v258_v36 = vmul.f32 %v861_v30, %v235_v10 }
 0x14d   :  { %v625_v49 = vpop.eup %624  ;;  %v288_v50 = vadd.f32 %v867_v38, %v265_v24  ;;  %v243_v51 = vmul.f32 %v623_v48, %v812_v17 }
 0x14e   :  { %v281_v11 = vadd.f32 %v867_v38, %v258_v36  ;;  %v236_v52 = vmul.f32 %v625_v49, %v821_v35 }
 0x14f   :  { %582 = vmatprep.mubr.msk.f32.mxu1 %vm36_vm0, %v288_v50  ;;  %v266_v23 = vmul.f32 %v861_v30, %v243_v51 }
 0x150   :  { %v627_v28 = vpop.eup %626  ;;  %571 = vmatmul.mubr.msk.f32.gmra.mrb[4].mxu0 %vm36_vm0, %v281_v11  ;;  %v259_v29 = vmul.f32 %v861_v30, %v236_v52 }
 0x151   :  { %v629_v53 = vpop.eup %628  ;;  %v289_v56 = vadd.f32 %v867_v38, %v266_v23  ;;  %v244_v57 = vmul.f32 %v627_v28, %v824_v21 }
 0x152   :  { %v282_v17 = vadd.f32 %v867_v38, %v259_v29  ;;  %v237_v58 = vmul.f32 %v629_v53, %v833_v47 }
 0x153   :  { %583 = vmatmul.mubr.msk.f32.gmra.mrb[4].mxu1 %vm36_vm0, %v289_v56  ;;  %v267_v35 = vmul.f32 %v861_v30, %v244_v57 }
 0x154   :  { %v631_v59 = vpop.eup %630  ;;  %573 = vmatprep.mubr.msk.f32.mxu0 %vm36_vm0, %v282_v17  ;;  %v260_v44 = vmul.f32 %v861_v30, %v237_v58 }
 0x155   :  { %v290_v60 = vadd.f32 %v867_v38, %v267_v35  ;;  %v245_v61 = vmul.f32 %v631_v59, %v836_v25 }
 0x156   :  { %v283_v37 = vadd.f32 %v867_v38, %v260_v44 }
 0x157   :  { %585 = vmatprep.mubr.msk.f32.mxu1 %vm36_vm0, %v290_v60  ;;  %v268_v21 = vmul.f32 %v861_v30, %v245_v61 }
 0x158   :  { %574 = vmatmul.mubr.msk.f32.gmra.mrb[6].mxu0 %vm36_vm0, %v283_v37 }
 0x159   :  { %v291_v47 = vadd.f32 %v867_v38, %v268_v21 }
 0x15b   :  { %586 = vmatmul.mubr.msk.f32.gmra.mrb[6].mxu1 %vm36_vm0, %v291_v47 }
 0x213   :  { %v566_v63 = vpop.f32.mrb[0].mxu0 }
 0x214   :  { %v423_v2 = vadd.f32 %v566_v63, %v519_v62  ;;  %v417_v25 = vpop.f32.mrb[1].mxu0 }
 0x215   :  { %v418_v3 = vadd.f32 %v519_v62, %v417_v25 }
 0x216   :  { %498 = vst.msk [vmem:[%s1004_s5 + $0x8] sm:$0xff] %vm496_vm1, %v423_v2  ;;  %v578_v30 = vpop.f32.mrb[0].mxu1 }
 0x217   :  { %497 = vst.msk [vmem:[%s1004_s5] sm:$0xff] %vm496_vm1, %v418_v3  ;;  %v463_v38 = vadd.f32 %v578_v30, %v519_v62  ;;  %v457_v4 = vpop.f32.mrb[1].mxu1 }
 0x218   :  { %v458_v5 = vadd.f32 %v519_v62, %v457_v4 }
 0x219   :  { %506 = vst.msk [vmem:[%s1004_s5 + $0x48] sm:$0xff] %vm496_vm1, %v463_v38 }
 0x21a   :  { %505 = vst.msk [vmem:[%s1004_s5 + $0x40] sm:$0xff] %vm496_vm1, %v458_v5 }
 0x21b   :  { %v569_v6 = vpop.f32.mrb[2].mxu0 }
 0x21c   :  { %v433_v7 = vadd.f32 %v569_v6, %v519_v62  ;;  %v427_v45 = vpop.f32.mrb[3].mxu0 }
 0x21d   :  { %v428_v8 = vadd.f32 %v519_v62, %v427_v45 }
 0x21e   :  { %500 = vst.msk [vmem:[%s1004_s5 + $0x18] sm:$0xff] %vm496_vm1, %v433_v7  ;;  %v581_v9 = vpop.f32.mrb[2].mxu1 }
 0x21f   :  { %499 = vst.msk [vmem:[%s1004_s5 + $0x10] sm:$0xff] %vm496_vm1, %v428_v8  ;;  %v473_v12 = vadd.f32 %v581_v9, %v519_v62  ;;  %v467_v13 = vpop.f32.mrb[3].mxu1 }
 0x220   :  { %v468_v14 = vadd.f32 %v519_v62, %v467_v13 }
 0x221   :  { %508 = vst.msk [vmem:[%s1004_s5 + $0x58] sm:$0xff] %vm496_vm1, %v473_v12 }
 0x222   :  { %507 = vst.msk [vmem:[%s1004_s5 + $0x50] sm:$0xff] %vm496_vm1, %v468_v14 }
 0x223   :  { %v572_v54 = vpop.f32.mrb[4].mxu0 }
 0x224   :  { %v443_v15 = vadd.f32 %v572_v54, %v519_v62  ;;  %v437_v18 = vpop.f32.mrb[5].mxu0 }
 0x225   :  { %v438_v19 = vadd.f32 %v519_v62, %v437_v18 }
 0x226   :  { %502 = vst.msk [vmem:[%s1004_s5 + $0x28] sm:$0xff] %vm496_vm1, %v443_v15  ;;  %v584_v22 = vpop.f32.mrb[4].mxu1 }
 0x227   :  { %501 = vst.msk [vmem:[%s1004_s5 + $0x20] sm:$0xff] %vm496_vm1, %v438_v19  ;;  %v483_v16 = vadd.f32 %v584_v22, %v519_v62  ;;  %v477_v26 = vpop.f32.mrb[5].mxu1 }
 0x228   :  { %v478_v27 = vadd.f32 %v519_v62, %v477_v26 }
 0x229   :  { %510 = vst.msk [vmem:[%s1004_s5 + $0x68] sm:$0xff] %vm496_vm1, %v483_v16 }
 0x22a   :  { %509 = vst.msk [vmem:[%s1004_s5 + $0x60] sm:$0xff] %vm496_vm1, %v478_v27 }
 0x22b   :  { %v575_v55 = vpop.f32.mrb[6].mxu0 }
 0x22c   :  { %v453_v31 = vadd.f32 %v575_v55, %v519_v62  ;;  %v447_v0 = vpop.f32.mrb[7].mxu0 }
 0x22d   :  { %v448_v32 = vadd.f32 %v519_v62, %v447_v0 }
 0x22e   :  { %504 = vst.msk [vmem:[%s1004_s5 + $0x38] sm:$0xff] %vm496_vm1, %v453_v31  ;;  %v587_v33 = vpop.f32.mrb[6].mxu1 }
 0x22f   :  { %503 = vst.msk [vmem:[%s1004_s5 + $0x30] sm:$0xff] %vm496_vm1, %v448_v32  ;;  %v493_v34 = vadd.f32 %v587_v33, %v519_v62  ;;  %v487_v20 = vpop.f32.mrb[7].mxu1 }
 0x230   :  { %v488_v39 = vadd.f32 %v519_v62, %v487_v20 }
 0x231   :  { %512 = vst.msk [vmem:[%s1004_s5 + $0x78] sm:$0xff] %vm496_vm1, %v493_v34 }
 0x232   :  { %511 = vst.msk [vmem:[%s1004_s5 + $0x70] sm:$0xff] %vm496_vm1, %v488_v39 }

// kernel: block_forward.8
= control target key start
LH: loop header
LB: loop body
LE: loop exit
PB: predicated region body
PF: predicated region fallthrough
CT: control target
= control target key end

     0   :  { %vm44_vm0 = vcmask 261120   ;;  %s605_s1 = inlined_call_operand.vmem [shape: f32[32,32], index: 1, kind: input, shape index: {}]   ;;  %s606_s0 = inlined_call_operand.vmem [shape: f32[128,32], index: 0, kind: input, shape index: {}]   ;;  %s607_s2 = inlined_call_operand.vmem [shape: f32[1,32], index: 2, kind: input, shape index: {}]   ;;  %s608_s3 = inlined_call_operand.vmem [shape: f32[128,32], index: 3, kind: input, shape index: {}]   ;;  %s609_s4 = inlined_call_operand.vmem [shape: f32[128,32], index: 4, kind: output, shape index: {}]  }
   0x1   :  { %v33_v0 = vld [vmem:[%s605_s1] sm:$0xff]  ;;  %v34_v1 = vld [vmem:[%s605_s1 + $0x8] sm:$0xff]  ;;  %v35_v2 = vld [vmem:[%s605_s1 + $0x10] sm:$0xff] }
   0x2   :  { %v359_v3 = vpack.c.bf16 %v34_v1, %v33_v0  ;;  %v36_v4 = vld [vmem:[%s605_s1 + $0x18] sm:$0xff]  ;;  %v17_v5 = vld [vmem:[%s606_s0] sm:$0xff]  ;;  %v18_v8 = vld [vmem:[%s606_s0 + $0x8] sm:$0xff] }
   0x3   :  { %v25_v6 = vld [vmem:[%s606_s0 + $0x40] sm:$0xff]  ;;  %v363_v7 = vpack.c.bf16 %v36_v4, %v35_v2  ;;  %335 = vmatprep.mubr.msk.f32.mxu0 %vm44_vm0, %v17_v5  ;;  %v26_v9 = vld [vmem:[%s606_s0 + $0x48] sm:$0xff]  ;;  %v19_v10 = vld [vmem:[%s606_s0 + $0x10] sm:$0xff] }
   0x4   :  { %347 = vmatprep.mubr.msk.f32.mxu1 %vm44_vm0, %v25_v6  ;;  %360 = vmatprep.subr.bf16.mxu0 %v359_v3  ;;  %v27_v11 = vld [vmem:[%s606_s0 + $0x50] sm:$0xff]  ;;  %v20_v12 = vld [vmem:[%s606_s0 + $0x18] sm:$0xff]  ;;  %v21_v14 = vld [vmem:[%s606_s0 + $0x20] sm:$0xff] }
   0x5   :  { %367 = vmatprep.subr.bf16.mxu1 %v359_v3  ;;  %362 = vmatpush3.bf16.msra.mxu0 %v359_v3  ;;  %v28_v13 = vld [vmem:[%s606_s0 + $0x58] sm:$0xff]  ;;  %v29_v15 = vld [vmem:[%s606_s0 + $0x60] sm:$0xff]  ;;  %v22_v16 = vld [vmem:[%s606_s0 + $0x28] sm:$0xff] }
   0x6   :  { %369 = vmatpush3.bf16.msra.mxu1 %v359_v3  ;;  %364 = vmatprep.subr.bf16.mxu0 %v363_v7  ;;  %v30_v17 = vld [vmem:[%s606_s0 + $0x68] sm:$0xff]  ;;  %v23_v18 = vld [vmem:[%s606_s0 + $0x30] sm:$0xff]  ;;  %v24_v20 = vld [vmem:[%s606_s0 + $0x38] sm:$0xff] }
   0x7   :  { %368 = vmatprep.subr.bf16.mxu1 %v363_v7  ;;  %v31_v19 = vld [vmem:[%s606_s0 + $0x70] sm:$0xff]  ;;  %v32_v21 = vld [vmem:[%s606_s0 + $0x78] sm:$0xff]  ;;  %v475_v22 = vld [vmem:[%s607_s2] ss:$0 sm:$0xff] }
   0x8   :  { %v239_v24 = vld [vmem:[%s608_s3 + $0x8] sm:$0xff]  ;;  %v238_v30 = vld [vmem:[%s608_s3] sm:$0xff]  ;;  %v241_v40 = vld [vmem:[%s608_s3 + $0x18] sm:$0xff] }
   0x9   :  { %366 = vmatpush3.bf16.msra.mxu0 %v363_v7  ;;  %v247_v26 = vld [vmem:[%s608_s3 + $0x48] sm:$0xff]  ;;  %v246_v32 = vld [vmem:[%s608_s3 + $0x40] sm:$0xff]  ;;  %v249_v42 = vld [vmem:[%s608_s3 + $0x58] sm:$0xff] }
   0xa   :  { %370 = vmatpush3.bf16.msra.mxu1 %v363_v7  ;;  %v240_v46 = vld [vmem:[%s608_s3 + $0x10] sm:$0xff]  ;;  %v243_v56 = vld [vmem:[%s608_s3 + $0x28] sm:$0xff]  ;;  %v242_v62 = vld [vmem:[%s608_s3 + $0x20] sm:$0xff] }
   0xb   :  { %v248_v48 = vld [vmem:[%s608_s3 + $0x50] sm:$0xff]  ;;  %v251_v58 = vld [vmem:[%s608_s3 + $0x68] sm:$0xff]  ;;  %v250_v0 = vld [vmem:[%s608_s3 + $0x60] sm:$0xff] }
   0xc   :  { %336 = vmatmul.mubr.msk.f32.vlgmr.msra.gmra.mrb[0].mxu0 %vm44_vm0, %v18_v8  ;;  %v245_v8 = vld [vmem:[%s608_s3 + $0x38] sm:$0xff] }
   0xd   :  { %348 = vmatmul.mubr.msk.f32.vlgmr.msra.gmra.mrb[0].mxu1 %vm44_vm0, %v26_v9  ;;  %338 = vmatprep.mubr.msk.f32.mxu0 %vm44_vm0, %v19_v10  ;;  %v253_v10 = vld [vmem:[%s608_s3 + $0x78] sm:$0xff] }
   0xe   :  { %350 = vmatprep.mubr.msk.f32.mxu1 %vm44_vm0, %v27_v11 }
  0x10   :  { %339 = vmatmul.mubr.msk.f32.gmra.mrb[2].mxu0 %vm44_vm0, %v20_v12 }
  0x11   :  { %351 = vmatmul.mubr.msk.f32.gmra.mrb[2].mxu1 %vm44_vm0, %v28_v13  ;;  %341 = vmatprep.mubr.msk.f32.mxu0 %vm44_vm0, %v21_v14  ;;  %v244_v14 = vld [vmem:[%s608_s3 + $0x30] sm:$0xff] }
  0x12   :  { %353 = vmatprep.mubr.msk.f32.mxu1 %vm44_vm0, %v29_v15 }
  0x14   :  { %342 = vmatmul.mubr.msk.f32.gmra.mrb[4].mxu0 %vm44_vm0, %v22_v16  ;;  %v252_v16 = vld [vmem:[%s608_s3 + $0x70] sm:$0xff] }
  0x15   :  { %354 = vmatmul.mubr.msk.f32.gmra.mrb[4].mxu1 %vm44_vm0, %v30_v17  ;;  %344 = vmatprep.mubr.msk.f32.mxu0 %vm44_vm0, %v23_v18 }
  0x16   :  { %356 = vmatprep.mubr.msk.f32.mxu1 %vm44_vm0, %v31_v19 }
  0x18   :  { %345 = vmatmul.mubr.msk.f32.gmra.mrb[6].mxu0 %vm44_vm0, %v24_v20 }
  0x19   :  { %357 = vmatmul.mubr.msk.f32.gmra.mrb[6].mxu1 %vm44_vm0, %v32_v21 }
  0xdf   :  { %v337_v23 = vpop.f32.mrb[0].mxu0 }
  0xe0   :  { %v349_v25 = vpop.f32.mrb[0].mxu1  ;;  %v165_v27 = vadd.f32 %v337_v23, %v475_v22  ;;  %v159_v29 = vpop.f32.mrb[1].mxu0 }
  0xe1   :  { %v205_v28 = vadd.f32 %v349_v25, %v475_v22  ;;  %v199_v31 = vpop.f32.mrb[1].mxu1  ;;  %v160_v33 = vadd.f32 %v475_v22, %v159_v29 }
  0xe2   :  { %v200_v34 = vadd.f32 %v475_v22, %v199_v31  ;;  %v255_v35 = vadd.f32 %v239_v24, %v165_v27 }
  0xe3   :  { %v263_v36 = vadd.f32 %v247_v26, %v205_v28  ;;  %v254_v37 = vadd.f32 %v238_v30, %v160_v33  ;;  %v340_v39 = vpop.f32.mrb[2].mxu0 }
  0xe4   :  { %v262_v38 = vadd.f32 %v246_v32, %v200_v34  ;;  %v352_v41 = vpop.f32.mrb[2].mxu1  ;;  %271 = vst.msk [vmem:[%s609_s4 + $0x8] sm:$0xff] %vm44_vm0, %v255_v35  ;;  %v175_v43 = vadd.f32 %v340_v39, %v475_v22  ;;  %v169_v45 = vpop.f32.mrb[3].mxu0 }
  0xe5   :  { %279 = vst.msk [vmem:[%s609_s4 + $0x48] sm:$0xff] %vm44_vm0, %v263_v36  ;;  %v215_v44 = vadd.f32 %v352_v41, %v475_v22  ;;  %v209_v47 = vpop.f32.mrb[3].mxu1  ;;  %270 = vst.msk [vmem:[%s609_s4] sm:$0xff] %vm44_vm0, %v254_v37  ;;  %v170_v49 = vadd.f32 %v475_v22, %v169_v45 }
  0xe6   :  { %278 = vst.msk [vmem:[%s609_s4 + $0x40] sm:$0xff] %vm44_vm0, %v262_v38  ;;  %v210_v50 = vadd.f32 %v475_v22, %v209_v47  ;;  %v257_v51 = vadd.f32 %v241_v40, %v175_v43 }
  0xe7   :  { %v265_v52 = vadd.f32 %v249_v42, %v215_v44  ;;  %v256_v53 = vadd.f32 %v240_v46, %v170_v49  ;;  %v343_v55 = vpop.f32.mrb[4].mxu0 }
  0xe8   :  { %v264_v54 = vadd.f32 %v248_v48, %v210_v50  ;;  %v355_v57 = vpop.f32.mrb[4].mxu1  ;;  %273 = vst.msk [vmem:[%s609_s4 + $0x18] sm:$0xff] %vm44_vm0, %v257_v51  ;;  %v185_v59 = vadd.f32 %v343_v55, %v475_v22  ;;  %v179_v61 = vpop.f32.mrb[5].mxu0 }
  0xe9   :  { %281 = vst.msk [vmem:[%s609_s4 + $0x58] sm:$0xff] %vm44_vm0, %v265_v52  ;;  %v225_v60 = vadd.f32 %v355_v57, %v475_v22  ;;  %v219_v63 = vpop.f32.mrb[5].mxu1  ;;  %272 = vst.msk [vmem:[%s609_s4 + $0x10] sm:$0xff] %vm44_vm0, %v256_v53  ;;  %v180_v1 = vadd.f32 %v475_v22, %v179_v61 }
  0xea   :  { %280 = vst.msk [vmem:[%s609_s4 + $0x50] sm:$0xff] %vm44_vm0, %v264_v54  ;;  %v220_v2 = vadd.f32 %v475_v22, %v219_v63  ;;  %v259_v3 = vadd.f32 %v243_v56, %v185_v59 }
  0xeb   :  { %v267_v4 = vadd.f32 %v251_v58, %v225_v60  ;;  %v258_v5 = vadd.f32 %v242_v62, %v180_v1  ;;  %v346_v7 = vpop.f32.mrb[6].mxu0 }
  0xec   :  { %v266_v6 = vadd.f32 %v250_v0, %v220_v2  ;;  %v358_v9 = vpop.f32.mrb[6].mxu1  ;;  %275 = vst.msk [vmem:[%s609_s4 + $0x28] sm:$0xff] %vm44_vm0, %v259_v3  ;;  %v195_v11 = vadd.f32 %v346_v7, %v475_v22  ;;  %v189_v13 = vpop.f32.mrb[7].mxu0 }
  0xed   :  { %283 = vst.msk [vmem:[%s609_s4 + $0x68] sm:$0xff] %vm44_vm0, %v267_v4  ;;  %v235_v12 = vadd.f32 %v358_v9, %v475_v22  ;;  %v229_v15 = vpop.f32.mrb[7].mxu1  ;;  %274 = vst.msk [vmem:[%s609_s4 + $0x20] sm:$0xff] %vm44_vm0, %v258_v5  ;;  %v190_v17 = vadd.f32 %v475_v22, %v189_v13 }
  0xee   :  { %282 = vst.msk [vmem:[%s609_s4 + $0x60] sm:$0xff] %vm44_vm0, %v266_v6  ;;  %v230_v18 = vadd.f32 %v475_v22, %v229_v15  ;;  %v261_v19 = vadd.f32 %v245_v8, %v195_v11 }
  0xef   :  { %v269_v20 = vadd.f32 %v253_v10, %v235_v12  ;;  %v260_v21 = vadd.f32 %v244_v14, %v190_v17 }
  0xf0   :  { %v268_v23 = vadd.f32 %v252_v16, %v230_v18  ;;  %277 = vst.msk [vmem:[%s609_s4 + $0x38] sm:$0xff] %vm44_vm0, %v261_v19 }
  0xf1   :  { %285 = vst.msk [vmem:[%s609_s4 + $0x78] sm:$0xff] %vm44_vm0, %v269_v20  ;;  %276 = vst.msk [vmem:[%s609_s4 + $0x30] sm:$0xff] %vm44_vm0, %v260_v21 }
  0xf2   :  { %284 = vst.msk [vmem:[%s609_s4 + $0x70] sm:$0xff] %vm44_vm0, %v268_v23 }

// kernel: block_forward.9
= control target key start
LH: loop header
LB: loop body
LE: loop exit
PB: predicated region body
PF: predicated region fallthrough
CT: control target
= control target key end

     0   :  { %vm36_vm0 = vcmask 261120   ;;  %s982_s0 = inlined_call_operand.vmem [shape: f32[128,32], index: 0, kind: input, shape index: {}]   ;;  %s983_s3 = inlined_call_operand.vmem [shape: f32[32,128], index: 3, kind: input, shape index: {}]   ;;  %s984_s1 = inlined_call_operand.vmem [shape: f32[1,32], index: 1, kind: input, shape index: {}]   ;;  %s985_s2 = inlined_call_operand.vmem [shape: f32[1,32], index: 2, kind: input, shape index: {}]   ;;  %s986_s4 = inlined_call_operand.vmem [shape: f32[1,128], index: 4, kind: input, shape index: {}]   ;;  %s987_s5 = inlined_call_operand.vmem [shape: f32[128,128], index: 5, kind: output, shape index: {}]  }
   0x1   :  { %v20_v0 = vld [vmem:[%s982_s0] sm:$0xff]  ;;  %v21_v1 = vld [vmem:[%s982_s0 + $0x8] sm:$0xff]  ;;  %v22_v8 = vld [vmem:[%s982_s0 + $0x10] sm:$0xff] }
   0x2   :  { %v28_v2 = vld [vmem:[%s982_s0 + $0x40] sm:$0xff]  ;;  %v37_v3 = vsel %vm36_vm0, %v20_v0, 0.0  ;;  %v40_v4 = vsel %vm36_vm0, %v21_v1, 0.0  ;;  %v29_v5 = vld [vmem:[%s982_s0 + $0x48] sm:$0xff]  ;;  %v30_v9 = vld [vmem:[%s982_s0 + $0x50] sm:$0xff]  ;;  %v43_v10 = vsel %vm36_vm0, %v22_v8, 0.0 }
   0x3   :  { %38 = vadd.xlane.f32.xlu0 %v37_v3  ;;  %41 = vadd.xlane.f32.xlu1 %v40_v4  ;;  %v61_v6 = vsel %vm36_vm0, %v28_v2, 0.0  ;;  %v64_v7 = vsel %vm36_vm0, %v29_v5, 0.0  ;;  %v67_v11 = vsel %vm36_vm0, %v30_v9, 0.0  ;;  %v688_v12 = vld [vmem:[%s982_s0 + $0x18] sm:$0xff]  ;;  %v702_v16 = vld [vmem:[%s982_s0 + $0x20] sm:$0xff]  ;;  %v716_v20 = vld [vmem:[%s982_s0 + $0x28] sm:$0xff] }
   0x4   :  { %v693_v13 = vld [vmem:[%s982_s0 + $0x58] sm:$0xff]  ;;  %v46_v14 = vsel %vm36_vm0, %v688_v12, 0.0  ;;  %v707_v17 = vld [vmem:[%s982_s0 + $0x60] sm:$0xff]  ;;  %v49_v18 = vsel %vm36_vm0, %v702_v16, 0.0  ;;  %v721_v21 = vld [vmem:[%s982_s0 + $0x68] sm:$0xff]  ;;  %v52_v22 = vsel %vm36_vm0, %v716_v20, 0.0 }
   0x5   :  { %v70_v15 = vsel %vm36_vm0, %v693_v13, 0.0  ;;  %v73_v19 = vsel %vm36_vm0, %v707_v17, 0.0  ;;  %v76_v23 = vsel %vm36_vm0, %v721_v21, 0.0  ;;  %v730_v24 = vld [vmem:[%s982_s0 + $0x30] sm:$0xff]  ;;  %v744_v28 = vld [vmem:[%s982_s0 + $0x38] sm:$0xff] }
   0x6   :  { %v735_v25 = vld [vmem:[%s982_s0 + $0x70] sm:$0xff]  ;;  %v55_v26 = vsel %vm36_vm0, %v730_v24, 0.0  ;;  %v749_v29 = vld [vmem:[%s982_s0 + $0x78] sm:$0xff]  ;;  %v58_v30 = vsel %vm36_vm0, %v744_v28, 0.0 }
   0x7   :  { %62 = vadd.xlane.f32.xlu0 %v61_v6  ;;  %65 = vadd.xlane.f32.xlu1 %v64_v7  ;;  %v79_v27 = vsel %vm36_vm0, %v735_v25, 0.0  ;;  %v82_v31 = vsel %vm36_vm0, %v749_v29, 0.0 }
   0xb   :  { %44 = vadd.xlane.f32.xlu0 %v43_v10  ;;  %68 = vadd.xlane.f32.xlu1 %v67_v11 }
   0xf   :  { %47 = vadd.xlane.f32.xlu0 %v46_v14  ;;  %71 = vadd.xlane.f32.xlu1 %v70_v15 }
  0x13   :  { %50 = vadd.xlane.f32.xlu0 %v49_v18  ;;  %74 = vadd.xlane.f32.xlu1 %v73_v19 }
  0x17   :  { %53 = vadd.xlane.f32.xlu0 %v52_v22  ;;  %77 = vadd.xlane.f32.xlu1 %v76_v23 }
  0x1b   :  { %56 = vadd.xlane.f32.xlu0 %v55_v26  ;;  %80 = vadd.xlane.f32.xlu1 %v79_v27 }
  0x1f   :  { %59 = vadd.xlane.f32.xlu0 %v58_v30  ;;  %83 = vadd.xlane.f32.xlu1 %v82_v31 }
  0x90   :  { %v39_v32 = vpop.xlane.xlu0 %38  ;;  %v42_v33 = vpop.xlane.xlu1 %41 }
  0x91   :  { %v86_v34 = vmul.f32 0.03125, %v39_v32  ;;  %v87_v35 = vmul.f32 0.03125, %v42_v33 }
  0x93   :  { %v755_v36 = vsub.f32 %v20_v0, %v86_v34  ;;  %v757_v37 = vsub.f32 %v21_v1, %v87_v35 }
  0x94   :  { %v63_v38 = vpop.xlane.xlu0 %62  ;;  %v66_v39 = vpop.xlane.xlu1 %65 }
  0x95   :  { %v94_v40 = vmul.f32 0.03125, %v63_v38  ;;  %v95_v41 = vmul.f32 0.03125, %v66_v39  ;;  %v118_v42 = vmul.f32 %v755_v36, %v755_v36  ;;  %v119_v43 = vmul.f32 %v757_v37, %v757_v37 }
  0x97   :  { %v763_v44 = vsub.f32 %v28_v2, %v94_v40  ;;  %v765_v45 = vsub.f32 %v29_v5, %v95_v41  ;;  %v134_v46 = vsel %vm36_vm0, %v118_v42, 0.0  ;;  %v137_v49 = vsel %vm36_vm0, %v119_v43, 0.0 }
  0x98   :  { %135 = vadd.xlane.f32.xlu0 %v134_v46  ;;  %v45_v47 = vpop.xlane.xlu0 %44  ;;  %v69_v48 = vpop.xlane.xlu1 %68 }
  0x99   :  { %v88_v50 = vmul.f32 0.03125, %v45_v47  ;;  %v96_v51 = vmul.f32 0.03125, %v69_v48  ;;  %v126_v52 = vmul.f32 %v763_v44, %v763_v44  ;;  %v127_v53 = vmul.f32 %v765_v45, %v765_v45 }
  0x9b   :  { %v773_v54 = vsub.f32 %v22_v8, %v88_v50  ;;  %v775_v55 = vsub.f32 %v30_v9, %v96_v51  ;;  %v158_v56 = vsel %vm36_vm0, %v126_v52, 0.0  ;;  %v161_v59 = vsel %vm36_vm0, %v127_v53, 0.0  ;;  %v293_v53 = vld [vmem:[%s983_s3 + $0x8] sm:$0xff] }
  0x9c   :  { %138 = vadd.xlane.f32.xlu0 %v137_v49  ;;  %159 = vadd.xlane.f32.xlu1 %v158_v56  ;;  %v48_v57 = vpop.xlane.xlu0 %47  ;;  %v72_v58 = vpop.xlane.xlu1 %71 }
  0x9d   :  { %v89_v60 = vmul.f32 0.03125, %v48_v57  ;;  %v97_v61 = vmul.f32 0.03125, %v72_v58  ;;  %v120_v62 = vmul.f32 %v773_v54, %v773_v54  ;;  %v128_v63 = vmul.f32 %v775_v55, %v775_v55  ;;  %v294_v57 = vld [vmem:[%s983_s3 + $0x10] sm:$0xff]  ;;  %v295_v58 = vld [vmem:[%s983_s3 + $0x18] sm:$0xff] }
  0x9f   :  { %v784_v0 = vsub.f32 %v688_v12, %v89_v60  ;;  %v787_v1 = vsub.f32 %v693_v13, %v97_v61  ;;  %v140_v2 = vsel %vm36_vm0, %v120_v62, 0.0  ;;  %v164_v5 = vsel %vm36_vm0, %v128_v63, 0.0 }
  0xa0   :  { %162 = vadd.xlane.f32.xlu1 %v161_v59  ;;  %141 = vadd.xlane.f32.xlu0 %v140_v2  ;;  %v51_v3 = vpop.xlane.xlu0 %50  ;;  %v75_v4 = vpop.xlane.xlu1 %74  ;;  %v591_v59 = vpack.c.bf16 %v295_v58, %v294_v57 }
  0xa1   :  { %v90_v6 = vmul.f32 0.03125, %v51_v3  ;;  %v98_v7 = vmul.f32 0.03125, %v75_v4  ;;  %v121_v8 = vmul.f32 %v784_v0, %v784_v0  ;;  %v129_v9 = vmul.f32 %v787_v1, %v787_v1 }
  0xa3   :  { %v796_v10 = vsub.f32 %v702_v16, %v90_v6  ;;  %v799_v11 = vsub.f32 %v707_v17, %v98_v7  ;;  %v143_v12 = vsel %vm36_vm0, %v121_v8, 0.0  ;;  %v167_v15 = vsel %vm36_vm0, %v129_v9, 0.0 }
  0xa4   :  { %165 = vadd.xlane.f32.xlu1 %v164_v5  ;;  %144 = vadd.xlane.f32.xlu0 %v143_v12  ;;  %v54_v13 = vpop.xlane.xlu0 %53  ;;  %v78_v14 = vpop.xlane.xlu1 %77 }
  0xa5   :  { %v91_v18 = vmul.f32 0.03125, %v54_v13  ;;  %v99_v19 = vmul.f32 0.03125, %v78_v14  ;;  %v122_v22 = vmul.f32 %v796_v10, %v796_v10  ;;  %v130_v16 = vmul.f32 %v799_v11, %v799_v11 }
  0xa7   :  { %v808_v23 = vsub.f32 %v716_v20, %v91_v18  ;;  %v811_v17 = vsub.f32 %v721_v21, %v99_v19  ;;  %v146_v26 = vsel %vm36_vm0, %v122_v22, 0.0  ;;  %v170_v31 = vsel %vm36_vm0, %v130_v16, 0.0 }
  0xa8   :  { %168 = vadd.xlane.f32.xlu1 %v167_v15  ;;  %147 = vadd.xlane.f32.xlu0 %v146_v26  ;;  %v57_v27 = vpop.xlane.xlu0 %56  ;;  %v81_v30 = vpop.xlane.xlu1 %80 }
  0xa9   :  { %v92_v32 = vmul.f32 0.03125, %v57_v27  ;;  %v100_v33 = vmul.f32 0.03125, %v81_v30  ;;  %v123_v34 = vmul.f32 %v808_v23, %v808_v23  ;;  %v131_v20 = vmul.f32 %v811_v17, %v811_v17  ;;  %v860_v30 = vld [vmem:[%s984_s1] ss:$0 sm:$0xff] }
  0xab   :  { %v820_v35 = vsub.f32 %v730_v24, %v92_v32  ;;  %v823_v21 = vsub.f32 %v735_v25, %v100_v33  ;;  %v149_v38 = vsel %vm36_vm0, %v123_v34, 0.0  ;;  %v173_v41 = vsel %vm36_vm0, %v131_v20, 0.0 }
  0xac   :  { %171 = vadd.xlane.f32.xlu1 %v170_v31  ;;  %150 = vadd.xlane.f32.xlu0 %v149_v38  ;;  %v60_v39 = vpop.xlane.xlu0 %59  ;;  %v84_v40 = vpop.xlane.xlu1 %83  ;;  %v866_v38 = vld [vmem:[%s985_s2] ss:$0 sm:$0xff] }
  0xad   :  { %v93_v42 = vmul.f32 0.03125, %v60_v39  ;;  %v101_v43 = vmul.f32 0.03125, %v84_v40  ;;  %v124_v46 = vmul.f32 %v820_v35, %v820_v35  ;;  %v132_v24 = vmul.f32 %v823_v21, %v823_v21 }
  0xaf   :  { %v832_v47 = vsub.f32 %v744_v28, %v93_v42  ;;  %v835_v25 = vsub.f32 %v749_v29, %v101_v43  ;;  %v152_v48 = vsel %vm36_vm0, %v124_v46, 0.0  ;;  %v176_v49 = vsel %vm36_vm0, %v132_v24, 0.0  ;;  %v292_v29 = vld [vmem:[%s983_s3] sm:$0xff] }
  0xb0   :  { %174 = vadd.xlane.f32.xlu1 %v173_v41  ;;  %153 = vadd.xlane.f32.xlu0 %v152_v48  ;;  %v587_v56 = vpack.c.bf16 %v293_v53, %v292_v29 }
  0xb1   :  { %v125_v50 = vmul.f32 %v832_v47, %v832_v47  ;;  %v133_v51 = vmul.f32 %v835_v25, %v835_v25 }
  0xb2   :  { %588 = vmatprep.subr.bf16.mxu0 %v587_v56  ;;  %595 = vmatprep.subr.bf16.mxu1 %v587_v56 }
  0xb3   :  { %v155_v52 = vsel %vm36_vm0, %v125_v50, 0.0  ;;  %v179_v28 = vsel %vm36_vm0, %v133_v51, 0.0  ;;  %590 = vmatpush3.bf16.msra.mxu0 %v587_v56  ;;  %597 = vmatpush3.bf16.msra.mxu1 %v587_v56 }
  0xb4   :  { %177 = vadd.xlane.f32.xlu1 %v176_v49  ;;  %156 = vadd.xlane.f32.xlu0 %v155_v52 }
  0xb5   :  { %592 = vmatprep.subr.bf16.mxu0 %v591_v59  ;;  %596 = vmatprep.subr.bf16.mxu1 %v591_v59 }
  0xb7   :  { %594 = vmatpush3.bf16.msra.mxu0 %v591_v59  ;;  %598 = vmatpush3.bf16.msra.mxu1 %v591_v59 }
  0xb8   :  { %180 = vadd.xlane.f32.xlu1 %v179_v28 }
 0x125   :  { %v136_v60 = vpop.xlane.xlu0 %135 }
 0x126   :  { %v182_v61 = vmul.f32 0.03125, %v136_v60 }
 0x128   :  { %v198_v62 = vadd.f32 1e-05, %v182_v61 }
 0x129   :  { %v160_v63 = vpop.xlane.xlu1 %159  ;;  %v139_v2 = vpop.xlane.xlu0 %138 }
 0x12a   :  { %599 = vrsqrt.f32 %v198_v62  ;;  %v190_v3 = vmul.f32 0.03125, %v160_v63  ;;  %v183_v4 = vmul.f32 0.03125, %v139_v2 }
 0x12c   :  { %v206_v5 = vadd.f32 1e-05, %v190_v3  ;;  %v199_v6 = vadd.f32 1e-05, %v183_v4 }
 0x12d   :  { %v163_v7 = vpop.xlane.xlu1 %162  ;;  %v142_v8 = vpop.xlane.xlu0 %141 }
 0x12e   :  { %601 = vrsqrt.f32 %v206_v5  ;;  %v191_v9 = vmul.f32 0.03125, %v163_v7  ;;  %v184_v12 = vmul.f32 0.03125, %v142_v8 }
 0x12f   :  { %603 = vrsqrt.f32 %v199_v6 }
 0x130   :  { %v207_v13 = vadd.f32 1e-05, %v191_v9  ;;  %v200_v14 = vadd.f32 1e-05, %v184_v12 }
 0x131   :  { %v166_v15 = vpop.xlane.xlu1 %165  ;;  %v145_v18 = vpop.xlane.xlu0 %144 }
 0x132   :  { %605 = vrsqrt.f32 %v207_v13  ;;  %v192_v19 = vmul.f32 0.03125, %v166_v15  ;;  %v185_v22 = vmul.f32 0.03125, %v145_v18 }
 0x133   :  { %607 = vrsqrt.f32 %v200_v14 }
 0x134   :  { %v600_v16 = vpop.eup %599  ;;  %v208_v26 = vadd.f32 1e-05, %v192_v19  ;;  %v201_v27 = vadd.f32 1e-05, %v185_v22 }
 0x135   :  { %v169_v31 = vpop.xlane.xlu1 %168  ;;  %v148_v32 = vpop.xlane.xlu0 %147  ;;  %v230_v33 = vmul.f32 %v600_v16, %v755_v36 }
 0x136   :  { %609 = vrsqrt.f32 %v208_v26  ;;  %v193_v34 = vmul.f32 0.03125, %v169_v31  ;;  %v186_v20 = vmul.f32 0.03125, %v148_v32 }
 0x137   :  { %611 = vrsqrt.f32 %v201_v27  ;;  %v253_v39 = vmul.f32 %v860_v30, %v230_v33 }
 0x138   :  { %v602_v40 = vpop.eup %601  ;;  %v209_v41 = vadd.f32 1e-05, %v193_v34  ;;  %v202_v42 = vadd.f32 1e-05, %v186_v20 }
 0x139   :  { %v604_v43 = vpop.eup %603  ;;  %v172_v46 = vpop.xlane.xlu1 %171  ;;  %v276_v48 = vadd.f32 %v866_v38, %v253_v39  ;;  %v238_v36 = vmul.f32 %v602_v40, %v763_v44 }
 0x13a   :  { %v151_v24 = vpop.xlane.xlu0 %150  ;;  %613 = vrsqrt.f32 %v209_v41  ;;  %v194_v49 = vmul.f32 0.03125, %v172_v46  ;;  %v231_v51 = vmul.f32 %v604_v43, %v757_v37 }
 0x13b   :  { %v187_v50 = vmul.f32 0.03125, %v151_v24  ;;  %615 = vrsqrt.f32 %v202_v42  ;;  %563 = vmatprep.mubr.msk.f32.mxu0 %vm36_vm0, %v276_v48  ;;  %v261_v52 = vmul.f32 %v860_v30, %v238_v36 }
 0x13c   :  { %v606_v28 = vpop.eup %605  ;;  %v210_v29 = vadd.f32 1e-05, %v194_v49  ;;  %v254_v56 = vmul.f32 %v860_v30, %v231_v51 }
 0x13d   :  { %v203_v53 = vadd.f32 1e-05, %v187_v50  ;;  %v608_v57 = vpop.eup %607  ;;  %v175_v58 = vpop.xlane.xlu1 %174  ;;  %v284_v44 = vadd.f32 %v866_v38, %v261_v52  ;;  %v239_v60 = vmul.f32 %v606_v28, %v765_v45 }
 0x13e   :  { %v154_v59 = vpop.xlane.xlu0 %153  ;;  %617 = vrsqrt.f32 %v210_v29  ;;  %v195_v61 = vmul.f32 0.03125, %v175_v58  ;;  %v277_v62 = vadd.f32 %v866_v38, %v254_v56  ;;  %v232_v63 = vmul.f32 %v608_v57, %v773_v54 }
 0x13f   :  { %v188_v37 = vmul.f32 0.03125, %v154_v59  ;;  %619 = vrsqrt.f32 %v203_v53  ;;  %575 = vmatprep.mubr.msk.f32.mxu1 %vm36_vm0, %v284_v44  ;;  %v262_v2 = vmul.f32 %v860_v30, %v239_v60 }
 0x140   :  { %v610_v3 = vpop.eup %609  ;;  %v211_v4 = vadd.f32 1e-05, %v195_v61  ;;  %564 = vmatmul.mubr.msk.f32.vlgmr.msra.gmra.mrb[0].mxu0 %vm36_vm0, %v277_v62  ;;  %v255_v8 = vmul.f32 %v860_v30, %v232_v63  ;;  %v518_v62 = vld [vmem:[%s986_s4] ss:$0 sm:$0xff] }
 0x141   :  { %v204_v5 = vadd.f32 1e-05, %v188_v37  ;;  %v612_v6 = vpop.eup %611  ;;  %v178_v7 = vpop.xlane.xlu1 %177  ;;  %v285_v9 = vadd.f32 %v866_v38, %v262_v2  ;;  %v240_v12 = vmul.f32 %v610_v3, %v775_v55 }
 0x142   :  { %v157_v45 = vpop.xlane.xlu0 %156  ;;  %621 = vrsqrt.f32 %v211_v4  ;;  %v196_v13 = vmul.f32 0.03125, %v178_v7  ;;  %v233_v54 = vmul.f32 %v612_v6, %v784_v0  ;;  %v278_v15 = vadd.f32 %v866_v38, %v255_v8 }
 0x143   :  { %v189_v14 = vmul.f32 0.03125, %v157_v45  ;;  %623 = vrsqrt.f32 %v204_v5  ;;  %576 = vmatmul.mubr.msk.f32.vlgmr.msra.gmra.mrb[0].mxu1 %vm36_vm0, %v285_v9  ;;  %v263_v18 = vmul.f32 %v860_v30, %v240_v12 }
 0x144   :  { %v614_v19 = vpop.eup %613  ;;  %v212_v22 = vadd.f32 1e-05, %v196_v13  ;;  %v256_v26 = vmul.f32 %v860_v30, %v233_v54  ;;  %566 = vmatprep.mubr.msk.f32.mxu0 %vm36_vm0, %v278_v15 }
 0x145   :  { %v205_v16 = vadd.f32 1e-05, %v189_v14  ;;  %v616_v27 = vpop.eup %615  ;;  %v181_v55 = vpop.xlane.xlu1 %180  ;;  %v286_v31 = vadd.f32 %v866_v38, %v263_v18  ;;  %v241_v0 = vmul.f32 %v614_v19, %v787_v1 }
 0x146   :  { %625 = vrsqrt.f32 %v212_v22  ;;  %v197_v32 = vmul.f32 0.03125, %v181_v55  ;;  %v279_v33 = vadd.f32 %v866_v38, %v256_v26  ;;  %v234_v34 = vmul.f32 %v616_v27, %v796_v10 }
 0x147   :  { %627 = vrsqrt.f32 %v205_v16  ;;  %578 = vmatprep.mubr.msk.f32.mxu1 %vm36_vm0, %v286_v31  ;;  %v264_v20 = vmul.f32 %v860_v30, %v241_v0 }
 0x148   :  { %v618_v39 = vpop.eup %617  ;;  %v213_v40 = vadd.f32 1e-05, %v197_v32  ;;  %567 = vmatmul.mubr.msk.f32.gmra.mrb[2].mxu0 %vm36_vm0, %v279_v33  ;;  %v257_v41 = vmul.f32 %v860_v30, %v234_v34 }
 0x149   :  { %v620_v42 = vpop.eup %619  ;;  %v287_v1 = vadd.f32 %v866_v38, %v264_v20  ;;  %v242_v43 = vmul.f32 %v618_v39, %v799_v11 }
 0x14a   :  { %629 = vrsqrt.f32 %v213_v40  ;;  %v280_v46 = vadd.f32 %v866_v38, %v257_v41  ;;  %v235_v10 = vmul.f32 %v620_v42, %v808_v23 }
 0x14b   :  { %579 = vmatmul.mubr.msk.f32.gmra.mrb[2].mxu1 %vm36_vm0, %v287_v1  ;;  %v265_v24 = vmul.f32 %v860_v30, %v242_v43 }
 0x14c   :  { %v622_v48 = vpop.eup %621  ;;  %569 = vmatprep.mubr.msk.f32.mxu0 %vm36_vm0, %v280_v46  ;;  %v258_v36 = vmul.f32 %v860_v30, %v235_v10 }
 0x14d   :  { %v624_v49 = vpop.eup %623  ;;  %v288_v50 = vadd.f32 %v866_v38, %v265_v24  ;;  %v243_v51 = vmul.f32 %v622_v48, %v811_v17 }
 0x14e   :  { %v281_v11 = vadd.f32 %v866_v38, %v258_v36  ;;  %v236_v52 = vmul.f32 %v624_v49, %v820_v35 }
 0x14f   :  { %581 = vmatprep.mubr.msk.f32.mxu1 %vm36_vm0, %v288_v50  ;;  %v266_v23 = vmul.f32 %v860_v30, %v243_v51 }
 0x150   :  { %v626_v28 = vpop.eup %625  ;;  %570 = vmatmul.mubr.msk.f32.gmra.mrb[4].mxu0 %vm36_vm0, %v281_v11  ;;  %v259_v29 = vmul.f32 %v860_v30, %v236_v52 }
 0x151   :  { %v628_v53 = vpop.eup %627  ;;  %v289_v56 = vadd.f32 %v866_v38, %v266_v23  ;;  %v244_v57 = vmul.f32 %v626_v28, %v823_v21 }
 0x152   :  { %v282_v17 = vadd.f32 %v866_v38, %v259_v29  ;;  %v237_v58 = vmul.f32 %v628_v53, %v832_v47 }
 0x153   :  { %582 = vmatmul.mubr.msk.f32.gmra.mrb[4].mxu1 %vm36_vm0, %v289_v56  ;;  %v267_v35 = vmul.f32 %v860_v30, %v244_v57 }
 0x154   :  { %v630_v59 = vpop.eup %629  ;;  %572 = vmatprep.mubr.msk.f32.mxu0 %vm36_vm0, %v282_v17  ;;  %v260_v44 = vmul.f32 %v860_v30, %v237_v58 }
 0x155   :  { %v290_v60 = vadd.f32 %v866_v38, %v267_v35  ;;  %v245_v61 = vmul.f32 %v630_v59, %v835_v25 }
 0x156   :  { %v283_v37 = vadd.f32 %v866_v38, %v260_v44 }
 0x157   :  { %584 = vmatprep.mubr.msk.f32.mxu1 %vm36_vm0, %v290_v60  ;;  %v268_v21 = vmul.f32 %v860_v30, %v245_v61 }
 0x158   :  { %573 = vmatmul.mubr.msk.f32.gmra.mrb[6].mxu0 %vm36_vm0, %v283_v37 }
 0x159   :  { %v291_v47 = vadd.f32 %v866_v38, %v268_v21 }
 0x15b   :  { %585 = vmatmul.mubr.msk.f32.gmra.mrb[6].mxu1 %vm36_vm0, %v291_v47 }
 0x213   :  { %v565_v63 = vpop.f32.mrb[0].mxu0 }
 0x214   :  { %v423_v2 = vadd.f32 %v565_v63, %v518_v62  ;;  %v417_v3 = vpop.f32.mrb[1].mxu0 }
 0x215   :  { %v418_v25 = vadd.f32 %v518_v62, %v417_v3 }
 0x216   :  { %497 = vst [vmem:[%s987_s5 + $0x8] sm:$0xff] %v423_v2  ;;  %v577_v4 = vpop.f32.mrb[0].mxu1 }
 0x217   :  { %496 = vst [vmem:[%s987_s5] sm:$0xff] %v418_v25  ;;  %v463_v30 = vadd.f32 %v577_v4, %v518_v62  ;;  %v457_v38 = vpop.f32.mrb[1].mxu1 }
 0x218   :  { %v458_v5 = vadd.f32 %v518_v62, %v457_v38 }
 0x219   :  { %505 = vst [vmem:[%s987_s5 + $0x48] sm:$0xff] %v463_v30 }
 0x21a   :  { %504 = vst [vmem:[%s987_s5 + $0x40] sm:$0xff] %v458_v5 }
 0x21b   :  { %v568_v6 = vpop.f32.mrb[2].mxu0 }
 0x21c   :  { %v433_v7 = vadd.f32 %v568_v6, %v518_v62  ;;  %v427_v45 = vpop.f32.mrb[3].mxu0 }
 0x21d   :  { %v428_v8 = vadd.f32 %v518_v62, %v427_v45 }
 0x21e   :  { %499 = vst [vmem:[%s987_s5 + $0x18] sm:$0xff] %v433_v7  ;;  %v580_v9 = vpop.f32.mrb[2].mxu1 }
 0x21f   :  { %498 = vst [vmem:[%s987_s5 + $0x10] sm:$0xff] %v428_v8  ;;  %v473_v12 = vadd.f32 %v580_v9, %v518_v62  ;;  %v467_v13 = vpop.f32.mrb[3].mxu1 }
 0x220   :  { %v468_v14 = vadd.f32 %v518_v62, %v467_v13 }
 0x221   :  { %507 = vst [vmem:[%s987_s5 + $0x58] sm:$0xff] %v473_v12 }
 0x222   :  { %506 = vst [vmem:[%s987_s5 + $0x50] sm:$0xff] %v468_v14 }
 0x223   :  { %v571_v54 = vpop.f32.mrb[4].mxu0 }
 0x224   :  { %v443_v15 = vadd.f32 %v571_v54, %v518_v62  ;;  %v437_v18 = vpop.f32.mrb[5].mxu0 }
 0x225   :  { %v438_v19 = vadd.f32 %v518_v62, %v437_v18 }
 0x226   :  { %501 = vst [vmem:[%s987_s5 + $0x28] sm:$0xff] %v443_v15  ;;  %v583_v22 = vpop.f32.mrb[4].mxu1 }
 0x227   :  { %500 = vst [vmem:[%s987_s5 + $0x20] sm:$0xff] %v438_v19  ;;  %v483_v16 = vadd.f32 %v583_v22, %v518_v62  ;;  %v477_v26 = vpop.f32.mrb[5].mxu1 }
 0x228   :  { %v478_v27 = vadd.f32 %v518_v62, %v477_v26 }
 0x229   :  { %509 = vst [vmem:[%s987_s5 + $0x68] sm:$0xff] %v483_v16 }
 0x22a   :  { %508 = vst [vmem:[%s987_s5 + $0x60] sm:$0xff] %v478_v27 }
 0x22b   :  { %v574_v55 = vpop.f32.mrb[6].mxu0 }
 0x22c   :  { %v453_v31 = vadd.f32 %v574_v55, %v518_v62  ;;  %v447_v0 = vpop.f32.mrb[7].mxu0 }
 0x22d   :  { %v448_v32 = vadd.f32 %v518_v62, %v447_v0 }
 0x22e   :  { %503 = vst [vmem:[%s987_s5 + $0x38] sm:$0xff] %v453_v31  ;;  %v586_v33 = vpop.f32.mrb[6].mxu1 }
 0x22f   :  { %502 = vst [vmem:[%s987_s5 + $0x30] sm:$0xff] %v448_v32  ;;  %v493_v34 = vadd.f32 %v586_v33, %v518_v62  ;;  %v487_v20 = vpop.f32.mrb[7].mxu1 }
 0x230   :  { %v488_v39 = vadd.f32 %v518_v62, %v487_v20 }
 0x231   :  { %511 = vst [vmem:[%s987_s5 + $0x78] sm:$0xff] %v493_v34 }
 0x232   :  { %510 = vst [vmem:[%s987_s5 + $0x70] sm:$0xff] %v488_v39 }

// kernel: block_forward.11
= control target key start
LH: loop header
LB: loop body
LE: loop exit
PB: predicated region body
PF: predicated region fallthrough
CT: control target
= control target key end

     0   :  { %vm233_vm0 = vcmask 261120   ;;  %s645_s1 = inlined_call_operand.vmem [shape: f32[128,32], index: 1, kind: input, shape index: {}]   ;;  %s646_s0 = inlined_call_operand.vmem [shape: f32[128,128], index: 0, kind: input, shape index: {}]   ;;  %s647_s2 = inlined_call_operand.vmem [shape: f32[1,32], index: 2, kind: input, shape index: {}]   ;;  %s648_s3 = inlined_call_operand.vmem [shape: f32[128,32], index: 3, kind: input, shape index: {}]   ;;  %s649_s4 = inlined_call_operand.vmem [shape: f32[128,32], index: 4, kind: output, shape index: {}]  }
   0x1   :  { %v33_v0 = vld [vmem:[%s645_s1] sm:$0xff]  ;;  %v34_v1 = vld [vmem:[%s645_s1 + $0x8] sm:$0xff]  ;;  %v35_v2 = vld [vmem:[%s645_s1 + $0x10] sm:$0xff] }
   0x2   :  { %v343_v3 = vpack.c.bf16 %v34_v1, %v33_v0  ;;  %v36_v4 = vld [vmem:[%s645_s1 + $0x18] sm:$0xff]  ;;  %v37_v6 = vld [vmem:[%s645_s1 + $0x20] sm:$0xff]  ;;  %v38_v7 = vld [vmem:[%s645_s1 + $0x28] sm:$0xff] }
   0x3   :  { %v347_v5 = vpack.c.bf16 %v36_v4, %v35_v2  ;;  %v351_v8 = vpack.c.bf16 %v38_v7, %v37_v6  ;;  %v17_v9 = vld [vmem:[%s646_s0] sm:$0xff]  ;;  %v39_v11 = vld [vmem:[%s645_s1 + $0x30] sm:$0xff]  ;;  %v40_v12 = vld [vmem:[%s645_s1 + $0x38] sm:$0xff] }
   0x4   :  { %344 = vmatprep.subr.bf16.mxu0 %v343_v3  ;;  %375 = vmatprep.subr.bf16.mxu1 %v343_v3  ;;  %v25_v10 = vld [vmem:[%s646_s0 + $0x40] sm:$0xff]  ;;  %v355_v13 = vpack.c.bf16 %v40_v12, %v39_v11  ;;  %v42_v15 = vld [vmem:[%s645_s1 + $0x48] sm:$0xff]  ;;  %v43_v17 = vld [vmem:[%s645_s1 + $0x50] sm:$0xff] }
   0x5   :  { %346 = vmatpush3.bf16.msra.mxu0 %v343_v3  ;;  %383 = vmatpush3.bf16.msra.mxu1 %v343_v3  ;;  %v41_v14 = vld [vmem:[%s645_s1 + $0x40] sm:$0xff]  ;;  %v44_v18 = vld [vmem:[%s645_s1 + $0x58] sm:$0xff]  ;;  %v46_v21 = vld [vmem:[%s645_s1 + $0x68] sm:$0xff] }
   0x6   :  { %348 = vmatprep.subr.bf16.mxu0 %v347_v5  ;;  %376 = vmatprep.subr.bf16.mxu1 %v347_v5  ;;  %v359_v16 = vpack.c.bf16 %v42_v15, %v41_v14  ;;  %v363_v19 = vpack.c.bf16 %v44_v18, %v43_v17  ;;  %v45_v20 = vld [vmem:[%s645_s1 + $0x60] sm:$0xff]  ;;  %v47_v23 = vld [vmem:[%s645_s1 + $0x70] sm:$0xff]  ;;  %v48_v24 = vld [vmem:[%s645_s1 + $0x78] sm:$0xff] }
   0x7   :  { %319 = vmatprep.mubr.f32.mxu0 %v17_v9  ;;  %331 = vmatprep.mubr.f32.mxu1 %v25_v10  ;;  %v367_v22 = vpack.c.bf16 %v46_v21, %v45_v20  ;;  %v371_v25 = vpack.c.bf16 %v48_v24, %v47_v23  ;;  %v18_v26 = vld [vmem:[%s646_s0 + $0x8] sm:$0xff]  ;;  %v19_v28 = vld [vmem:[%s646_s0 + $0x10] sm:$0xff]  ;;  %v20_v30 = vld [vmem:[%s646_s0 + $0x18] sm:$0xff] }
   0x8   :  { %v26_v27 = vld [vmem:[%s646_s0 + $0x48] sm:$0xff]  ;;  %v27_v29 = vld [vmem:[%s646_s0 + $0x50] sm:$0xff]  ;;  %v28_v31 = vld [vmem:[%s646_s0 + $0x58] sm:$0xff] }
   0x9   :  { %350 = vmatpush3.bf16.msra.mxu0 %v347_v5  ;;  %384 = vmatpush3.bf16.msra.mxu1 %v347_v5  ;;  %v21_v32 = vld [vmem:[%s646_s0 + $0x20] sm:$0xff]  ;;  %v22_v34 = vld [vmem:[%s646_s0 + $0x28] sm:$0xff]  ;;  %v23_v36 = vld [vmem:[%s646_s0 + $0x30] sm:$0xff] }
   0xa   :  { %352 = vmatprep.subr.bf16.mxu0 %v351_v8  ;;  %377 = vmatprep.subr.bf16.mxu1 %v351_v8  ;;  %v29_v33 = vld [vmem:[%s646_s0 + $0x60] sm:$0xff]  ;;  %v30_v35 = vld [vmem:[%s646_s0 + $0x68] sm:$0xff]  ;;  %v31_v37 = vld [vmem:[%s646_s0 + $0x70] sm:$0xff] }
   0xb   :  { %v24_v38 = vld [vmem:[%s646_s0 + $0x38] sm:$0xff]  ;;  %v515_v40 = vld [vmem:[%s647_s2] ss:$0 sm:$0xff]  ;;  %v202_v42 = vld [vmem:[%s648_s3 + $0x8] sm:$0xff] }
   0xc   :  { %v32_v39 = vld [vmem:[%s646_s0 + $0x78] sm:$0xff]  ;;  %v210_v44 = vld [vmem:[%s648_s3 + $0x48] sm:$0xff]  ;;  %v201_v48 = vld [vmem:[%s648_s3] sm:$0xff] }
   0xd   :  { %354 = vmatpush3.bf16.msra.mxu0 %v351_v8  ;;  %385 = vmatpush3.bf16.msra.mxu1 %v351_v8  ;;  %v209_v50 = vld [vmem:[%s648_s3 + $0x40] sm:$0xff]  ;;  %v204_v58 = vld [vmem:[%s648_s3 + $0x18] sm:$0xff]  ;;  %v203_v0 = vld [vmem:[%s648_s3 + $0x10] sm:$0xff] }
   0xe   :  { %356 = vmatprep.subr.bf16.mxu0 %v355_v13  ;;  %378 = vmatprep.subr.bf16.mxu1 %v355_v13  ;;  %v212_v60 = vld [vmem:[%s648_s3 + $0x58] sm:$0xff]  ;;  %v211_v2 = vld [vmem:[%s648_s3 + $0x50] sm:$0xff]  ;;  %v206_v10 = vld [vmem:[%s648_s3 + $0x28] sm:$0xff] }
   0xf   :  { %v214_v12 = vld [vmem:[%s648_s3 + $0x68] sm:$0xff]  ;;  %v213_v18 = vld [vmem:[%s648_s3 + $0x60] sm:$0xff] }
  0x11   :  { %358 = vmatpush3.bf16.msra.mxu0 %v355_v13  ;;  %386 = vmatpush3.bf16.msra.mxu1 %v355_v13 }
  0x12   :  { %360 = vmatprep.subr.bf16.mxu0 %v359_v16  ;;  %379 = vmatprep.subr.bf16.mxu1 %v359_v16 }
  0x15   :  { %362 = vmatpush3.bf16.msra.mxu0 %v359_v16  ;;  %387 = vmatpush3.bf16.msra.mxu1 %v359_v16  ;;  %v205_v16 = vld [vmem:[%s648_s3 + $0x20] sm:$0xff] }
  0x16   :  { %364 = vmatprep.subr.bf16.mxu0 %v363_v19  ;;  %380 = vmatprep.subr.bf16.mxu1 %v363_v19 }
  0x19   :  { %366 = vmatpush3.bf16.msra.mxu0 %v363_v19  ;;  %388 = vmatpush3.bf16.msra.mxu1 %v363_v19 }
  0x1a   :  { %368 = vmatprep.subr.bf16.mxu0 %v367_v22  ;;  %381 = vmatprep.subr.bf16.mxu1 %v367_v22 }
  0x1d   :  { %370 = vmatpush3.bf16.msra.mxu0 %v367_v22  ;;  %389 = vmatpush3.bf16.msra.mxu1 %v367_v22 }
  0x1e   :  { %372 = vmatprep.subr.bf16.mxu0 %v371_v25  ;;  %382 = vmatprep.subr.bf16.mxu1 %v371_v25 }
  0x21   :  { %374 = vmatpush3.bf16.msra.mxu0 %v371_v25  ;;  %390 = vmatpush3.bf16.msra.mxu1 %v371_v25 }
  0x24   :  { %320 = vmatmul.mubr.f32.vlgmr.msra.gmra.mrb[0].mxu0 %v18_v26  ;;  %332 = vmatmul.mubr.f32.vlgmr.msra.gmra.mrb[0].mxu1 %v26_v27  ;;  %v208_v26 = vld [vmem:[%s648_s3 + $0x38] sm:$0xff] }
  0x25   :  { %322 = vmatprep.mubr.f32.mxu0 %v19_v28  ;;  %334 = vmatprep.mubr.f32.mxu1 %v27_v29  ;;  %v216_v28 = vld [vmem:[%s648_s3 + $0x78] sm:$0xff] }
  0x28   :  { %323 = vmatmul.mubr.f32.gmra.mrb[2].mxu0 %v20_v30  ;;  %335 = vmatmul.mubr.f32.gmra.mrb[2].mxu1 %v28_v31 }
  0x29   :  { %325 = vmatprep.mubr.f32.mxu0 %v21_v32  ;;  %337 = vmatprep.mubr.f32.mxu1 %v29_v33  ;;  %v207_v32 = vld [vmem:[%s648_s3 + $0x30] sm:$0xff] }
  0x2c   :  { %326 = vmatmul.mubr.f32.gmra.mrb[4].mxu0 %v22_v34  ;;  %338 = vmatmul.mubr.f32.gmra.mrb[4].mxu1 %v30_v35  ;;  %v215_v34 = vld [vmem:[%s648_s3 + $0x70] sm:$0xff] }
  0x2d   :  { %328 = vmatprep.mubr.f32.mxu0 %v23_v36  ;;  %340 = vmatprep.mubr.f32.mxu1 %v31_v37 }
  0x30   :  { %329 = vmatmul.mubr.f32.gmra.mrb[6].mxu0 %v24_v38  ;;  %341 = vmatmul.mubr.f32.gmra.mrb[6].mxu1 %v32_v39 }
  0xf7   :  { %v321_v41 = vpop.f32.mrb[0].mxu0  ;;  %v333_v43 = vpop.f32.mrb[0].mxu1 }
  0xf8   :  { %v128_v45 = vadd.f32 %v321_v41, %v515_v40  ;;  %v168_v46 = vadd.f32 %v333_v43, %v515_v40  ;;  %v122_v47 = vpop.f32.mrb[1].mxu0  ;;  %v162_v49 = vpop.f32.mrb[1].mxu1 }
  0xf9   :  { %v123_v51 = vadd.f32 %v515_v40, %v122_v47  ;;  %v163_v52 = vadd.f32 %v515_v40, %v162_v49 }
  0xfa   :  { %v218_v53 = vadd.f32 %v202_v42, %v128_v45  ;;  %v226_v54 = vadd.f32 %v210_v44, %v168_v46 }
  0xfb   :  { %v217_v55 = vadd.f32 %v201_v48, %v123_v51  ;;  %v225_v56 = vadd.f32 %v209_v50, %v163_v52  ;;  %v324_v57 = vpop.f32.mrb[2].mxu0  ;;  %v336_v59 = vpop.f32.mrb[2].mxu1 }
  0xfc   :  { %235 = vst.msk [vmem:[%s649_s4 + $0x8] sm:$0xff] %vm233_vm0, %v218_v53  ;;  %243 = vst.msk [vmem:[%s649_s4 + $0x48] sm:$0xff] %vm233_vm0, %v226_v54  ;;  %v138_v61 = vadd.f32 %v324_v57, %v515_v40  ;;  %v178_v62 = vadd.f32 %v336_v59, %v515_v40  ;;  %v132_v63 = vpop.f32.mrb[3].mxu0  ;;  %v172_v1 = vpop.f32.mrb[3].mxu1 }
  0xfd   :  { %234 = vst.msk [vmem:[%s649_s4] sm:$0xff] %vm233_vm0, %v217_v55  ;;  %242 = vst.msk [vmem:[%s649_s4 + $0x40] sm:$0xff] %vm233_vm0, %v225_v56  ;;  %v133_v3 = vadd.f32 %v515_v40, %v132_v63  ;;  %v173_v4 = vadd.f32 %v515_v40, %v172_v1 }
  0xfe   :  { %v220_v5 = vadd.f32 %v204_v58, %v138_v61  ;;  %v228_v6 = vadd.f32 %v212_v60, %v178_v62 }
  0xff   :  { %v219_v7 = vadd.f32 %v203_v0, %v133_v3  ;;  %v227_v8 = vadd.f32 %v211_v2, %v173_v4  ;;  %v327_v9 = vpop.f32.mrb[4].mxu0  ;;  %v339_v11 = vpop.f32.mrb[4].mxu1 }
 0x100   :  { %237 = vst.msk [vmem:[%s649_s4 + $0x18] sm:$0xff] %vm233_vm0, %v220_v5  ;;  %245 = vst.msk [vmem:[%s649_s4 + $0x58] sm:$0xff] %vm233_vm0, %v228_v6  ;;  %v148_v13 = vadd.f32 %v327_v9, %v515_v40  ;;  %v188_v14 = vadd.f32 %v339_v11, %v515_v40  ;;  %v142_v15 = vpop.f32.mrb[5].mxu0  ;;  %v182_v17 = vpop.f32.mrb[5].mxu1 }
 0x101   :  { %236 = vst.msk [vmem:[%s649_s4 + $0x10] sm:$0xff] %vm233_vm0, %v219_v7  ;;  %244 = vst.msk [vmem:[%s649_s4 + $0x50] sm:$0xff] %vm233_vm0, %v227_v8  ;;  %v143_v19 = vadd.f32 %v515_v40, %v142_v15  ;;  %v183_v20 = vadd.f32 %v515_v40, %v182_v17 }
 0x102   :  { %v222_v21 = vadd.f32 %v206_v10, %v148_v13  ;;  %v230_v22 = vadd.f32 %v214_v12, %v188_v14 }
 0x103   :  { %v221_v23 = vadd.f32 %v205_v16, %v143_v19  ;;  %v229_v24 = vadd.f32 %v213_v18, %v183_v20  ;;  %v330_v25 = vpop.f32.mrb[6].mxu0  ;;  %v342_v27 = vpop.f32.mrb[6].mxu1 }
 0x104   :  { %239 = vst.msk [vmem:[%s649_s4 + $0x28] sm:$0xff] %vm233_vm0, %v222_v21  ;;  %247 = vst.msk [vmem:[%s649_s4 + $0x68] sm:$0xff] %vm233_vm0, %v230_v22  ;;  %v158_v29 = vadd.f32 %v330_v25, %v515_v40  ;;  %v198_v30 = vadd.f32 %v342_v27, %v515_v40  ;;  %v152_v31 = vpop.f32.mrb[7].mxu0  ;;  %v192_v33 = vpop.f32.mrb[7].mxu1 }
 0x105   :  { %238 = vst.msk [vmem:[%s649_s4 + $0x20] sm:$0xff] %vm233_vm0, %v221_v23  ;;  %246 = vst.msk [vmem:[%s649_s4 + $0x60] sm:$0xff] %vm233_vm0, %v229_v24  ;;  %v153_v35 = vadd.f32 %v515_v40, %v152_v31  ;;  %v193_v36 = vadd.f32 %v515_v40, %v192_v33 }
 0x106   :  { %v224_v37 = vadd.f32 %v208_v26, %v158_v29  ;;  %v232_v38 = vadd.f32 %v216_v28, %v198_v30 }
 0x107   :  { %v223_v39 = vadd.f32 %v207_v32, %v153_v35  ;;  %v231_v41 = vadd.f32 %v215_v34, %v193_v36 }
 0x108   :  { %241 = vst.msk [vmem:[%s649_s4 + $0x38] sm:$0xff] %vm233_vm0, %v224_v37  ;;  %249 = vst.msk [vmem:[%s649_s4 + $0x78] sm:$0xff] %vm233_vm0, %v232_v38 }
 0x109   :  { %240 = vst.msk [vmem:[%s649_s4 + $0x30] sm:$0xff] %vm233_vm0, %v223_v39  ;;  %248 = vst.msk [vmem:[%s649_s4 + $0x70] sm:$0xff] %vm233_vm0, %v231_v41 }

// kernel: block_forward.10
= control target key start
LH: loop header
LB: loop body
LE: loop exit
PB: predicated region body
PF: predicated region fallthrough
CT: control target
= control target key end

     0   :  { %s927_s12 = smov 0   ;;  %s1341_s0 = inlined_call_operand.vmem [shape: f32[2,10,10,128], index: 0, kind: input, shape index: {}]   ;;  %s1342_s1 = inlined_call_operand.vmem [shape: f32[9,128], index: 1, kind: input, shape index: {}]   ;;  %s1343_s2 = inlined_call_operand.vmem [shape: f32[1,128], index: 2, kind: input, shape index: {}]   ;;  %s1344_s3 = inlined_call_operand.vmem [shape: f32[2,8,8,128], index: 3, kind: output, shape index: {}]  }
   0x1 LB: > { %s861_s13 = sadd.s32 4294967295, %s905_s12   ;;  %p865_p0 = scmp.ge.s32.totalorder %s905_s12, 1  ;;  %s905_s12 = sphi %s927_s12, %s13_s12  }
   0x2   : > { %p137_p1 = scmp.lt.s32.totalorder %s905_s12, 3 }
   0x4   : > { %p138_p2 = pnand %p865_p0, %p137_p1 }
   0x5   : > { %p161_p3 = scmp.lt.s32.totalorder (!%p138_p2), %s861_s13, 1  ;;  %v193_v0 = vlaneseq (!%p138_p2)  ;;  %v191_v2 = vld [vmem:[%s1342_s1] sm:$0xff] (!%p138_p2)  ;;  %vm249_vm0 = vcmask (!%p138_p2), 1046528   ;;  %vm326_vm1 = vcmask (!%p138_p2), 1045504   ;;  %v981_v36 = vld [vmem:[%s1342_s1 + $0x8] ss:$0 sm:$0xff] (!%p138_p2) }
   0x6   : > { %141 = sbr.rel (%p138_p2) target bundleno = 152 (0x98), region = 32 }
   0x7   : > { %v194_v1 = vshrl.u32 (!%p138_p2), %v193_v0, 7 }
   0x9   : > { %v195_v3 = vsub.s32 (!%p138_p2), 0, %v194_v1  ;;  %v215_v4 = vsub.s32 (!%p138_p2), 1, %v194_v1  ;;  %v292_v5 = vsub.s32 (!%p138_p2), 2, %v194_v1  ;;  %v369_v6 = vsub.s32 (!%p138_p2), 3, %v194_v1 }
   0xa   : > { %v389_v7 = vsub.s32 (!%p138_p2), 4, %v194_v1  ;;  %v465_v8 = vsub.s32 (!%p138_p2), 5, %v194_v1  ;;  %v541_v9 = vsub.s32 (!%p138_p2), 6, %v194_v1  ;;  %v561_v10 = vsub.s32 (!%p138_p2), 7, %v194_v1 }
   0xb   : > { %v946_v11 = vrot.slane (!%p138_p2), %v191_v2, %v195_v3  ;;  %v948_v12 = vrot.slane (!%p138_p2), %v191_v2, %v215_v4  ;;  %v950_v13 = vrot.slane (!%p138_p2), %v191_v2, %v292_v5  ;;  %v952_v14 = vrot.slane (!%p138_p2), %v191_v2, %v369_v6 }
   0xc   : > { %v956_v17 = vrot.slane (!%p138_p2), %v191_v2, %v389_v7  ;;  %v958_v18 = vrot.slane (!%p138_p2), %v191_v2, %v465_v8  ;;  %v960_v19 = vrot.slane (!%p138_p2), %v191_v2, %v541_v9  ;;  %v962_v20 = vrot.slane (!%p138_p2), %v191_v2, %v561_v10 }
   0xd   : > { %s1346_s13 = smov (!%p161_p3, %s861_s13), 1 }
   0xe   : > { %s874_s16 = smul.u32 160, %s1346_s13  ;;  %s873_s24 = sshll.u32 %s1346_s13, 6 }
   0xf   : > { %s1163_s27 = scalar_lea.vmem %s1344_s3, %s873_s24 }
  0x10   : > { %s944_s19 = scalar_lea.vmem %s1341_s0, %s874_s16 }
  0x11   : > { %v171_v15 = vld [vmem:[%s944_s19] sm:$0xff]  ;;  %v172_v16 = vld [vmem:[%s944_s19 + $0x8] sm:$0x3]  ;;  %v173_v21 = vld [vmem:[%s944_s19 + $0x10] sm:$0xff] }
  0x12   : > { %v174_v22 = vld [vmem:[%s944_s19 + $0x18] sm:$0x3]  ;;  %v197_v23 = vmul.f32 %v946_v11, %v171_v15  ;;  %v217_v24 = vmul.f32 %v948_v12, %v171_v15  ;;  %v218_v25 = vmul.f32 %v948_v12, %v172_v16  ;;  %v294_v26 = vmul.f32 %v950_v13, %v171_v15  ;;  %v976_v35 = vld [vmem:[%s944_s19 + $0x20] sm:$0xff]  ;;  %v990_v45 = vld [vmem:[%s944_s19 + $0x28] sm:$0x3] }
  0x13   : > { %v295_v27 = vmul.f32 %v950_v13, %v172_v16  ;;  %v371_v28 = vmul.f32 %v952_v14, %v173_v21  ;;  %v391_v29 = vmul.f32 %v956_v17, %v173_v21  ;;  %v392_v30 = vmul.f32 %v956_v17, %v174_v22 }
  0x14   : > { %v250_v31 = vrot.slane %v217_v24, 1  ;;  %v251_v32 = vrot.slane %v218_v25, 1  ;;  %v327_v33 = vrot.slane %v294_v26, 2  ;;  %v467_v34 = vmul.f32 %v958_v18, %v173_v21 }
  0x15   : > { %v328_v37 = vrot.slane %v295_v27, 2  ;;  %v423_v38 = vrot.slane %v391_v29, 1  ;;  %v424_v39 = vrot.slane %v392_v30, 1  ;;  %v468_v40 = vmul.f32 %v958_v18, %v174_v22  ;;  %v1024_v27 = vld [vmem:[%s944_s19 + $0x38] sm:$0x3] }
  0x16   : > { %v252_v41 = vsel %vm249_vm0, %v250_v31, %v251_v32  ;;  %v499_v42 = vrot.slane %v467_v34, 2  ;;  %v543_v43 = vmul.f32 %v960_v19, %v976_v35  ;;  %v563_v44 = vmul.f32 %v962_v20, %v976_v35 }
  0x17   : > { %v282_v46 = vadd.f32 %v252_v41, %v197_v23  ;;  %v329_v47 = vsel %vm326_vm1, %v327_v33, %v328_v37  ;;  %v425_v48 = vsel %vm249_vm0, %v423_v38, %v424_v39  ;;  %v500_v49 = vrot.slane %v468_v40, 2  ;;  %v1020_v23 = vld [vmem:[%s944_s19 + $0x30] sm:$0xff] }
  0x18   : > { %v564_v50 = vmul.f32 %v962_v20, %v990_v45  ;;  %v595_v51 = vrot.slane %v563_v44, 1  ;;  %v639_v52 = vmul.f32 %v981_v36, %v976_v35  ;;  %v640_v53 = vmul.f32 %v981_v36, %v990_v45 }
  0x19   : > { %v359_v54 = vadd.f32 %v329_v47, %v282_v46  ;;  %v501_v55 = vsel %vm326_vm1, %v499_v42, %v500_v49  ;;  %v198_v56 = vmul.f32 %v946_v11, %v173_v21  ;;  %v219_v57 = vmul.f32 %v948_v12, %v173_v21  ;;  %v1041_v47 = vld [vmem:[%s1343_s2] ss:$0 sm:$0xff] }
  0x1a   : > { %v596_v58 = vrot.slane %v564_v50, 1  ;;  %v671_v59 = vrot.slane %v639_v52, 2  ;;  %v672_v60 = vrot.slane %v640_v53, 2  ;;  %v220_v61 = vmul.f32 %v948_v12, %v174_v22 }
  0x1b   : > { %v379_v62 = vadd.f32 %v371_v28, %v359_v54  ;;  %v253_v63 = vrot.slane %v219_v57, 1  ;;  %v296_v0 = vmul.f32 %v950_v13, %v173_v21  ;;  %v297_v1 = vmul.f32 %v950_v13, %v174_v22 }
  0x1c   : > { %v597_v2 = vsel %vm249_vm0, %v595_v51, %v596_v58  ;;  %v673_v3 = vsel %vm326_vm1, %v671_v59, %v672_v60  ;;  %v254_v4 = vrot.slane %v220_v61, 1  ;;  %v372_v5 = vmul.f32 %v952_v14, %v976_v35 }
  0x1d   : > { %v455_v6 = vadd.f32 %v425_v48, %v379_v62  ;;  %v330_v7 = vrot.slane %v296_v0, 2  ;;  %v331_v8 = vrot.slane %v297_v1, 2  ;;  %v393_v9 = vmul.f32 %v956_v17, %v976_v35 }
  0x1e   : > { %v255_v10 = vsel %vm249_vm0, %v253_v63, %v254_v4  ;;  %v394_v15 = vmul.f32 %v956_v17, %v990_v45  ;;  %v469_v16 = vmul.f32 %v958_v18, %v976_v35  ;;  %v470_v21 = vmul.f32 %v958_v18, %v990_v45 }
  0x1f   : > { %v531_v22 = vadd.f32 %v501_v55, %v455_v6  ;;  %v283_v24 = vadd.f32 %v255_v10, %v198_v56  ;;  %v332_v25 = vsel %vm326_vm1, %v330_v7, %v331_v8  ;;  %v426_v26 = vrot.slane %v393_v9, 1 }
  0x20   : > { %v427_v28 = vrot.slane %v394_v15, 1  ;;  %v502_v29 = vrot.slane %v469_v16, 2  ;;  %v503_v30 = vrot.slane %v470_v21, 2  ;;  %v544_v31 = vmul.f32 %v960_v19, %v1020_v23  ;;  %v1072_v16 = vld [vmem:[%s944_s19 + $0x40] sm:$0xff] }
  0x21   : > { %v551_v32 = vadd.f32 %v543_v43, %v531_v22  ;;  %v360_v33 = vadd.f32 %v332_v25, %v283_v24  ;;  %v565_v34 = vmul.f32 %v962_v20, %v1020_v23  ;;  %v566_v37 = vmul.f32 %v962_v20, %v1024_v27  ;;  %v1077_v24 = vld [vmem:[%s944_s19 + $0x48] sm:$0x3] }
  0x22   : > { %v428_v38 = vsel %vm249_vm0, %v426_v26, %v427_v28  ;;  %v504_v39 = vsel %vm326_vm1, %v502_v29, %v503_v30  ;;  %v641_v40 = vmul.f32 %v981_v36, %v1020_v23  ;;  %v642_v41 = vmul.f32 %v981_v36, %v1024_v27 }
  0x23   : > { %v627_v42 = vadd.f32 %v597_v2, %v551_v32  ;;  %v380_v44 = vadd.f32 %v372_v5, %v360_v33  ;;  %v598_v43 = vrot.slane %v565_v34, 1  ;;  %v599_v46 = vrot.slane %v566_v37, 1 }
  0x24   : > { %v674_v48 = vrot.slane %v641_v40, 2  ;;  %v675_v49 = vrot.slane %v642_v41, 2  ;;  %v199_v50 = vmul.f32 %v946_v11, %v976_v35  ;;  %v221_v51 = vmul.f32 %v948_v12, %v976_v35 }
  0x25   : > { %v703_v52 = vadd.f32 %v673_v3, %v627_v42  ;;  %v456_v53 = vadd.f32 %v428_v38, %v380_v44  ;;  %v600_v54 = vsel %vm249_vm0, %v598_v43, %v599_v46  ;;  %v222_v55 = vmul.f32 %v948_v12, %v990_v45 }
  0x26   : > { %v676_v56 = vsel %vm326_vm1, %v674_v48, %v675_v49  ;;  %v256_v57 = vrot.slane %v221_v51, 1  ;;  %v298_v58 = vmul.f32 %v950_v13, %v976_v35  ;;  %v299_v59 = vmul.f32 %v950_v13, %v990_v45 }
  0x27   : > { %v1056_v60 = vadd.f32 %v1041_v47, %v703_v52  ;;  %v532_v61 = vadd.f32 %v504_v39, %v456_v53  ;;  %v257_v62 = vrot.slane %v222_v55, 1  ;;  %v373_v63 = vmul.f32 %v952_v14, %v1020_v23 }
  0x28   : > { %v333_v0 = vrot.slane %v298_v58, 2  ;;  %v334_v1 = vrot.slane %v299_v59, 2  ;;  %v395_v2 = vmul.f32 %v956_v17, %v1020_v23  ;;  %v396_v35 = vmul.f32 %v956_v17, %v1024_v27 }
  0x29   : > { %v726_v45 = vmul.f32 %v1056_v60, %v1056_v60  ;;  %v552_v3 = vadd.f32 %v544_v31, %v532_v61  ;;  %v258_v4 = vsel %vm249_vm0, %v256_v57, %v257_v62  ;;  %v471_v5 = vmul.f32 %v958_v18, %v1020_v23 }
  0x2a   : > { %v284_v6 = vadd.f32 %v258_v4, %v199_v50  ;;  %v335_v7 = vsel %vm326_vm1, %v333_v0, %v334_v1  ;;  %v429_v8 = vrot.slane %v395_v2, 1  ;;  %v430_v9 = vrot.slane %v396_v35, 1 }
  0x2b   : > { %v734_v10 = vmul.f32 %v726_v45, %v1056_v60  ;;  %v628_v15 = vadd.f32 %v600_v54, %v552_v3  ;;  %v472_v21 = vmul.f32 %v958_v18, %v1024_v27  ;;  %v505_v22 = vrot.slane %v471_v5, 2 }
  0x2c   : > { %v361_v25 = vadd.f32 %v335_v7, %v284_v6  ;;  %v431_v26 = vsel %vm249_vm0, %v429_v8, %v430_v9  ;;  %v545_v28 = vmul.f32 %v960_v19, %v1072_v16  ;;  %v567_v29 = vmul.f32 %v962_v20, %v1072_v16 }
  0x2d   : > { %v742_v30 = vmul.f32 0.044715, %v734_v10  ;;  %v704_v31 = vadd.f32 %v676_v56, %v628_v15  ;;  %v506_v32 = vrot.slane %v472_v21, 2  ;;  %v568_v33 = vmul.f32 %v962_v20, %v1077_v24  ;;  %v1124_v15 = vld [vmem:[%s944_s19 + $0x50] sm:$0xff] }
  0x2e   : > { %v381_v34 = vadd.f32 %v373_v63, %v361_v25  ;;  %v601_v37 = vrot.slane %v567_v29, 1  ;;  %v643_v38 = vmul.f32 %v981_v36, %v1072_v16  ;;  %v644_v39 = vmul.f32 %v981_v36, %v1077_v24 }
  0x2f   : > { %v750_v40 = vadd.f32 %v742_v30, %v1056_v60  ;;  %v1092_v41 = vadd.f32 %v1041_v47, %v704_v31  ;;  %v507_v42 = vsel %vm326_vm1, %v505_v22, %v506_v32  ;;  %v602_v44 = vrot.slane %v568_v33, 1 }
  0x30   : > { %v457_v43 = vadd.f32 %v431_v26, %v381_v34  ;;  %v677_v46 = vrot.slane %v643_v38, 2  ;;  %v678_v48 = vrot.slane %v644_v39, 2  ;;  %v200_v49 = vmul.f32 %v946_v11, %v1020_v23 }
  0x31   : > { %v758_v50 = vmul.f32 0.7978846, %v750_v40  ;;  %v727_v51 = vmul.f32 %v1092_v41, %v1092_v41  ;;  %v603_v52 = vsel %vm249_vm0, %v601_v37, %v602_v44  ;;  %v223_v53 = vmul.f32 %v948_v12, %v1020_v23 }
  0x32   : > { %v533_v54 = vadd.f32 %v507_v42, %v457_v43  ;;  %v679_v55 = vsel %vm326_vm1, %v677_v46, %v678_v48  ;;  %v224_v56 = vmul.f32 %v948_v12, %v1024_v27  ;;  %v300_v57 = vmul.f32 %v950_v13, %v1020_v23 }
  0x33   : > { %883 = vtanh.f32 %v758_v50  ;;  %v735_v58 = vmul.f32 %v727_v51, %v1092_v41  ;;  %v259_v59 = vrot.slane %v223_v53, 1  ;;  %v301_v61 = vmul.f32 %v950_v13, %v1024_v27 }
  0x34   : > { %v553_v62 = vadd.f32 %v545_v28, %v533_v54  ;;  %v260_v63 = vrot.slane %v224_v56, 1  ;;  %v336_v0 = vrot.slane %v300_v57, 2  ;;  %v374_v1 = vmul.f32 %v952_v14, %v1072_v16  ;;  %v1127_v28 = vld [vmem:[%s944_s19 + $0x58] sm:$0x3] }
  0x35   : > { %v743_v2 = vmul.f32 0.044715, %v735_v58  ;;  %v337_v35 = vrot.slane %v301_v61, 2  ;;  %v397_v45 = vmul.f32 %v956_v17, %v1072_v16  ;;  %v398_v23 = vmul.f32 %v956_v17, %v1077_v24 }
  0x36   : > { %v629_v3 = vadd.f32 %v603_v52, %v553_v62  ;;  %v261_v4 = vsel %vm249_vm0, %v259_v59, %v260_v63  ;;  %v473_v27 = vmul.f32 %v958_v18, %v1072_v16  ;;  %v474_v5 = vmul.f32 %v958_v18, %v1077_v24 }
  0x37   : > { %v751_v6 = vadd.f32 %v743_v2, %v1092_v41  ;;  %v285_v7 = vadd.f32 %v261_v4, %v200_v49  ;;  %v338_v8 = vsel %vm326_vm1, %v336_v0, %v337_v35  ;;  %v432_v9 = vrot.slane %v397_v45, 1 }
  0x38   : > { %v705_v10 = vadd.f32 %v679_v55, %v629_v3  ;;  %v433_v21 = vrot.slane %v398_v23, 1  ;;  %v508_v22 = vrot.slane %v473_v27, 2  ;;  %v509_v25 = vrot.slane %v474_v5, 2  ;;  %v1171_v5 = vld [vmem:[%s944_s19 + $0x60] sm:$0xff] }
  0x39   : > { %v759_v26 = vmul.f32 0.7978846, %v751_v6  ;;  %v362_v29 = vadd.f32 %v338_v8, %v285_v7  ;;  %v546_v30 = vmul.f32 %v960_v19, %v1124_v15  ;;  %v569_v31 = vmul.f32 %v962_v20, %v1124_v15 }
  0x3a   : > { %v1134_v32 = vadd.f32 %v1041_v47, %v705_v10  ;;  %v434_v33 = vsel %vm249_vm0, %v432_v9, %v433_v21  ;;  %v510_v34 = vsel %vm326_vm1, %v508_v22, %v509_v25  ;;  %v570_v37 = vmul.f32 %v962_v20, %v1127_v28 }
  0x3b   : > { %885 = vtanh.f32 %v759_v26  ;;  %v382_v38 = vadd.f32 %v374_v1, %v362_v29  ;;  %v604_v39 = vrot.slane %v569_v31, 1  ;;  %v645_v40 = vmul.f32 %v981_v36, %v1124_v15 }
  0x3c   : > { %v728_v42 = vmul.f32 %v1134_v32, %v1134_v32  ;;  %v605_v44 = vrot.slane %v570_v37, 1  ;;  %v646_v43 = vmul.f32 %v981_v36, %v1127_v28  ;;  %v201_v46 = vmul.f32 %v946_v11, %v1072_v16 }
  0x3d   : > { %v884_v48 = vpop.eup %883  ;;  %v458_v49 = vadd.f32 %v434_v33, %v382_v38  ;;  %v680_v50 = vrot.slane %v645_v40, 2  ;;  %v225_v51 = vmul.f32 %v948_v12, %v1072_v16  ;;  %v226_v52 = vmul.f32 %v948_v12, %v1077_v24  ;;  %v1189_v38 = vld [vmem:[%s944_s19 + $0x68] sm:$0x3] }
  0x3e   : > { %v774_v53 = vadd.f32 1.0, %v884_v48  ;;  %v736_v54 = vmul.f32 %v728_v42, %v1134_v32  ;;  %v606_v55 = vsel %vm249_vm0, %v604_v39, %v605_v44  ;;  %v681_v56 = vrot.slane %v646_v43, 2 }
  0x3f   : > { %v534_v57 = vadd.f32 %v510_v34, %v458_v49  ;;  %v262_v58 = vrot.slane %v225_v51, 1  ;;  %v263_v59 = vrot.slane %v226_v52, 1  ;;  %v302_v61 = vmul.f32 %v950_v13, %v1072_v16 }
  0x40   : > { %v782_v62 = vmul.f32 0.5, %v774_v53  ;;  %v744_v63 = vmul.f32 0.044715, %v736_v54  ;;  %v682_v0 = vsel %vm326_vm1, %v680_v50, %v681_v56  ;;  %v303_v1 = vmul.f32 %v950_v13, %v1077_v24 }
  0x41   : > { %v554_v2 = vadd.f32 %v546_v30, %v534_v57  ;;  %v264_v35 = vsel %vm249_vm0, %v262_v58, %v263_v59  ;;  %v339_v45 = vrot.slane %v302_v61, 2  ;;  %v375_v16 = vmul.f32 %v952_v14, %v1124_v15 }
  0x42   : > { %v790_v23 = vmul.f32 %v782_v62, %v1056_v60  ;;  %v752_v3 = vadd.f32 %v744_v63, %v1134_v32  ;;  %v286_v4 = vadd.f32 %v264_v35, %v201_v46  ;;  %v340_v27 = vrot.slane %v303_v1, 2 }
  0x43   : > { %v630_v24 = vadd.f32 %v606_v55, %v554_v2  ;;  %v399_v6 = vmul.f32 %v956_v17, %v1124_v15  ;;  %v400_v7 = vmul.f32 %v956_v17, %v1127_v28  ;;  %v475_v8 = vmul.f32 %v958_v18, %v1124_v15 }
  0x44   : > { %798 = vst [vmem:[%s1163_s27] sm:$0xff] %v790_v23  ;;  %v760_v9 = vmul.f32 0.7978846, %v752_v3  ;;  %v341_v60 = vsel %vm326_vm1, %v339_v45, %v340_v27  ;;  %v476_v10 = vmul.f32 %v958_v18, %v1127_v28  ;;  %v547_v21 = vmul.f32 %v960_v19, %v1171_v5 }
  0x45   : > { %v886_v22 = vpop.eup %885  ;;  %v706_v25 = vadd.f32 %v682_v0, %v630_v24  ;;  %v363_v26 = vadd.f32 %v341_v60, %v286_v4  ;;  %v435_v29 = vrot.slane %v399_v6, 1  ;;  %v436_v30 = vrot.slane %v400_v7, 1 }
  0x46   : > { %v775_v31 = vadd.f32 1.0, %v886_v22  ;;  %887 = vtanh.f32 %v760_v9  ;;  %v511_v33 = vrot.slane %v475_v8, 2  ;;  %v512_v34 = vrot.slane %v476_v10, 2 }
  0x47   : > { %v1186_v37 = vadd.f32 %v1041_v47, %v706_v25  ;;  %v383_v39 = vadd.f32 %v375_v16, %v363_v26  ;;  %v437_v40 = vsel %vm249_vm0, %v435_v29, %v436_v30  ;;  %v571_v42 = vmul.f32 %v962_v20, %v1171_v5 }
  0x48   : > { %v783_v44 = vmul.f32 0.5, %v775_v31  ;;  %v513_v43 = vsel %vm326_vm1, %v511_v33, %v512_v34  ;;  %v572_v46 = vmul.f32 %v962_v20, %v1189_v38  ;;  %v647_v48 = vmul.f32 %v981_v36, %v1171_v5 }
  0x49   : > { %v729_v49 = vmul.f32 %v1186_v37, %v1186_v37  ;;  %v459_v50 = vadd.f32 %v437_v40, %v383_v39  ;;  %v607_v51 = vrot.slane %v571_v42, 1  ;;  %v648_v52 = vmul.f32 %v981_v36, %v1189_v38  ;;  %v1235_v39 = vld [vmem:[%s944_s19 + $0x70] sm:$0xff]  ;;  %v1238_v42 = vld [vmem:[%s944_s19 + $0x78] sm:$0x3] }
  0x4a   : > { %v791_v53 = vmul.f32 %v783_v44, %v1092_v41  ;;  %v608_v54 = vrot.slane %v572_v46, 1  ;;  %v683_v55 = vrot.slane %v647_v48, 2  ;;  %v202_v56 = vmul.f32 %v946_v11, %v1124_v15 }
  0x4b   : > { %v737_v57 = vmul.f32 %v729_v49, %v1186_v37  ;;  %v535_v58 = vadd.f32 %v513_v43, %v459_v50  ;;  %v684_v59 = vrot.slane %v648_v52, 2  ;;  %v227_v61 = vmul.f32 %v948_v12, %v1124_v15 }
  0x4c   : > { %799 = vst [vmem:[%s1163_s27 + $0x8] sm:$0xff] %v791_v53  ;;  %v609_v62 = vsel %vm249_vm0, %v607_v51, %v608_v54  ;;  %v228_v63 = vmul.f32 %v948_v12, %v1127_v28  ;;  %v304_v41 = vmul.f32 %v950_v13, %v1124_v15  ;;  %v305_v0 = vmul.f32 %v950_v13, %v1127_v28 }
  0x4d   : > { %v745_v1 = vmul.f32 0.044715, %v737_v57  ;;  %v555_v2 = vadd.f32 %v547_v21, %v535_v58  ;;  %v685_v35 = vsel %vm326_vm1, %v683_v55, %v684_v59  ;;  %v265_v45 = vrot.slane %v227_v61, 1 }
  0x4e   : > { %v266_v16 = vrot.slane %v228_v63, 1  ;;  %v342_v23 = vrot.slane %v304_v41, 2  ;;  %v343_v3 = vrot.slane %v305_v0, 2  ;;  %v376_v4 = vmul.f32 %v952_v14, %v1171_v5 }
  0x4f   : > { %v753_v27 = vadd.f32 %v745_v1, %v1186_v37  ;;  %v631_v24 = vadd.f32 %v609_v62, %v555_v2  ;;  %v401_v15 = vmul.f32 %v956_v17, %v1171_v5  ;;  %v402_v28 = vmul.f32 %v956_v17, %v1189_v38 }
  0x50   : > { %v888_v6 = vpop.eup %887  ;;  %v267_v7 = vsel %vm249_vm0, %v265_v45, %v266_v16  ;;  %v344_v8 = vsel %vm326_vm1, %v342_v23, %v343_v3  ;;  %v477_v9 = vmul.f32 %v958_v18, %v1171_v5  ;;  %v478_v60 = vmul.f32 %v958_v18, %v1189_v38 }
  0x51   : > { %v776_v10 = vadd.f32 1.0, %v888_v6  ;;  %v761_v21 = vmul.f32 0.7978846, %v753_v27  ;;  %v707_v22 = vadd.f32 %v685_v35, %v631_v24  ;;  %v287_v25 = vadd.f32 %v267_v7, %v202_v56 }
  0x52   : > { %v438_v26 = vrot.slane %v401_v15, 1  ;;  %v439_v29 = vrot.slane %v402_v28, 1  ;;  %v514_v30 = vrot.slane %v477_v9, 2  ;;  %v515_v31 = vrot.slane %v478_v60, 2 }
  0x53   : > { %v784_v33 = vmul.f32 0.5, %v776_v10  ;;  %889 = vtanh.f32 %v761_v21  ;;  %v1232_v34 = vadd.f32 %v1041_v47, %v707_v22  ;;  %v364_v40 = vadd.f32 %v344_v8, %v287_v25 }
  0x54   : > { %v440_v44 = vsel %vm249_vm0, %v438_v26, %v439_v29  ;;  %v516_v43 = vsel %vm326_vm1, %v514_v30, %v515_v31  ;;  %v548_v46 = vmul.f32 %v960_v19, %v1235_v39  ;;  %v573_v48 = vmul.f32 %v962_v20, %v1235_v39  ;;  %v187_v30 = vld [vmem:[%s944_s19 + $0x80] sm:$0xff] }
  0x55   : > { %v792_v49 = vmul.f32 %v784_v33, %v1134_v32  ;;  %v730_v50 = vmul.f32 %v1232_v34, %v1232_v34  ;;  %v384_v51 = vadd.f32 %v376_v4, %v364_v40  ;;  %v574_v52 = vmul.f32 %v962_v20, %v1238_v42 }
  0x56   : > { %v610_v53 = vrot.slane %v573_v48, 1  ;;  %v649_v54 = vmul.f32 %v981_v36, %v1235_v39  ;;  %v650_v55 = vmul.f32 %v981_v36, %v1238_v42  ;;  %v203_v56 = vmul.f32 %v946_v11, %v1171_v5 }
  0x57   : > { %800 = vst [vmem:[%s1163_s27 + $0x10] sm:$0xff] %v792_v49  ;;  %v738_v32 = vmul.f32 %v730_v50, %v1232_v34  ;;  %v460_v57 = vadd.f32 %v440_v44, %v384_v51  ;;  %v611_v58 = vrot.slane %v574_v52, 1  ;;  %v229_v59 = vmul.f32 %v948_v12, %v1171_v5  ;;  %v188_v44 = vld [vmem:[%s944_s19 + $0x88] sm:$0x3] }
  0x58   : > { %v686_v61 = vrot.slane %v649_v54, 2  ;;  %v687_v62 = vrot.slane %v650_v55, 2  ;;  %v230_v63 = vmul.f32 %v948_v12, %v1189_v38  ;;  %v306_v41 = vmul.f32 %v950_v13, %v1171_v5 }
  0x59   : > { %v746_v0 = vmul.f32 0.044715, %v738_v32  ;;  %v536_v1 = vadd.f32 %v516_v43, %v460_v57  ;;  %v612_v2 = vsel %vm249_vm0, %v610_v53, %v611_v58  ;;  %v268_v35 = vrot.slane %v229_v59, 1 }
  0x5a   : > { %v688_v45 = vsel %vm326_vm1, %v686_v61, %v687_v62  ;;  %v269_v16 = vrot.slane %v230_v63, 1  ;;  %v307_v23 = vmul.f32 %v950_v13, %v1189_v38  ;;  %v345_v3 = vrot.slane %v306_v41, 2 }
  0x5b   : > { %v754_v4 = vadd.f32 %v746_v0, %v1232_v34  ;;  %v556_v27 = vadd.f32 %v548_v46, %v536_v1  ;;  %v377_v24 = vmul.f32 %v952_v14, %v1235_v39  ;;  %v403_v5 = vmul.f32 %v956_v17, %v1235_v39 }
  0x5c   : > { %v270_v15 = vsel %vm249_vm0, %v268_v35, %v269_v16  ;;  %v346_v28 = vrot.slane %v307_v23, 2  ;;  %v404_v6 = vmul.f32 %v956_v17, %v1238_v42  ;;  %v479_v38 = vmul.f32 %v958_v18, %v1235_v39 }
  0x5d   : > { %v890_v7 = vpop.eup %889  ;;  %v762_v8 = vmul.f32 0.7978846, %v754_v4  ;;  %v632_v9 = vadd.f32 %v612_v2, %v556_v27  ;;  %v288_v60 = vadd.f32 %v270_v15, %v203_v56  ;;  %v441_v10 = vrot.slane %v403_v5, 1 }
  0x5e   : > { %v777_v21 = vadd.f32 1.0, %v890_v7  ;;  %v347_v22 = vsel %vm326_vm1, %v345_v3, %v346_v28  ;;  %v442_v25 = vrot.slane %v404_v6, 1  ;;  %v480_v26 = vmul.f32 %v958_v18, %v1238_v42 }
  0x5f   : > { %891 = vtanh.f32 %v762_v8  ;;  %v708_v29 = vadd.f32 %v688_v45, %v632_v9  ;;  %v365_v31 = vadd.f32 %v347_v22, %v288_v60  ;;  %v517_v33 = vrot.slane %v479_v38, 2 }
  0x60   : > { %v785_v40 = vmul.f32 0.5, %v777_v21  ;;  %v443_v43 = vsel %vm249_vm0, %v441_v10, %v442_v25  ;;  %v518_v46 = vrot.slane %v480_v26, 2  ;;  %v549_v48 = vmul.f32 %v960_v19, %v187_v30  ;;  %v189_v10 = vld [vmem:[%s944_s19 + $0x90] sm:$0xff]  ;;  %v190_v21 = vld [vmem:[%s944_s19 + $0x98] sm:$0x3] }
  0x61   : > { %v1287_v49 = vadd.f32 %v1041_v47, %v708_v29  ;;  %v385_v50 = vadd.f32 %v377_v24, %v365_v31  ;;  %v575_v51 = vmul.f32 %v962_v20, %v187_v30  ;;  %v576_v52 = vmul.f32 %v962_v20, %v188_v44 }
  0x62   : > { %v793_v53 = vmul.f32 %v785_v40, %v1186_v37  ;;  %v519_v54 = vsel %vm326_vm1, %v517_v33, %v518_v46  ;;  %v651_v55 = vmul.f32 %v981_v36, %v187_v30  ;;  %v652_v56 = vmul.f32 %v981_v36, %v188_v44 }
  0x63   : > { %v731_v32 = vmul.f32 %v1287_v49, %v1287_v49  ;;  %v461_v57 = vadd.f32 %v443_v43, %v385_v50  ;;  %v613_v58 = vrot.slane %v575_v51, 1  ;;  %v614_v59 = vrot.slane %v576_v52, 1 }
  0x64   : > { %801 = vst [vmem:[%s1163_s27 + $0x18] sm:$0xff] %v793_v53  ;;  %v689_v61 = vrot.slane %v651_v55, 2  ;;  %v690_v62 = vrot.slane %v652_v56, 2  ;;  %v204_v63 = vmul.f32 %v946_v11, %v1235_v39  ;;  %v231_v37 = vmul.f32 %v948_v12, %v1235_v39 }
  0x65   : > { %v739_v41 = vmul.f32 %v731_v32, %v1287_v49  ;;  %v537_v0 = vadd.f32 %v519_v54, %v461_v57  ;;  %v615_v1 = vsel %vm249_vm0, %v613_v58, %v614_v59  ;;  %v232_v2 = vmul.f32 %v948_v12, %v1238_v42 }
  0x66   : > { %v691_v35 = vsel %vm326_vm1, %v689_v61, %v690_v62  ;;  %v271_v45 = vrot.slane %v231_v37, 1  ;;  %v308_v16 = vmul.f32 %v950_v13, %v1235_v39  ;;  %v309_v11 = vmul.f32 %v950_v13, %v1238_v42 }
  0x67   : > { %v747_v23 = vmul.f32 0.044715, %v739_v41  ;;  %v557_v3 = vadd.f32 %v549_v48, %v537_v0  ;;  %v272_v4 = vrot.slane %v232_v2, 1  ;;  %v378_v27 = vmul.f32 %v952_v14, %v187_v30 }
  0x68   : > { %v348_v24 = vrot.slane %v308_v16, 2  ;;  %v349_v5 = vrot.slane %v309_v11, 2  ;;  %v405_v12 = vmul.f32 %v956_v17, %v187_v30  ;;  %v406_v15 = vmul.f32 %v956_v17, %v188_v44 }
  0x69   : > { %v892_v28 = vpop.eup %891  ;;  %v755_v6 = vadd.f32 %v747_v23, %v1287_v49  ;;  %v633_v39 = vadd.f32 %v615_v1, %v557_v3  ;;  %v273_v38 = vsel %vm249_vm0, %v271_v45, %v272_v4  ;;  %v481_v13 = vmul.f32 %v958_v18, %v187_v30 }
  0x6a   : > { %v778_v42 = vadd.f32 1.0, %v892_v28  ;;  %v289_v7 = vadd.f32 %v273_v38, %v204_v63  ;;  %v350_v14 = vsel %vm326_vm1, %v348_v24, %v349_v5  ;;  %v444_v8 = vrot.slane %v405_v12, 1 }
  0x6b   : > { %v763_v9 = vmul.f32 0.7978846, %v755_v6  ;;  %v709_v60 = vadd.f32 %v691_v35, %v633_v39  ;;  %v445_v22 = vrot.slane %v406_v15, 1  ;;  %v482_v17 = vmul.f32 %v958_v18, %v188_v44 }
  0x6c   : > { %v786_v25 = vmul.f32 0.5, %v778_v42  ;;  %v366_v26 = vadd.f32 %v350_v14, %v289_v7  ;;  %v520_v29 = vrot.slane %v481_v13, 2  ;;  %v577_v46 = vmul.f32 %v962_v20, %v189_v10 }
  0x6d   : > { %893 = vtanh.f32 %v763_v9  ;;  %v724_v31 = vadd.f32 %v1041_v47, %v709_v60  ;;  %v446_v30 = vsel %vm249_vm0, %v444_v8, %v445_v22  ;;  %v521_v33 = vrot.slane %v482_v17, 2 }
  0x6e   : > { %v794_v40 = vmul.f32 %v786_v25, %v1232_v34  ;;  %v386_v43 = vadd.f32 %v378_v27, %v366_v26  ;;  %v578_v48 = vmul.f32 %v962_v20, %v190_v21  ;;  %v653_v44 = vmul.f32 %v981_v36, %v189_v10 }
  0x6f   : > { %v732_v50 = vmul.f32 %v724_v31, %v724_v31  ;;  %v522_v18 = vsel %vm326_vm1, %v520_v29, %v521_v33  ;;  %v654_v51 = vmul.f32 %v981_v36, %v190_v21  ;;  %v550_v53 = vmul.f32 %v960_v19, %v189_v10 }
  0x70   : > { %802 = vst [vmem:[%s1163_s27 + $0x20] sm:$0xff] %v794_v40  ;;  %v462_v52 = vadd.f32 %v446_v30, %v386_v43  ;;  %v616_v54 = vrot.slane %v577_v46, 1  ;;  %v617_v55 = vrot.slane %v578_v48, 1  ;;  %v692_v34 = vrot.slane %v653_v44, 2 }
  0x71   : > { %v740_v56 = vmul.f32 %v732_v50, %v724_v31  ;;  %v693_v32 = vrot.slane %v654_v51, 2 }
  0x72   : > { %v538_v57 = vadd.f32 %v522_v18, %v462_v52  ;;  %v618_v20 = vsel %vm249_vm0, %v616_v54, %v617_v55 }
  0x73   : > { %v748_v58 = vmul.f32 0.044715, %v740_v56  ;;  %v694_v62 = vsel %vm326_vm1, %v692_v34, %v693_v32 }
  0x74   : > { %v558_v59 = vadd.f32 %v550_v53, %v538_v57 }
  0x75   : > { %v756_v61 = vadd.f32 %v748_v58, %v724_v31 }
  0x76   : > { %v634_v63 = vadd.f32 %v618_v20, %v558_v59 }
  0x77   : > { %v894_v36 = vpop.eup %893  ;;  %v764_v37 = vmul.f32 0.7978846, %v756_v61 }
  0x78   : > { %v779_v41 = vadd.f32 1.0, %v894_v36  ;;  %v710_v0 = vadd.f32 %v694_v62, %v634_v63 }
  0x79   : > { %895 = vtanh.f32 %v764_v37 }
  0x7a   : > { %v787_v19 = vmul.f32 0.5, %v779_v41  ;;  %v725_v1 = vadd.f32 %v1041_v47, %v710_v0 }
  0x7c   : > { %v795_v2 = vmul.f32 %v787_v19, %v1287_v49  ;;  %v733_v35 = vmul.f32 %v725_v1, %v725_v1 }
  0x7e   : > { %803 = vst [vmem:[%s1163_s27 + $0x28] sm:$0xff] %v795_v2  ;;  %v741_v45 = vmul.f32 %v733_v35, %v725_v1 }
  0x80   : > { %v749_v16 = vmul.f32 0.044715, %v741_v45 }
  0x82   : > { %v757_v11 = vadd.f32 %v749_v16, %v725_v1 }
  0x83   : > { %v896_v23 = vpop.eup %895 }
  0x84   : > { %v780_v3 = vadd.f32 1.0, %v896_v23  ;;  %v765_v4 = vmul.f32 0.7978846, %v757_v11 }
  0x86   : > { %v788_v27 = vmul.f32 0.5, %v780_v3  ;;  %897 = vtanh.f32 %v765_v4 }
  0x88   : > { %v796_v24 = vmul.f32 %v788_v27, %v724_v31 }
  0x8a   : > { %804 = vst [vmem:[%s1163_s27 + $0x30] sm:$0xff] %v796_v24 }
  0x90   : > { %v898_v5 = vpop.eup %897 }
  0x91   : > { %v781_v12 = vadd.f32 1.0, %v898_v5 }
  0x93   : > { %v789_v15 = vmul.f32 0.5, %v781_v12 }
  0x95   : > { %v797_v28 = vmul.f32 %v789_v15, %v725_v1 }
  0x97   : > { %805 = vst [vmem:[%s1163_s27 + $0x38] sm:$0xff] %v797_v28 }
  0x98 PF: > { %s13_s12 = sadd.s32 1, %s905_s12  }
  0x99   : > { %p10_p4 = scmp.ge.s32.totalorder %s13_s12, 4  }
  0x9b   :  { %12 = sbr.rel (!%p10_p4) target bundleno = 1 (0x1), region = 62 }

</bundles_post_ra>
